<compile_context>
chip_gen: v7x
topology: tpu7x:2x2x1
jax: 0.10.0
libtpu: 0.0.40
codegen_flags: <defaults>
</compile_context>

<pallas_src>
import jax
import jax.numpy as jnp
from jax import lax
from jax.experimental import pallas as pl
from jax.experimental.pallas import tpu as pltpu


DW_NAMES = ('5', '17', '71', '111', '11_1', '121', '21_1')
DW_SPECS = ((5, 5), (1, 7), (7, 1), (1, 11), (11, 1), (1, 21), (21, 1))


def _tap_offsets():
    offs = []
    off = 0
    for kh, kw in DW_SPECS:
        offs.append(off)
        off += kh * kw
    return offs, off


def _make_kernel(C, H, W, CB):
    HW = H * W
    R = CB * C
    offsets, TOTAL = _tap_offsets()
    BIAS_BASE = TOTAL

    def kernel(x_ref, pmat_ref, bmat_ref, w1_ref, b1_ref, ws_ref, bs_ref,
               mhw_ref, wc_ref, bc_ref, dwt_ref, out_ref):
        f32 = jnp.float32

        def dot(a, b):
            return jnp.dot(a, b, preferred_element_type=f32)

        x = x_ref[...]                                   # (R, HW) lane-dense slab

        # ---------------- CoordAtt: merged MXU dots ----------------
        pool = dot(x, pmat_ref[...])                     # (R, H+W)  [mean_W | mean_H]
        y = jnp.maximum(dot(w1_ref[...], pool) + b1_ref[...], 0.0)   # (CB*MIP, H+W)
        a = jax.nn.sigmoid(dot(ws_ref[...], y) + bs_ref[...]) * mhw_ref[...]  # (2R, H+W)
        attn = dot(a, bmat_ref[...])                     # (2R, HW): [ah_full ; aw_full]
        ah = attn[:R, :]
        aw = attn[R:, :]

        wc = wc_ref[...]
        bc = bc_ref[...]
        # channel_att_vec * inputs, then inputs = act(conv(inputs))  (1x1 on MXU)
        inp = jnp.maximum(dot(wc, x * x * ah * aw) + bc, 0.0)        # (R, HW)

        # ---------------- depthwise convs: roll -> table-mul -> add ----------------
        def tab(i):
            return dwt_ref[i]                            # (R, HW) weight*mask slab

        def shift(z, s):
            # out[:, p] = z[:, p + s] (wrap; precomputed table masks the edges)
            if s == 0:
                return z
            return pltpu.roll(z, shift=(-s) % HW, axis=1)

        # --- dconv5_5 on inp (4-way round-robin accumulators for VALU ILP) ---
        accs = [tab(BIAS_BASE + 0), None, None, None]
        t = 0
        for ki in range(5):
            for kj in range(5):
                s = (ki - 2) * W + (kj - 2)
                term = tab(offsets[0] + t) * shift(inp, s)
                j = t & 3
                accs[j] = term if accs[j] is None else accs[j] + term
                t += 1
        x_init = (accs[0] + accs[1]) + (accs[2] + accs[3])

        # --- shared horizontal sweep: 1x7 (conv1), 1x11 (conv3), 1x21 (conv5) ---
        x1 = tab(BIAS_BASE + 1)
        x2 = tab(BIAS_BASE + 3)
        x3 = tab(BIAS_BASE + 5)
        for dj in range(-10, 11):
            z = shift(x_init, dj)                        # one roll shared by 3 branches
            if abs(dj) <= 3:
                x1 = x1 + tab(offsets[1] + dj + 3) * z
            if abs(dj) <= 5:
                x2 = x2 + tab(offsets[3] + dj + 5) * z
            x3 = x3 + tab(offsets[5] + dj + 10) * z

        # --- vertical convs: 7x1 (conv2), 11x1 (conv4), 21x1 (conv6) ---
        def vconv(z, conv_idx, kh):
            pad = (kh - 1) // 2
            vacc = [tab(BIAS_BASE + conv_idx), None, None, None]
            for ki in range(kh):
                s = (ki - pad) * W
                term = tab(offsets[conv_idx] + ki) * shift(z, s)
                j = ki & 3
                vacc[j] = term if vacc[j] is None else vacc[j] + term
            acc = vacc[0]
            for v in vacc[1:]:
                if v is not None:
                    acc = acc + v
            return acc

        x1 = vconv(x1, 2, 7)
        x2 = vconv(x2, 4, 11)
        x3 = vconv(x3, 6, 21)

        xs = (x1 + x2) + (x3 + x_init)
        spatial_att = dot(wc, xs) + bc                   # conv(x)
        out_ref[...] = dot(wc, spatial_att * inp) + bc   # conv(spatial_att * inputs)

    return kernel


def _block_diag(w, cb):
    o, i = w.shape
    out = jnp.zeros((cb * o, cb * i), w.dtype)
    for b in range(cb):
        out = out.at[b * o:(b + 1) * o, b * i:(b + 1) * i].set(w)
    return out


def _build_dw_tables(p, C, H, W, CB):
    """(total_taps + 7, CB*C, HW) table: weight*edge-mask per tap, then 7 bias slabs."""
    HW = H * W
    f32 = jnp.float32
    ii = jnp.arange(HW)
    rr = ii // W
    cc = ii % W
    slabs = []
    for name, (kh, kw) in zip(DW_NAMES, DW_SPECS):
        w = p['w' + name]                                # (C, kh, kw)
        ph, pw = (kh - 1) // 2, (kw - 1) // 2
        for ki in range(kh):
            for kj in range(kw):
                di, dj = ki - ph, kj - pw
                ok = ((rr + di >= 0) & (rr + di < H)
                      & (cc + dj >= 0) & (cc + dj < W)).astype(f32)  # (HW,)
                slab = w[:, ki, kj][:, None] * ok[None, :]           # (C, HW)
                slabs.append(jnp.tile(slab, (CB, 1)))                # (R, HW)
    for name in DW_NAMES:
        b = p['b' + name]                                # (C,)
        slabs.append(jnp.tile(jnp.broadcast_to(b[:, None], (C, HW)), (CB, 1)))
    return jnp.stack(slabs, axis=0)


def dam1_pallas(x, p):
    N, C, H, W = x.shape
    HW = H * W
    f32 = jnp.float32

    # Fuse CB batch elements onto sublanes (8 rows per vreg).
    CB = max(1, 8 // C)
    if N % CB != 0:
        CB = 1
    R = CB * C
    NB = N // CB

    # ---- constant pooling / broadcast matrices (built once in the wrapper) ----
    ii = jnp.arange(HW)
    row = ii // W
    colv = ii % W
    ph_mat = (row[:, None] == jnp.arange(H)[None, :]).astype(f32) / W   # (HW, H)
    pw_mat = (colv[:, None] == jnp.arange(W)[None, :]).astype(f32) / H  # (HW, W)
    pmat = jnp.concatenate([ph_mat, pw_mat], axis=1)                    # (HW, H+W)
    bh_mat = (jnp.arange(H)[:, None] == row[None, :]).astype(f32)       # (H, HW)
    bw_mat = (jnp.arange(W)[:, None] == colv[None, :]).astype(f32)      # (W, HW)
    bmat = jnp.concatenate([bh_mat, bw_mat], axis=0)                    # (H+W, HW)

    # ---- CoordAtt weights: fold eval-mode BN, make block-diagonal per fused batch ----
    w1_f = p['w1'] * p['bn_s'][:, None]
    b1_f = p['b1'] * p['bn_s'] + p['bn_t']
    w1_bd = _block_diag(w1_f, CB)                                       # (CB*MIP, R)
    b1_bd = jnp.tile(b1_f, CB)[:, None]                                 # (CB*MIP, 1)
    wh_bd = _block_diag(p['wh'], CB)                                    # (R, CB*MIP)
    ww_bd = _block_diag(p['ww'], CB)
    ws = jnp.concatenate([wh_bd, ww_bd], axis=0)                        # (2R, CB*MIP)
    bs = jnp.concatenate([jnp.tile(p['bh'], CB),
                          jnp.tile(p['bw'], CB)])[:, None]              # (2R, 1)
    # validity mask: a_h rows use the first H columns, a_w rows the last W columns
    mhw = jnp.concatenate([
        jnp.concatenate([jnp.ones((R, H), f32), jnp.zeros((R, W), f32)], axis=1),
        jnp.concatenate([jnp.zeros((R, H), f32), jnp.ones((R, W), f32)], axis=1)],
        axis=0)                                                          # (2R, H+W)

    wc_bd = _block_diag(p['wc'], CB)                                    # (R, R)
    bc_bd = jnp.tile(p['bc'], CB)[:, None]                              # (R, 1)

    dwtab = _build_dw_tables(p, C, H, W, CB)                            # (taps+7, R, HW)

    weights = [pmat, bmat, w1_bd, b1_bd, ws, bs, mhw, wc_bd, bc_bd, dwtab]
    wspecs = [pl.BlockSpec(memory_space=pltpu.MemorySpace.VMEM) for _ in weights]

    kernel = _make_kernel(C, H, W, CB)
    out = pl.pallas_call(
        kernel,
        out_shape=jax.ShapeDtypeStruct((NB, R, HW), f32),
        grid=(NB,),
        in_specs=[pl.BlockSpec((None, R, HW), lambda n: (n, 0, 0))] + wspecs,
        out_specs=pl.BlockSpec((None, R, HW), lambda n: (n, 0, 0)),
        compiler_params=pltpu.CompilerParams(
            dimension_semantics=("parallel",)),   # shards batch-blocks across TCs
    )(x.reshape(NB, R, HW), *weights)
    return out.reshape(N, C, H, W)


# ---------------- pure-JAX reference (for correctness check) ----------------
def ref_dam1(x, p):
    C = x.shape[1]
    HIGH = lax.Precision.HIGHEST

    def conv1x1(z, w, b):
        return jnp.einsum('oc,nchw->nohw', w, z, precision=HIGH) + b[None, :, None, None]

    def dwconv(z, w_oihw, b, pad):
        y = lax.conv_general_dilated(
            z, w_oihw, window_strides=(1, 1), padding=[pad[0], pad[1]],
            dimension_numbers=('NCHW', 'OIHW', 'NCHW'),
            feature_group_count=C, precision=HIGH)
        return y + b[None, :, None, None]

    ph = jnp.mean(x, axis=3, keepdims=True)      # (N,C,H,1)
    pw = jnp.mean(x, axis=2, keepdims=True)      # (N,C,1,W)

    def mlp(pool):
        y = jnp.einsum('mc,nchw->nmhw', p['w1'], pool, precision=HIGH) + p['b1'][None, :, None, None]
        y = y * p['bn_s'][None, :, None, None] + p['bn_t'][None, :, None, None]
        return jnp.maximum(y, 0.0)

    yh = mlp(ph)
    yw = mlp(pw)
    a_h = jax.nn.sigmoid(jnp.einsum('om,nmhw->nohw', p['wh'], yh, precision=HIGH) + p['bh'][None, :, None, None])
    a_w = jax.nn.sigmoid(jnp.einsum('om,nmhw->nohw', p['ww'], yw, precision=HIGH) + p['bw'][None, :, None, None])
    ca_out = x * a_w * a_h

    inp = ca_out * x
    inp = jnp.maximum(conv1x1(inp, p['wc'], p['bc']), 0.0)

    x_init = dwconv(inp, p['w5_r'], p['b5'], ((2, 2), (2, 2)))
    x1 = dwconv(dwconv(x_init, p['w17_r'], p['b17'], ((0, 0), (3, 3))),
                p['w71_r'], p['b71'], ((3, 3), (0, 0)))
    x2 = dwconv(dwconv(x_init, p['w111_r'], p['b111'], ((0, 0), (5, 5))),
                p['w11_1_r'], p['b11_1'], ((5, 5), (0, 0)))
    x3 = dwconv(dwconv(x_init, p['w121_r'], p['b121'], ((0, 0), (10, 10))),
                p['w21_1_r'], p['b21_1'], ((10, 10), (0, 0)))
    xs = x1 + x2 + x3 + x_init
    att = conv1x1(xs, p['wc'], p['bc'])
    out = conv1x1(att * inp, p['wc'], p['bc'])
    return out


if __name__ == "__main__":
    N, C, H, W = 2, 4, 16, 16          # DAM1(in_channels=4, ou_channels=4)
    MIP = max(8, C // 32)              # CoordAtt hidden width
    f32 = jnp.float32

    keys = iter(jax.random.split(jax.random.PRNGKey(0), 40))

    def nrm(shape, scale):
        return scale * jax.random.normal(next(keys), shape, dtype=f32)

    p = {}
    # CoordAtt parameters
    p['w1'] = nrm((MIP, C), 0.4)
    p['b1'] = nrm((MIP,), 0.1)
    gamma = 1.0 + nrm((MIP,), 0.1)
    beta = nrm((MIP,), 0.1)
    rmean = nrm((MIP,), 0.1)
    rvar = jnp.abs(nrm((MIP,), 0.3)) + 0.5
    p['bn_s'] = gamma / jnp.sqrt(rvar + 1e-5)
    p['bn_t'] = beta - rmean * p['bn_s']
    p['wh'] = nrm((C, MIP), 0.3)
    p['bh'] = nrm((C,), 0.1)
    p['ww'] = nrm((C, MIP), 0.3)
    p['bw'] = nrm((C,), 0.1)
    # shared 1x1 conv
    p['wc'] = nrm((C, C), 0.4)
    p['bc'] = nrm((C,), 0.1)
    # depthwise convs
    for name, (kh, kw) in zip(DW_NAMES, DW_SPECS):
        base = nrm((C, kh, kw), 0.15)
        bias = nrm((C,), 0.05)
        p['w' + name] = base                              # kernel layout source
        p['w%s_r' % name] = base.reshape(C, 1, kh, kw)    # reference (OIHW) layout
        p['b' + name] = bias

    x = jax.random.normal(next(keys), (N, C, H, W), dtype=f32)

    out = jax.block_until_ready(dam1_pallas(x, p))

    ref = ref_dam1(x, p)
    err = float(jnp.max(jnp.abs(out - ref)))
    assert out.shape == (N, C, H, W)
    assert jnp.allclose(out, ref, atol=2e-3, rtol=2e-3), f"max abs err {err}"
    print("KERNEL_OK")
</pallas_src>

<mosaic_0001>
module attributes {stable_mosaic.version = 11 : i64} {
  func.func @kernel(%arg0: i32, %arg1: memref<1x8x256xf32, #tpu.memory_space<vmem>>, %arg2: memref<256x32xf32, #tpu.memory_space<vmem>>, %arg3: memref<32x256xf32, #tpu.memory_space<vmem>>, %arg4: memref<16x8xf32, #tpu.memory_space<vmem>>, %arg5: memref<16x1xf32, #tpu.memory_space<vmem>>, %arg6: memref<16x16xf32, #tpu.memory_space<vmem>>, %arg7: memref<16x1xf32, #tpu.memory_space<vmem>>, %arg8: memref<16x32xf32, #tpu.memory_space<vmem>>, %arg9: memref<8x8xf32, #tpu.memory_space<vmem>>, %arg10: memref<8x1xf32, #tpu.memory_space<vmem>>, %arg11: memref<110x8x256xf32, #tpu.memory_space<vmem>>, %arg12: memref<1x8x256xf32, #tpu.memory_space<vmem>>) attributes {dimension_semantics = [#tpu.dimension_semantics<parallel>], iteration_bounds = array<i64: 1>, scalar_prefetch = 0 : i64, scratch_operands = 0 : i64, tpu.core_type = #tpu.core_type<tc>, window_params = [{transform_indices = @transform_0, window_bounds = array<i64: 1, 8, 256>}, {pipeline_mode = #tpu.pipeline_mode<synchronous>, transform_indices = @transform_1, window_bounds = array<i64: 256, 32>}, {pipeline_mode = #tpu.pipeline_mode<synchronous>, transform_indices = @transform_2, window_bounds = array<i64: 32, 256>}, {pipeline_mode = #tpu.pipeline_mode<synchronous>, transform_indices = @transform_3, window_bounds = array<i64: 16, 8>}, {pipeline_mode = #tpu.pipeline_mode<synchronous>, transform_indices = @transform_4, window_bounds = array<i64: 16, 1>}, {pipeline_mode = #tpu.pipeline_mode<synchronous>, transform_indices = @transform_5, window_bounds = array<i64: 16, 16>}, {pipeline_mode = #tpu.pipeline_mode<synchronous>, transform_indices = @transform_6, window_bounds = array<i64: 16, 1>}, {pipeline_mode = #tpu.pipeline_mode<synchronous>, transform_indices = @transform_7, window_bounds = array<i64: 16, 32>}, {pipeline_mode = #tpu.pipeline_mode<synchronous>, transform_indices = @transform_8, window_bounds = array<i64: 8, 8>}, {pipeline_mode = #tpu.pipeline_mode<synchronous>, transform_indices = @transform_9, window_bounds = array<i64: 8, 1>}, {pipeline_mode = #tpu.pipeline_mode<synchronous>, transform_indices = @transform_10, window_bounds = array<i64: 110, 8, 256>}, {transform_indices = @transform_11, window_bounds = array<i64: 1, 8, 256>}]} {
    %c0 = arith.constant 0 : index
    %c0_0 = arith.constant 0 : index
    %c0_1 = arith.constant 0 : index
    %0 = vector.load %arg1[%c0, %c0_0, %c0_1] : memref<1x8x256xf32, #tpu.memory_space<vmem>>, vector<1x8x256xf32>
    %1 = vector.shape_cast %0 : vector<1x8x256xf32> to vector<8x256xf32>
    %c0_2 = arith.constant 0 : index
    %c0_3 = arith.constant 0 : index
    %2 = vector.load %arg2[%c0_2, %c0_3] : memref<256x32xf32, #tpu.memory_space<vmem>>, vector<256x32xf32>
    %cst = arith.constant dense<0.000000e+00> : vector<8x32xf32>
    %3 = tpu.matmul %1, %2, %cst {dimension_numbers = #tpu.dot_dimension_numbers<[1], [0], [0], [1], [0, 0, 1, 1], [], []>} : vector<8x256xf32>, vector<256x32xf32>, vector<8x32xf32> -> vector<8x32xf32>
    %c0_4 = arith.constant 0 : index
    %c0_5 = arith.constant 0 : index
    %4 = vector.load %arg4[%c0_4, %c0_5] : memref<16x8xf32, #tpu.memory_space<vmem>>, vector<16x8xf32>
    %cst_6 = arith.constant dense<0.000000e+00> : vector<16x32xf32>
    %5 = tpu.matmul %4, %3, %cst_6 {dimension_numbers = #tpu.dot_dimension_numbers<[1], [0], [0], [1], [0, 0, 1, 1], [], []>} : vector<16x8xf32>, vector<8x32xf32>, vector<16x32xf32> -> vector<16x32xf32>
    %c0_7 = arith.constant 0 : index
    %c0_8 = arith.constant 0 : index
    %6 = vector.load %arg5[%c0_7, %c0_8] : memref<16x1xf32, #tpu.memory_space<vmem>>, vector<16x1xf32>
    %7 = vector.broadcast %6 : vector<16x1xf32> to vector<16x32xf32>
    %8 = arith.addf %5, %7 : vector<16x32xf32>
    %cst_9 = arith.constant 0.000000e+00 : f32
    %9 = vector.broadcast %cst_9 : f32 to vector<16x32xf32>
    %10 = arith.maximumf %8, %9 : vector<16x32xf32>
    %c0_10 = arith.constant 0 : index
    %c0_11 = arith.constant 0 : index
    %11 = vector.load %arg6[%c0_10, %c0_11] : memref<16x16xf32, #tpu.memory_space<vmem>>, vector<16x16xf32>
    %cst_12 = arith.constant dense<0.000000e+00> : vector<16x32xf32>
    %12 = tpu.matmul %11, %10, %cst_12 {dimension_numbers = #tpu.dot_dimension_numbers<[1], [0], [0], [1], [0, 0, 1, 1], [], []>} : vector<16x16xf32>, vector<16x32xf32>, vector<16x32xf32> -> vector<16x32xf32>
    %c0_13 = arith.constant 0 : index
    %c0_14 = arith.constant 0 : index
    %13 = vector.load %arg7[%c0_13, %c0_14] : memref<16x1xf32, #tpu.memory_space<vmem>>, vector<16x1xf32>
    %14 = vector.broadcast %13 : vector<16x1xf32> to vector<16x32xf32>
    %15 = arith.addf %12, %14 : vector<16x32xf32>
    %16 = arith.negf %15 : vector<16x32xf32>
    %17 = math.exp %16 : vector<16x32xf32>
    %cst_15 = arith.constant 1.000000e+00 : f32
    %18 = vector.broadcast %cst_15 : f32 to vector<16x32xf32>
    %19 = arith.addf %18, %17 : vector<16x32xf32>
    %20 = arith.divf %18, %19 : vector<16x32xf32>
    %c0_16 = arith.constant 0 : index
    %c0_17 = arith.constant 0 : index
    %21 = vector.load %arg8[%c0_16, %c0_17] : memref<16x32xf32, #tpu.memory_space<vmem>>, vector<16x32xf32>
    %22 = arith.mulf %20, %21 : vector<16x32xf32>
    %c0_18 = arith.constant 0 : index
    %c0_19 = arith.constant 0 : index
    %23 = vector.load %arg3[%c0_18, %c0_19] : memref<32x256xf32, #tpu.memory_space<vmem>>, vector<32x256xf32>
    %cst_20 = arith.constant dense<0.000000e+00> : vector<16x256xf32>
    %24 = tpu.matmul %22, %23, %cst_20 {dimension_numbers = #tpu.dot_dimension_numbers<[1], [0], [0], [1], [0, 0, 1, 1], [], []>} : vector<16x32xf32>, vector<32x256xf32>, vector<16x256xf32> -> vector<16x256xf32>
    %25 = vector.extract_strided_slice %24 {offsets = [0, 0], sizes = [8, 256], strides = [1, 1]} : vector<16x256xf32> to vector<8x256xf32>
    %26 = vector.extract_strided_slice %24 {offsets = [8, 0], sizes = [8, 256], strides = [1, 1]} : vector<16x256xf32> to vector<8x256xf32>
    %c0_21 = arith.constant 0 : index
    %c0_22 = arith.constant 0 : index
    %27 = vector.load %arg9[%c0_21, %c0_22] : memref<8x8xf32, #tpu.memory_space<vmem>>, vector<8x8xf32>
    %c0_23 = arith.constant 0 : index
    %c0_24 = arith.constant 0 : index
    %28 = vector.load %arg10[%c0_23, %c0_24] : memref<8x1xf32, #tpu.memory_space<vmem>>, vector<8x1xf32>
    %29 = arith.mulf %1, %1 : vector<8x256xf32>
    %30 = arith.mulf %29, %25 : vector<8x256xf32>
    %31 = arith.mulf %30, %26 : vector<8x256xf32>
    %cst_25 = arith.constant dense<0.000000e+00> : vector<8x256xf32>
    %32 = tpu.matmul %27, %31, %cst_25 {dimension_numbers = #tpu.dot_dimension_numbers<[1], [0], [0], [1], [0, 0, 1, 1], [], []>} : vector<8x8xf32>, vector<8x256xf32>, vector<8x256xf32> -> vector<8x256xf32>
    %33 = vector.broadcast %28 : vector<8x1xf32> to vector<8x256xf32>
    %34 = arith.addf %32, %33 : vector<8x256xf32>
    %cst_26 = arith.constant 0.000000e+00 : f32
    %35 = vector.broadcast %cst_26 : f32 to vector<8x256xf32>
    %36 = arith.maximumf %34, %35 : vector<8x256xf32>
    %c103 = arith.constant 103 : index
    %c0_27 = arith.constant 0 : index
    %c0_28 = arith.constant 0 : index
    %37 = vector.load %arg11[%c103, %c0_27, %c0_28] : memref<110x8x256xf32, #tpu.memory_space<vmem>>, vector<1x8x256xf32>
    %38 = vector.shape_cast %37 : vector<1x8x256xf32> to vector<8x256xf32>
    %c0_29 = arith.constant 0 : index
    %c0_30 = arith.constant 0 : index
    %c0_31 = arith.constant 0 : index
    %39 = vector.load %arg11[%c0_29, %c0_30, %c0_31] : memref<110x8x256xf32, #tpu.memory_space<vmem>>, vector<1x8x256xf32>
    %40 = vector.shape_cast %39 : vector<1x8x256xf32> to vector<8x256xf32>
    %c34_i32 = arith.constant 34 : i32
    %41 = tpu.dynamic_rotate %36 by %c34_i32 dim 1 : vector<8x256xf32>, i32 -> vector<8x256xf32>
    %42 = arith.mulf %40, %41 : vector<8x256xf32>
    %43 = arith.addf %38, %42 : vector<8x256xf32>
    %c1 = arith.constant 1 : index
    %c0_32 = arith.constant 0 : index
    %c0_33 = arith.constant 0 : index
    %44 = vector.load %arg11[%c1, %c0_32, %c0_33] : memref<110x8x256xf32, #tpu.memory_space<vmem>>, vector<1x8x256xf32>
    %45 = vector.shape_cast %44 : vector<1x8x256xf32> to vector<8x256xf32>
    %c33_i32 = arith.constant 33 : i32
    %46 = tpu.dynamic_rotate %36 by %c33_i32 dim 1 : vector<8x256xf32>, i32 -> vector<8x256xf32>
    %47 = arith.mulf %45, %46 : vector<8x256xf32>
    %c2 = arith.constant 2 : index
    %c0_34 = arith.constant 0 : index
    %c0_35 = arith.constant 0 : index
    %48 = vector.load %arg11[%c2, %c0_34, %c0_35] : memref<110x8x256xf32, #tpu.memory_space<vmem>>, vector<1x8x256xf32>
    %49 = vector.shape_cast %48 : vector<1x8x256xf32> to vector<8x256xf32>
    %c32_i32 = arith.constant 32 : i32
    %50 = tpu.dynamic_rotate %36 by %c32_i32 dim 1 : vector<8x256xf32>, i32 -> vector<8x256xf32>
    %51 = arith.mulf %49, %50 : vector<8x256xf32>
    %c3 = arith.constant 3 : index
    %c0_36 = arith.constant 0 : index
    %c0_37 = arith.constant 0 : index
    %52 = vector.load %arg11[%c3, %c0_36, %c0_37] : memref<110x8x256xf32, #tpu.memory_space<vmem>>, vector<1x8x256xf32>
    %53 = vector.shape_cast %52 : vector<1x8x256xf32> to vector<8x256xf32>
    %c31_i32 = arith.constant 31 : i32
    %54 = tpu.dynamic_rotate %36 by %c31_i32 dim 1 : vector<8x256xf32>, i32 -> vector<8x256xf32>
    %55 = arith.mulf %53, %54 : vector<8x256xf32>
    %c4 = arith.constant 4 : index
    %c0_38 = arith.constant 0 : index
    %c0_39 = arith.constant 0 : index
    %56 = vector.load %arg11[%c4, %c0_38, %c0_39] : memref<110x8x256xf32, #tpu.memory_space<vmem>>, vector<1x8x256xf32>
    %57 = vector.shape_cast %56 : vector<1x8x256xf32> to vector<8x256xf32>
    %c30_i32 = arith.constant 30 : i32
    %58 = tpu.dynamic_rotate %36 by %c30_i32 dim 1 : vector<8x256xf32>, i32 -> vector<8x256xf32>
    %59 = arith.mulf %57, %58 : vector<8x256xf32>
    %60 = arith.addf %43, %59 : vector<8x256xf32>
    %c5 = arith.constant 5 : index
    %c0_40 = arith.constant 0 : index
    %c0_41 = arith.constant 0 : index
    %61 = vector.load %arg11[%c5, %c0_40, %c0_41] : memref<110x8x256xf32, #tpu.memory_space<vmem>>, vector<1x8x256xf32>
    %62 = vector.shape_cast %61 : vector<1x8x256xf32> to vector<8x256xf32>
    %c18_i32 = arith.constant 18 : i32
    %63 = tpu.dynamic_rotate %36 by %c18_i32 dim 1 : vector<8x256xf32>, i32 -> vector<8x256xf32>
    %64 = arith.mulf %62, %63 : vector<8x256xf32>
    %65 = arith.addf %47, %64 : vector<8x256xf32>
    %c6 = arith.constant 6 : index
    %c0_42 = arith.constant 0 : index
    %c0_43 = arith.constant 0 : index
    %66 = vector.load %arg11[%c6, %c0_42, %c0_43] : memref<110x8x256xf32, #tpu.memory_space<vmem>>, vector<1x8x256xf32>
    %67 = vector.shape_cast %66 : vector<1x8x256xf32> to vector<8x256xf32>
    %c17_i32 = arith.constant 17 : i32
    %68 = tpu.dynamic_rotate %36 by %c17_i32 dim 1 : vector<8x256xf32>, i32 -> vector<8x256xf32>
    %69 = arith.mulf %67, %68 : vector<8x256xf32>
    %70 = arith.addf %51, %69 : vector<8x256xf32>
    %c7 = arith.constant 7 : index
    %c0_44 = arith.constant 0 : index
    %c0_45 = arith.constant 0 : index
    %71 = vector.load %arg11[%c7, %c0_44, %c0_45] : memref<110x8x256xf32, #tpu.memory_space<vmem>>, vector<1x8x256xf32>
    %72 = vector.shape_cast %71 : vector<1x8x256xf32> to vector<8x256xf32>
    %c16_i32 = arith.constant 16 : i32
    %73 = tpu.dynamic_rotate %36 by %c16_i32 dim 1 : vector<8x256xf32>, i32 -> vector<8x256xf32>
    %74 = arith.mulf %72, %73 : vector<8x256xf32>
    %75 = arith.addf %55, %74 : vector<8x256xf32>
    %c8 = arith.constant 8 : index
    %c0_46 = arith.constant 0 : index
    %c0_47 = arith.constant 0 : index
    %76 = vector.load %arg11[%c8, %c0_46, %c0_47] : memref<110x8x256xf32, #tpu.memory_space<vmem>>, vector<1x8x256xf32>
    %77 = vector.shape_cast %76 : vector<1x8x256xf32> to vector<8x256xf32>
    %c15_i32 = arith.constant 15 : i32
    %78 = tpu.dynamic_rotate %36 by %c15_i32 dim 1 : vector<8x256xf32>, i32 -> vector<8x256xf32>
    %79 = arith.mulf %77, %78 : vector<8x256xf32>
    %80 = arith.addf %60, %79 : vector<8x256xf32>
    %c9 = arith.constant 9 : index
    %c0_48 = arith.constant 0 : index
    %c0_49 = arith.constant 0 : index
    %81 = vector.load %arg11[%c9, %c0_48, %c0_49] : memref<110x8x256xf32, #tpu.memory_space<vmem>>, vector<1x8x256xf32>
    %82 = vector.shape_cast %81 : vector<1x8x256xf32> to vector<8x256xf32>
    %c14_i32 = arith.constant 14 : i32
    %83 = tpu.dynamic_rotate %36 by %c14_i32 dim 1 : vector<8x256xf32>, i32 -> vector<8x256xf32>
    %84 = arith.mulf %82, %83 : vector<8x256xf32>
    %85 = arith.addf %65, %84 : vector<8x256xf32>
    %c10 = arith.constant 10 : index
    %c0_50 = arith.constant 0 : index
    %c0_51 = arith.constant 0 : index
    %86 = vector.load %arg11[%c10, %c0_50, %c0_51] : memref<110x8x256xf32, #tpu.memory_space<vmem>>, vector<1x8x256xf32>
    %87 = vector.shape_cast %86 : vector<1x8x256xf32> to vector<8x256xf32>
    %c2_i32 = arith.constant 2 : i32
    %88 = tpu.dynamic_rotate %36 by %c2_i32 dim 1 : vector<8x256xf32>, i32 -> vector<8x256xf32>
    %89 = arith.mulf %87, %88 : vector<8x256xf32>
    %90 = arith.addf %70, %89 : vector<8x256xf32>
    %c11 = arith.constant 11 : index
    %c0_52 = arith.constant 0 : index
    %c0_53 = arith.constant 0 : index
    %91 = vector.load %arg11[%c11, %c0_52, %c0_53] : memref<110x8x256xf32, #tpu.memory_space<vmem>>, vector<1x8x256xf32>
    %92 = vector.shape_cast %91 : vector<1x8x256xf32> to vector<8x256xf32>
    %c1_i32 = arith.constant 1 : i32
    %93 = tpu.dynamic_rotate %36 by %c1_i32 dim 1 : vector<8x256xf32>, i32 -> vector<8x256xf32>
    %94 = arith.mulf %92, %93 : vector<8x256xf32>
    %95 = arith.addf %75, %94 : vector<8x256xf32>
    %c12 = arith.constant 12 : index
    %c0_54 = arith.constant 0 : index
    %c0_55 = arith.constant 0 : index
    %96 = vector.load %arg11[%c12, %c0_54, %c0_55] : memref<110x8x256xf32, #tpu.memory_space<vmem>>, vector<1x8x256xf32>
    %97 = vector.shape_cast %96 : vector<1x8x256xf32> to vector<8x256xf32>
    %98 = arith.mulf %97, %36 : vector<8x256xf32>
    %99 = arith.addf %80, %98 : vector<8x256xf32>
    %c13 = arith.constant 13 : index
    %c0_56 = arith.constant 0 : index
    %c0_57 = arith.constant 0 : index
    %100 = vector.load %arg11[%c13, %c0_56, %c0_57] : memref<110x8x256xf32, #tpu.memory_space<vmem>>, vector<1x8x256xf32>
    %101 = vector.shape_cast %100 : vector<1x8x256xf32> to vector<8x256xf32>
    %c255_i32 = arith.constant 255 : i32
    %102 = tpu.dynamic_rotate %36 by %c255_i32 dim 1 : vector<8x256xf32>, i32 -> vector<8x256xf32>
    %103 = arith.mulf %101, %102 : vector<8x256xf32>
    %104 = arith.addf %85, %103 : vector<8x256xf32>
    %c14 = arith.constant 14 : index
    %c0_58 = arith.constant 0 : index
    %c0_59 = arith.constant 0 : index
    %105 = vector.load %arg11[%c14, %c0_58, %c0_59] : memref<110x8x256xf32, #tpu.memory_space<vmem>>, vector<1x8x256xf32>
    %106 = vector.shape_cast %105 : vector<1x8x256xf32> to vector<8x256xf32>
    %c254_i32 = arith.constant 254 : i32
    %107 = tpu.dynamic_rotate %36 by %c254_i32 dim 1 : vector<8x256xf32>, i32 -> vector<8x256xf32>
    %108 = arith.mulf %106, %107 : vector<8x256xf32>
    %109 = arith.addf %90, %108 : vector<8x256xf32>
    %c15 = arith.constant 15 : index
    %c0_60 = arith.constant 0 : index
    %c0_61 = arith.constant 0 : index
    %110 = vector.load %arg11[%c15, %c0_60, %c0_61] : memref<110x8x256xf32, #tpu.memory_space<vmem>>, vector<1x8x256xf32>
    %111 = vector.shape_cast %110 : vector<1x8x256xf32> to vector<8x256xf32>
    %c242_i32 = arith.constant 242 : i32
    %112 = tpu.dynamic_rotate %36 by %c242_i32 dim 1 : vector<8x256xf32>, i32 -> vector<8x256xf32>
    %113 = arith.mulf %111, %112 : vector<8x256xf32>
    %114 = arith.addf %95, %113 : vector<8x256xf32>
    %c16 = arith.constant 16 : index
    %c0_62 = arith.constant 0 : index
    %c0_63 = arith.constant 0 : index
    %115 = vector.load %arg11[%c16, %c0_62, %c0_63] : memref<110x8x256xf32, #tpu.memory_space<vmem>>, vector<1x8x256xf32>
    %116 = vector.shape_cast %115 : vector<1x8x256xf32> to vector<8x256xf32>
    %c241_i32 = arith.constant 241 : i32
    %117 = tpu.dynamic_rotate %36 by %c241_i32 dim 1 : vector<8x256xf32>, i32 -> vector<8x256xf32>
    %118 = arith.mulf %116, %117 : vector<8x256xf32>
    %119 = arith.addf %99, %118 : vector<8x256xf32>
    %c17 = arith.constant 17 : index
    %c0_64 = arith.constant 0 : index
    %c0_65 = arith.constant 0 : index
    %120 = vector.load %arg11[%c17, %c0_64, %c0_65] : memref<110x8x256xf32, #tpu.memory_space<vmem>>, vector<1x8x256xf32>
    %121 = vector.shape_cast %120 : vector<1x8x256xf32> to vector<8x256xf32>
    %c240_i32 = arith.constant 240 : i32
    %122 = tpu.dynamic_rotate %36 by %c240_i32 dim 1 : vector<8x256xf32>, i32 -> vector<8x256xf32>
    %123 = arith.mulf %121, %122 : vector<8x256xf32>
    %124 = arith.addf %104, %123 : vector<8x256xf32>
    %c18 = arith.constant 18 : index
    %c0_66 = arith.constant 0 : index
    %c0_67 = arith.constant 0 : index
    %125 = vector.load %arg11[%c18, %c0_66, %c0_67] : memref<110x8x256xf32, #tpu.memory_space<vmem>>, vector<1x8x256xf32>
    %126 = vector.shape_cast %125 : vector<1x8x256xf32> to vector<8x256xf32>
    %c239_i32 = arith.constant 239 : i32
    %127 = tpu.dynamic_rotate %36 by %c239_i32 dim 1 : vector<8x256xf32>, i32 -> vector<8x256xf32>
    %128 = arith.mulf %126, %127 : vector<8x256xf32>
    %129 = arith.addf %109, %128 : vector<8x256xf32>
    %c19 = arith.constant 19 : index
    %c0_68 = arith.constant 0 : index
    %c0_69 = arith.constant 0 : index
    %130 = vector.load %arg11[%c19, %c0_68, %c0_69] : memref<110x8x256xf32, #tpu.memory_space<vmem>>, vector<1x8x256xf32>
    %131 = vector.shape_cast %130 : vector<1x8x256xf32> to vector<8x256xf32>
    %c238_i32 = arith.constant 238 : i32
    %132 = tpu.dynamic_rotate %36 by %c238_i32 dim 1 : vector<8x256xf32>, i32 -> vector<8x256xf32>
    %133 = arith.mulf %131, %132 : vector<8x256xf32>
    %134 = arith.addf %114, %133 : vector<8x256xf32>
    %c20 = arith.constant 20 : index
    %c0_70 = arith.constant 0 : index
    %c0_71 = arith.constant 0 : index
    %135 = vector.load %arg11[%c20, %c0_70, %c0_71] : memref<110x8x256xf32, #tpu.memory_space<vmem>>, vector<1x8x256xf32>
    %136 = vector.shape_cast %135 : vector<1x8x256xf32> to vector<8x256xf32>
    %c226_i32 = arith.constant 226 : i32
    %137 = tpu.dynamic_rotate %36 by %c226_i32 dim 1 : vector<8x256xf32>, i32 -> vector<8x256xf32>
    %138 = arith.mulf %136, %137 : vector<8x256xf32>
    %139 = arith.addf %119, %138 : vector<8x256xf32>
    %c21 = arith.constant 21 : index
    %c0_72 = arith.constant 0 : index
    %c0_73 = arith.constant 0 : index
    %140 = vector.load %arg11[%c21, %c0_72, %c0_73] : memref<110x8x256xf32, #tpu.memory_space<vmem>>, vector<1x8x256xf32>
    %141 = vector.shape_cast %140 : vector<1x8x256xf32> to vector<8x256xf32>
    %c225_i32 = arith.constant 225 : i32
    %142 = tpu.dynamic_rotate %36 by %c225_i32 dim 1 : vector<8x256xf32>, i32 -> vector<8x256xf32>
    %143 = arith.mulf %141, %142 : vector<8x256xf32>
    %144 = arith.addf %124, %143 : vector<8x256xf32>
    %c22 = arith.constant 22 : index
    %c0_74 = arith.constant 0 : index
    %c0_75 = arith.constant 0 : index
    %145 = vector.load %arg11[%c22, %c0_74, %c0_75] : memref<110x8x256xf32, #tpu.memory_space<vmem>>, vector<1x8x256xf32>
    %146 = vector.shape_cast %145 : vector<1x8x256xf32> to vector<8x256xf32>
    %c224_i32 = arith.constant 224 : i32
    %147 = tpu.dynamic_rotate %36 by %c224_i32 dim 1 : vector<8x256xf32>, i32 -> vector<8x256xf32>
    %148 = arith.mulf %146, %147 : vector<8x256xf32>
    %149 = arith.addf %129, %148 : vector<8x256xf32>
    %c23 = arith.constant 23 : index
    %c0_76 = arith.constant 0 : index
    %c0_77 = arith.constant 0 : index
    %150 = vector.load %arg11[%c23, %c0_76, %c0_77] : memref<110x8x256xf32, #tpu.memory_space<vmem>>, vector<1x8x256xf32>
    %151 = vector.shape_cast %150 : vector<1x8x256xf32> to vector<8x256xf32>
    %c223_i32 = arith.constant 223 : i32
    %152 = tpu.dynamic_rotate %36 by %c223_i32 dim 1 : vector<8x256xf32>, i32 -> vector<8x256xf32>
    %153 = arith.mulf %151, %152 : vector<8x256xf32>
    %154 = arith.addf %134, %153 : vector<8x256xf32>
    %c24 = arith.constant 24 : index
    %c0_78 = arith.constant 0 : index
    %c0_79 = arith.constant 0 : index
    %155 = vector.load %arg11[%c24, %c0_78, %c0_79] : memref<110x8x256xf32, #tpu.memory_space<vmem>>, vector<1x8x256xf32>
    %156 = vector.shape_cast %155 : vector<1x8x256xf32> to vector<8x256xf32>
    %c222_i32 = arith.constant 222 : i32
    %157 = tpu.dynamic_rotate %36 by %c222_i32 dim 1 : vector<8x256xf32>, i32 -> vector<8x256xf32>
    %158 = arith.mulf %156, %157 : vector<8x256xf32>
    %159 = arith.addf %139, %158 : vector<8x256xf32>
    %160 = arith.addf %159, %144 : vector<8x256xf32>
    %161 = arith.addf %149, %154 : vector<8x256xf32>
    %162 = arith.addf %160, %161 : vector<8x256xf32>
    %c104 = arith.constant 104 : index
    %c0_80 = arith.constant 0 : index
    %c0_81 = arith.constant 0 : index
    %163 = vector.load %arg11[%c104, %c0_80, %c0_81] : memref<110x8x256xf32, #tpu.memory_space<vmem>>, vector<1x8x256xf32>
    %164 = vector.shape_cast %163 : vector<1x8x256xf32> to vector<8x256xf32>
    %c106 = arith.constant 106 : index
    %c0_82 = arith.constant 0 : index
    %c0_83 = arith.constant 0 : index
    %165 = vector.load %arg11[%c106, %c0_82, %c0_83] : memref<110x8x256xf32, #tpu.memory_space<vmem>>, vector<1x8x256xf32>
    %166 = vector.shape_cast %165 : vector<1x8x256xf32> to vector<8x256xf32>
    %c108 = arith.constant 108 : index
    %c0_84 = arith.constant 0 : index
    %c0_85 = arith.constant 0 : index
    %167 = vector.load %arg11[%c108, %c0_84, %c0_85] : memref<110x8x256xf32, #tpu.memory_space<vmem>>, vector<1x8x256xf32>
    %168 = vector.shape_cast %167 : vector<1x8x256xf32> to vector<8x256xf32>
    %c10_i32 = arith.constant 10 : i32
    %169 = tpu.dynamic_rotate %162 by %c10_i32 dim 1 : vector<8x256xf32>, i32 -> vector<8x256xf32>
    %c61 = arith.constant 61 : index
    %c0_86 = arith.constant 0 : index
    %c0_87 = arith.constant 0 : index
    %170 = vector.load %arg11[%c61, %c0_86, %c0_87] : memref<110x8x256xf32, #tpu.memory_space<vmem>>, vector<1x8x256xf32>
    %171 = vector.shape_cast %170 : vector<1x8x256xf32> to vector<8x256xf32>
    %172 = arith.mulf %171, %169 : vector<8x256xf32>
    %173 = arith.addf %168, %172 : vector<8x256xf32>
    %c9_i32 = arith.constant 9 : i32
    %174 = tpu.dynamic_rotate %162 by %c9_i32 dim 1 : vector<8x256xf32>, i32 -> vector<8x256xf32>
    %c62 = arith.constant 62 : index
    %c0_88 = arith.constant 0 : index
    %c0_89 = arith.constant 0 : index
    %175 = vector.load %arg11[%c62, %c0_88, %c0_89] : memref<110x8x256xf32, #tpu.memory_space<vmem>>, vector<1x8x256xf32>
    %176 = vector.shape_cast %175 : vector<1x8x256xf32> to vector<8x256xf32>
    %177 = arith.mulf %176, %174 : vector<8x256xf32>
    %178 = arith.addf %173, %177 : vector<8x256xf32>
    %c8_i32 = arith.constant 8 : i32
    %179 = tpu.dynamic_rotate %162 by %c8_i32 dim 1 : vector<8x256xf32>, i32 -> vector<8x256xf32>
    %c63 = arith.constant 63 : index
    %c0_90 = arith.constant 0 : index
    %c0_91 = arith.constant 0 : index
    %180 = vector.load %arg11[%c63, %c0_90, %c0_91] : memref<110x8x256xf32, #tpu.memory_space<vmem>>, vector<1x8x256xf32>
    %181 = vector.shape_cast %180 : vector<1x8x256xf32> to vector<8x256xf32>
    %182 = arith.mulf %181, %179 : vector<8x256xf32>
    %183 = arith.addf %178, %182 : vector<8x256xf32>
    %c7_i32 = arith.constant 7 : i32
    %184 = tpu.dynamic_rotate %162 by %c7_i32 dim 1 : vector<8x256xf32>, i32 -> vector<8x256xf32>
    %c64 = arith.constant 64 : index
    %c0_92 = arith.constant 0 : index
    %c0_93 = arith.constant 0 : index
    %185 = vector.load %arg11[%c64, %c0_92, %c0_93] : memref<110x8x256xf32, #tpu.memory_space<vmem>>, vector<1x8x256xf32>
    %186 = vector.shape_cast %185 : vector<1x8x256xf32> to vector<8x256xf32>
    %187 = arith.mulf %186, %184 : vector<8x256xf32>
    %188 = arith.addf %183, %187 : vector<8x256xf32>
    %c6_i32 = arith.constant 6 : i32
    %189 = tpu.dynamic_rotate %162 by %c6_i32 dim 1 : vector<8x256xf32>, i32 -> vector<8x256xf32>
    %c65 = arith.constant 65 : index
    %c0_94 = arith.constant 0 : index
    %c0_95 = arith.constant 0 : index
    %190 = vector.load %arg11[%c65, %c0_94, %c0_95] : memref<110x8x256xf32, #tpu.memory_space<vmem>>, vector<1x8x256xf32>
    %191 = vector.shape_cast %190 : vector<1x8x256xf32> to vector<8x256xf32>
    %192 = arith.mulf %191, %189 : vector<8x256xf32>
    %193 = arith.addf %188, %192 : vector<8x256xf32>
    %c5_i32 = arith.constant 5 : i32
    %194 = tpu.dynamic_rotate %162 by %c5_i32 dim 1 : vector<8x256xf32>, i32 -> vector<8x256xf32>
    %c39 = arith.constant 39 : index
    %c0_96 = arith.constant 0 : index
    %c0_97 = arith.constant 0 : index
    %195 = vector.load %arg11[%c39, %c0_96, %c0_97] : memref<110x8x256xf32, #tpu.memory_space<vmem>>, vector<1x8x256xf32>
    %196 = vector.shape_cast %195 : vector<1x8x256xf32> to vector<8x256xf32>
    %197 = arith.mulf %196, %194 : vector<8x256xf32>
    %198 = arith.addf %166, %197 : vector<8x256xf32>
    %c66 = arith.constant 66 : index
    %c0_98 = arith.constant 0 : index
    %c0_99 = arith.constant 0 : index
    %199 = vector.load %arg11[%c66, %c0_98, %c0_99] : memref<110x8x256xf32, #tpu.memory_space<vmem>>, vector<1x8x256xf32>
    %200 = vector.shape_cast %199 : vector<1x8x256xf32> to vector<8x256xf32>
    %201 = arith.mulf %200, %194 : vector<8x256xf32>
    %202 = arith.addf %193, %201 : vector<8x256xf32>
    %c4_i32 = arith.constant 4 : i32
    %203 = tpu.dynamic_rotate %162 by %c4_i32 dim 1 : vector<8x256xf32>, i32 -> vector<8x256xf32>
    %c40 = arith.constant 40 : index
    %c0_100 = arith.constant 0 : index
    %c0_101 = arith.constant 0 : index
    %204 = vector.load %arg11[%c40, %c0_100, %c0_101] : memref<110x8x256xf32, #tpu.memory_space<vmem>>, vector<1x8x256xf32>
    %205 = vector.shape_cast %204 : vector<1x8x256xf32> to vector<8x256xf32>
    %206 = arith.mulf %205, %203 : vector<8x256xf32>
    %207 = arith.addf %198, %206 : vector<8x256xf32>
    %c67 = arith.constant 67 : index
    %c0_102 = arith.constant 0 : index
    %c0_103 = arith.constant 0 : index
    %208 = vector.load %arg11[%c67, %c0_102, %c0_103] : memref<110x8x256xf32, #tpu.memory_space<vmem>>, vector<1x8x256xf32>
    %209 = vector.shape_cast %208 : vector<1x8x256xf32> to vector<8x256xf32>
    %210 = arith.mulf %209, %203 : vector<8x256xf32>
    %211 = arith.addf %202, %210 : vector<8x256xf32>
    %c3_i32 = arith.constant 3 : i32
    %212 = tpu.dynamic_rotate %162 by %c3_i32 dim 1 : vector<8x256xf32>, i32 -> vector<8x256xf32>
    %c25 = arith.constant 25 : index
    %c0_104 = arith.constant 0 : index
    %c0_105 = arith.constant 0 : index
    %213 = vector.load %arg11[%c25, %c0_104, %c0_105] : memref<110x8x256xf32, #tpu.memory_space<vmem>>, vector<1x8x256xf32>
    %214 = vector.shape_cast %213 : vector<1x8x256xf32> to vector<8x256xf32>
    %215 = arith.mulf %214, %212 : vector<8x256xf32>
    %216 = arith.addf %164, %215 : vector<8x256xf32>
    %c41 = arith.constant 41 : index
    %c0_106 = arith.constant 0 : index
    %c0_107 = arith.constant 0 : index
    %217 = vector.load %arg11[%c41, %c0_106, %c0_107] : memref<110x8x256xf32, #tpu.memory_space<vmem>>, vector<1x8x256xf32>
    %218 = vector.shape_cast %217 : vector<1x8x256xf32> to vector<8x256xf32>
    %219 = arith.mulf %218, %212 : vector<8x256xf32>
    %220 = arith.addf %207, %219 : vector<8x256xf32>
    %c68 = arith.constant 68 : index
    %c0_108 = arith.constant 0 : index
    %c0_109 = arith.constant 0 : index
    %221 = vector.load %arg11[%c68, %c0_108, %c0_109] : memref<110x8x256xf32, #tpu.memory_space<vmem>>, vector<1x8x256xf32>
    %222 = vector.shape_cast %221 : vector<1x8x256xf32> to vector<8x256xf32>
    %223 = arith.mulf %222, %212 : vector<8x256xf32>
    %224 = arith.addf %211, %223 : vector<8x256xf32>
    %c2_i32_110 = arith.constant 2 : i32
    %225 = tpu.dynamic_rotate %162 by %c2_i32_110 dim 1 : vector<8x256xf32>, i32 -> vector<8x256xf32>
    %c26 = arith.constant 26 : index
    %c0_111 = arith.constant 0 : index
    %c0_112 = arith.constant 0 : index
    %226 = vector.load %arg11[%c26, %c0_111, %c0_112] : memref<110x8x256xf32, #tpu.memory_space<vmem>>, vector<1x8x256xf32>
    %227 = vector.shape_cast %226 : vector<1x8x256xf32> to vector<8x256xf32>
    %228 = arith.mulf %227, %225 : vector<8x256xf32>
    %229 = arith.addf %216, %228 : vector<8x256xf32>
    %c42 = arith.constant 42 : index
    %c0_113 = arith.constant 0 : index
    %c0_114 = arith.constant 0 : index
    %230 = vector.load %arg11[%c42, %c0_113, %c0_114] : memref<110x8x256xf32, #tpu.memory_space<vmem>>, vector<1x8x256xf32>
    %231 = vector.shape_cast %230 : vector<1x8x256xf32> to vector<8x256xf32>
    %232 = arith.mulf %231, %225 : vector<8x256xf32>
    %233 = arith.addf %220, %232 : vector<8x256xf32>
    %c69 = arith.constant 69 : index
    %c0_115 = arith.constant 0 : index
    %c0_116 = arith.constant 0 : index
    %234 = vector.load %arg11[%c69, %c0_115, %c0_116] : memref<110x8x256xf32, #tpu.memory_space<vmem>>, vector<1x8x256xf32>
    %235 = vector.shape_cast %234 : vector<1x8x256xf32> to vector<8x256xf32>
    %236 = arith.mulf %235, %225 : vector<8x256xf32>
    %237 = arith.addf %224, %236 : vector<8x256xf32>
    %c1_i32_117 = arith.constant 1 : i32
    %238 = tpu.dynamic_rotate %162 by %c1_i32_117 dim 1 : vector<8x256xf32>, i32 -> vector<8x256xf32>
    %c27 = arith.constant 27 : index
    %c0_118 = arith.constant 0 : index
    %c0_119 = arith.constant 0 : index
    %239 = vector.load %arg11[%c27, %c0_118, %c0_119] : memref<110x8x256xf32, #tpu.memory_space<vmem>>, vector<1x8x256xf32>
    %240 = vector.shape_cast %239 : vector<1x8x256xf32> to vector<8x256xf32>
    %241 = arith.mulf %240, %238 : vector<8x256xf32>
    %242 = arith.addf %229, %241 : vector<8x256xf32>
    %c43 = arith.constant 43 : index
    %c0_120 = arith.constant 0 : index
    %c0_121 = arith.constant 0 : index
    %243 = vector.load %arg11[%c43, %c0_120, %c0_121] : memref<110x8x256xf32, #tpu.memory_space<vmem>>, vector<1x8x256xf32>
    %244 = vector.shape_cast %243 : vector<1x8x256xf32> to vector<8x256xf32>
    %245 = arith.mulf %244, %238 : vector<8x256xf32>
    %246 = arith.addf %233, %245 : vector<8x256xf32>
    %c70 = arith.constant 70 : index
    %c0_122 = arith.constant 0 : index
    %c0_123 = arith.constant 0 : index
    %247 = vector.load %arg11[%c70, %c0_122, %c0_123] : memref<110x8x256xf32, #tpu.memory_space<vmem>>, vector<1x8x256xf32>
    %248 = vector.shape_cast %247 : vector<1x8x256xf32> to vector<8x256xf32>
    %249 = arith.mulf %248, %238 : vector<8x256xf32>
    %250 = arith.addf %237, %249 : vector<8x256xf32>
    %c28 = arith.constant 28 : index
    %c0_124 = arith.constant 0 : index
    %c0_125 = arith.constant 0 : index
    %251 = vector.load %arg11[%c28, %c0_124, %c0_125] : memref<110x8x256xf32, #tpu.memory_space<vmem>>, vector<1x8x256xf32>
    %252 = vector.shape_cast %251 : vector<1x8x256xf32> to vector<8x256xf32>
    %253 = arith.mulf %252, %162 : vector<8x256xf32>
    %254 = arith.addf %242, %253 : vector<8x256xf32>
    %c44 = arith.constant 44 : index
    %c0_126 = arith.constant 0 : index
    %c0_127 = arith.constant 0 : index
    %255 = vector.load %arg11[%c44, %c0_126, %c0_127] : memref<110x8x256xf32, #tpu.memory_space<vmem>>, vector<1x8x256xf32>
    %256 = vector.shape_cast %255 : vector<1x8x256xf32> to vector<8x256xf32>
    %257 = arith.mulf %256, %162 : vector<8x256xf32>
    %258 = arith.addf %246, %257 : vector<8x256xf32>
    %c71 = arith.constant 71 : index
    %c0_128 = arith.constant 0 : index
    %c0_129 = arith.constant 0 : index
    %259 = vector.load %arg11[%c71, %c0_128, %c0_129] : memref<110x8x256xf32, #tpu.memory_space<vmem>>, vector<1x8x256xf32>
    %260 = vector.shape_cast %259 : vector<1x8x256xf32> to vector<8x256xf32>
    %261 = arith.mulf %260, %162 : vector<8x256xf32>
    %262 = arith.addf %250, %261 : vector<8x256xf32>
    %c255_i32_130 = arith.constant 255 : i32
    %263 = tpu.dynamic_rotate %162 by %c255_i32_130 dim 1 : vector<8x256xf32>, i32 -> vector<8x256xf32>
    %c29 = arith.constant 29 : index
    %c0_131 = arith.constant 0 : index
    %c0_132 = arith.constant 0 : index
    %264 = vector.load %arg11[%c29, %c0_131, %c0_132] : memref<110x8x256xf32, #tpu.memory_space<vmem>>, vector<1x8x256xf32>
    %265 = vector.shape_cast %264 : vector<1x8x256xf32> to vector<8x256xf32>
    %266 = arith.mulf %265, %263 : vector<8x256xf32>
    %267 = arith.addf %254, %266 : vector<8x256xf32>
    %c45 = arith.constant 45 : index
    %c0_133 = arith.constant 0 : index
    %c0_134 = arith.constant 0 : index
    %268 = vector.load %arg11[%c45, %c0_133, %c0_134] : memref<110x8x256xf32, #tpu.memory_space<vmem>>, vector<1x8x256xf32>
    %269 = vector.shape_cast %268 : vector<1x8x256xf32> to vector<8x256xf32>
    %270 = arith.mulf %269, %263 : vector<8x256xf32>
    %271 = arith.addf %258, %270 : vector<8x256xf32>
    %c72 = arith.constant 72 : index
    %c0_135 = arith.constant 0 : index
    %c0_136 = arith.constant 0 : index
    %272 = vector.load %arg11[%c72, %c0_135, %c0_136] : memref<110x8x256xf32, #tpu.memory_space<vmem>>, vector<1x8x256xf32>
    %273 = vector.shape_cast %272 : vector<1x8x256xf32> to vector<8x256xf32>
    %274 = arith.mulf %273, %263 : vector<8x256xf32>
    %275 = arith.addf %262, %274 : vector<8x256xf32>
    %c254_i32_137 = arith.constant 254 : i32
    %276 = tpu.dynamic_rotate %162 by %c254_i32_137 dim 1 : vector<8x256xf32>, i32 -> vector<8x256xf32>
    %c30 = arith.constant 30 : index
    %c0_138 = arith.constant 0 : index
    %c0_139 = arith.constant 0 : index
    %277 = vector.load %arg11[%c30, %c0_138, %c0_139] : memref<110x8x256xf32, #tpu.memory_space<vmem>>, vector<1x8x256xf32>
    %278 = vector.shape_cast %277 : vector<1x8x256xf32> to vector<8x256xf32>
    %279 = arith.mulf %278, %276 : vector<8x256xf32>
    %280 = arith.addf %267, %279 : vector<8x256xf32>
    %c46 = arith.constant 46 : index
    %c0_140 = arith.constant 0 : index
    %c0_141 = arith.constant 0 : index
    %281 = vector.load %arg11[%c46, %c0_140, %c0_141] : memref<110x8x256xf32, #tpu.memory_space<vmem>>, vector<1x8x256xf32>
    %282 = vector.shape_cast %281 : vector<1x8x256xf32> to vector<8x256xf32>
    %283 = arith.mulf %282, %276 : vector<8x256xf32>
    %284 = arith.addf %271, %283 : vector<8x256xf32>
    %c73 = arith.constant 73 : index
    %c0_142 = arith.constant 0 : index
    %c0_143 = arith.constant 0 : index
    %285 = vector.load %arg11[%c73, %c0_142, %c0_143] : memref<110x8x256xf32, #tpu.memory_space<vmem>>, vector<1x8x256xf32>
    %286 = vector.shape_cast %285 : vector<1x8x256xf32> to vector<8x256xf32>
    %287 = arith.mulf %286, %276 : vector<8x256xf32>
    %288 = arith.addf %275, %287 : vector<8x256xf32>
    %c253_i32 = arith.constant 253 : i32
    %289 = tpu.dynamic_rotate %162 by %c253_i32 dim 1 : vector<8x256xf32>, i32 -> vector<8x256xf32>
    %c31 = arith.constant 31 : index
    %c0_144 = arith.constant 0 : index
    %c0_145 = arith.constant 0 : index
    %290 = vector.load %arg11[%c31, %c0_144, %c0_145] : memref<110x8x256xf32, #tpu.memory_space<vmem>>, vector<1x8x256xf32>
    %291 = vector.shape_cast %290 : vector<1x8x256xf32> to vector<8x256xf32>
    %292 = arith.mulf %291, %289 : vector<8x256xf32>
    %293 = arith.addf %280, %292 : vector<8x256xf32>
    %c47 = arith.constant 47 : index
    %c0_146 = arith.constant 0 : index
    %c0_147 = arith.constant 0 : index
    %294 = vector.load %arg11[%c47, %c0_146, %c0_147] : memref<110x8x256xf32, #tpu.memory_space<vmem>>, vector<1x8x256xf32>
    %295 = vector.shape_cast %294 : vector<1x8x256xf32> to vector<8x256xf32>
    %296 = arith.mulf %295, %289 : vector<8x256xf32>
    %297 = arith.addf %284, %296 : vector<8x256xf32>
    %c74 = arith.constant 74 : index
    %c0_148 = arith.constant 0 : index
    %c0_149 = arith.constant 0 : index
    %298 = vector.load %arg11[%c74, %c0_148, %c0_149] : memref<110x8x256xf32, #tpu.memory_space<vmem>>, vector<1x8x256xf32>
    %299 = vector.shape_cast %298 : vector<1x8x256xf32> to vector<8x256xf32>
    %300 = arith.mulf %299, %289 : vector<8x256xf32>
    %301 = arith.addf %288, %300 : vector<8x256xf32>
    %c252_i32 = arith.constant 252 : i32
    %302 = tpu.dynamic_rotate %162 by %c252_i32 dim 1 : vector<8x256xf32>, i32 -> vector<8x256xf32>
    %c48 = arith.constant 48 : index
    %c0_150 = arith.constant 0 : index
    %c0_151 = arith.constant 0 : index
    %303 = vector.load %arg11[%c48, %c0_150, %c0_151] : memref<110x8x256xf32, #tpu.memory_space<vmem>>, vector<1x8x256xf32>
    %304 = vector.shape_cast %303 : vector<1x8x256xf32> to vector<8x256xf32>
    %305 = arith.mulf %304, %302 : vector<8x256xf32>
    %306 = arith.addf %297, %305 : vector<8x256xf32>
    %c75 = arith.constant 75 : index
    %c0_152 = arith.constant 0 : index
    %c0_153 = arith.constant 0 : index
    %307 = vector.load %arg11[%c75, %c0_152, %c0_153] : memref<110x8x256xf32, #tpu.memory_space<vmem>>, vector<1x8x256xf32>
    %308 = vector.shape_cast %307 : vector<1x8x256xf32> to vector<8x256xf32>
    %309 = arith.mulf %308, %302 : vector<8x256xf32>
    %310 = arith.addf %301, %309 : vector<8x256xf32>
    %c251_i32 = arith.constant 251 : i32
    %311 = tpu.dynamic_rotate %162 by %c251_i32 dim 1 : vector<8x256xf32>, i32 -> vector<8x256xf32>
    %c49 = arith.constant 49 : index
    %c0_154 = arith.constant 0 : index
    %c0_155 = arith.constant 0 : index
    %312 = vector.load %arg11[%c49, %c0_154, %c0_155] : memref<110x8x256xf32, #tpu.memory_space<vmem>>, vector<1x8x256xf32>
    %313 = vector.shape_cast %312 : vector<1x8x256xf32> to vector<8x256xf32>
    %314 = arith.mulf %313, %311 : vector<8x256xf32>
    %315 = arith.addf %306, %314 : vector<8x256xf32>
    %c76 = arith.constant 76 : index
    %c0_156 = arith.constant 0 : index
    %c0_157 = arith.constant 0 : index
    %316 = vector.load %arg11[%c76, %c0_156, %c0_157] : memref<110x8x256xf32, #tpu.memory_space<vmem>>, vector<1x8x256xf32>
    %317 = vector.shape_cast %316 : vector<1x8x256xf32> to vector<8x256xf32>
    %318 = arith.mulf %317, %311 : vector<8x256xf32>
    %319 = arith.addf %310, %318 : vector<8x256xf32>
    %c250_i32 = arith.constant 250 : i32
    %320 = tpu.dynamic_rotate %162 by %c250_i32 dim 1 : vector<8x256xf32>, i32 -> vector<8x256xf32>
    %c77 = arith.constant 77 : index
    %c0_158 = arith.constant 0 : index
    %c0_159 = arith.constant 0 : index
    %321 = vector.load %arg11[%c77, %c0_158, %c0_159] : memref<110x8x256xf32, #tpu.memory_space<vmem>>, vector<1x8x256xf32>
    %322 = vector.shape_cast %321 : vector<1x8x256xf32> to vector<8x256xf32>
    %323 = arith.mulf %322, %320 : vector<8x256xf32>
    %324 = arith.addf %319, %323 : vector<8x256xf32>
    %c249_i32 = arith.constant 249 : i32
    %325 = tpu.dynamic_rotate %162 by %c249_i32 dim 1 : vector<8x256xf32>, i32 -> vector<8x256xf32>
    %c78 = arith.constant 78 : index
    %c0_160 = arith.constant 0 : index
    %c0_161 = arith.constant 0 : index
    %326 = vector.load %arg11[%c78, %c0_160, %c0_161] : memref<110x8x256xf32, #tpu.memory_space<vmem>>, vector<1x8x256xf32>
    %327 = vector.shape_cast %326 : vector<1x8x256xf32> to vector<8x256xf32>
    %328 = arith.mulf %327, %325 : vector<8x256xf32>
    %329 = arith.addf %324, %328 : vector<8x256xf32>
    %c248_i32 = arith.constant 248 : i32
    %330 = tpu.dynamic_rotate %162 by %c248_i32 dim 1 : vector<8x256xf32>, i32 -> vector<8x256xf32>
    %c79 = arith.constant 79 : index
    %c0_162 = arith.constant 0 : index
    %c0_163 = arith.constant 0 : index
    %331 = vector.load %arg11[%c79, %c0_162, %c0_163] : memref<110x8x256xf32, #tpu.memory_space<vmem>>, vector<1x8x256xf32>
    %332 = vector.shape_cast %331 : vector<1x8x256xf32> to vector<8x256xf32>
    %333 = arith.mulf %332, %330 : vector<8x256xf32>
    %334 = arith.addf %329, %333 : vector<8x256xf32>
    %c247_i32 = arith.constant 247 : i32
    %335 = tpu.dynamic_rotate %162 by %c247_i32 dim 1 : vector<8x256xf32>, i32 -> vector<8x256xf32>
    %c80 = arith.constant 80 : index
    %c0_164 = arith.constant 0 : index
    %c0_165 = arith.constant 0 : index
    %336 = vector.load %arg11[%c80, %c0_164, %c0_165] : memref<110x8x256xf32, #tpu.memory_space<vmem>>, vector<1x8x256xf32>
    %337 = vector.shape_cast %336 : vector<1x8x256xf32> to vector<8x256xf32>
    %338 = arith.mulf %337, %335 : vector<8x256xf32>
    %339 = arith.addf %334, %338 : vector<8x256xf32>
    %c246_i32 = arith.constant 246 : i32
    %340 = tpu.dynamic_rotate %162 by %c246_i32 dim 1 : vector<8x256xf32>, i32 -> vector<8x256xf32>
    %c81 = arith.constant 81 : index
    %c0_166 = arith.constant 0 : index
    %c0_167 = arith.constant 0 : index
    %341 = vector.load %arg11[%c81, %c0_166, %c0_167] : memref<110x8x256xf32, #tpu.memory_space<vmem>>, vector<1x8x256xf32>
    %342 = vector.shape_cast %341 : vector<1x8x256xf32> to vector<8x256xf32>
    %343 = arith.mulf %342, %340 : vector<8x256xf32>
    %344 = arith.addf %339, %343 : vector<8x256xf32>
    %c105 = arith.constant 105 : index
    %c0_168 = arith.constant 0 : index
    %c0_169 = arith.constant 0 : index
    %345 = vector.load %arg11[%c105, %c0_168, %c0_169] : memref<110x8x256xf32, #tpu.memory_space<vmem>>, vector<1x8x256xf32>
    %346 = vector.shape_cast %345 : vector<1x8x256xf32> to vector<8x256xf32>
    %c32 = arith.constant 32 : index
    %c0_170 = arith.constant 0 : index
    %c0_171 = arith.constant 0 : index
    %347 = vector.load %arg11[%c32, %c0_170, %c0_171] : memref<110x8x256xf32, #tpu.memory_space<vmem>>, vector<1x8x256xf32>
    %348 = vector.shape_cast %347 : vector<1x8x256xf32> to vector<8x256xf32>
    %c48_i32 = arith.constant 48 : i32
    %349 = tpu.dynamic_rotate %293 by %c48_i32 dim 1 : vector<8x256xf32>, i32 -> vector<8x256xf32>
    %350 = arith.mulf %348, %349 : vector<8x256xf32>
    %351 = arith.addf %346, %350 : vector<8x256xf32>
    %c33 = arith.constant 33 : index
    %c0_172 = arith.constant 0 : index
    %c0_173 = arith.constant 0 : index
    %352 = vector.load %arg11[%c33, %c0_172, %c0_173] : memref<110x8x256xf32, #tpu.memory_space<vmem>>, vector<1x8x256xf32>
    %353 = vector.shape_cast %352 : vector<1x8x256xf32> to vector<8x256xf32>
    %c32_i32_174 = arith.constant 32 : i32
    %354 = tpu.dynamic_rotate %293 by %c32_i32_174 dim 1 : vector<8x256xf32>, i32 -> vector<8x256xf32>
    %355 = arith.mulf %353, %354 : vector<8x256xf32>
    %c34 = arith.constant 34 : index
    %c0_175 = arith.constant 0 : index
    %c0_176 = arith.constant 0 : index
    %356 = vector.load %arg11[%c34, %c0_175, %c0_176] : memref<110x8x256xf32, #tpu.memory_space<vmem>>, vector<1x8x256xf32>
    %357 = vector.shape_cast %356 : vector<1x8x256xf32> to vector<8x256xf32>
    %c16_i32_177 = arith.constant 16 : i32
    %358 = tpu.dynamic_rotate %293 by %c16_i32_177 dim 1 : vector<8x256xf32>, i32 -> vector<8x256xf32>
    %359 = arith.mulf %357, %358 : vector<8x256xf32>
    %c35 = arith.constant 35 : index
    %c0_178 = arith.constant 0 : index
    %c0_179 = arith.constant 0 : index
    %360 = vector.load %arg11[%c35, %c0_178, %c0_179] : memref<110x8x256xf32, #tpu.memory_space<vmem>>, vector<1x8x256xf32>
    %361 = vector.shape_cast %360 : vector<1x8x256xf32> to vector<8x256xf32>
    %362 = arith.mulf %361, %293 : vector<8x256xf32>
    %c36 = arith.constant 36 : index
    %c0_180 = arith.constant 0 : index
    %c0_181 = arith.constant 0 : index
    %363 = vector.load %arg11[%c36, %c0_180, %c0_181] : memref<110x8x256xf32, #tpu.memory_space<vmem>>, vector<1x8x256xf32>
    %364 = vector.shape_cast %363 : vector<1x8x256xf32> to vector<8x256xf32>
    %c240_i32_182 = arith.constant 240 : i32
    %365 = tpu.dynamic_rotate %293 by %c240_i32_182 dim 1 : vector<8x256xf32>, i32 -> vector<8x256xf32>
    %366 = arith.mulf %364, %365 : vector<8x256xf32>
    %367 = arith.addf %351, %366 : vector<8x256xf32>
    %c37 = arith.constant 37 : index
    %c0_183 = arith.constant 0 : index
    %c0_184 = arith.constant 0 : index
    %368 = vector.load %arg11[%c37, %c0_183, %c0_184] : memref<110x8x256xf32, #tpu.memory_space<vmem>>, vector<1x8x256xf32>
    %369 = vector.shape_cast %368 : vector<1x8x256xf32> to vector<8x256xf32>
    %c224_i32_185 = arith.constant 224 : i32
    %370 = tpu.dynamic_rotate %293 by %c224_i32_185 dim 1 : vector<8x256xf32>, i32 -> vector<8x256xf32>
    %371 = arith.mulf %369, %370 : vector<8x256xf32>
    %372 = arith.addf %355, %371 : vector<8x256xf32>
    %c38 = arith.constant 38 : index
    %c0_186 = arith.constant 0 : index
    %c0_187 = arith.constant 0 : index
    %373 = vector.load %arg11[%c38, %c0_186, %c0_187] : memref<110x8x256xf32, #tpu.memory_space<vmem>>, vector<1x8x256xf32>
    %374 = vector.shape_cast %373 : vector<1x8x256xf32> to vector<8x256xf32>
    %c208_i32 = arith.constant 208 : i32
    %375 = tpu.dynamic_rotate %293 by %c208_i32 dim 1 : vector<8x256xf32>, i32 -> vector<8x256xf32>
    %376 = arith.mulf %374, %375 : vector<8x256xf32>
    %377 = arith.addf %359, %376 : vector<8x256xf32>
    %378 = arith.addf %367, %372 : vector<8x256xf32>
    %379 = arith.addf %378, %377 : vector<8x256xf32>
    %380 = arith.addf %379, %362 : vector<8x256xf32>
    %c107 = arith.constant 107 : index
    %c0_188 = arith.constant 0 : index
    %c0_189 = arith.constant 0 : index
    %381 = vector.load %arg11[%c107, %c0_188, %c0_189] : memref<110x8x256xf32, #tpu.memory_space<vmem>>, vector<1x8x256xf32>
    %382 = vector.shape_cast %381 : vector<1x8x256xf32> to vector<8x256xf32>
    %c50 = arith.constant 50 : index
    %c0_190 = arith.constant 0 : index
    %c0_191 = arith.constant 0 : index
    %383 = vector.load %arg11[%c50, %c0_190, %c0_191] : memref<110x8x256xf32, #tpu.memory_space<vmem>>, vector<1x8x256xf32>
    %384 = vector.shape_cast %383 : vector<1x8x256xf32> to vector<8x256xf32>
    %c80_i32 = arith.constant 80 : i32
    %385 = tpu.dynamic_rotate %315 by %c80_i32 dim 1 : vector<8x256xf32>, i32 -> vector<8x256xf32>
    %386 = arith.mulf %384, %385 : vector<8x256xf32>
    %387 = arith.addf %382, %386 : vector<8x256xf32>
    %c51 = arith.constant 51 : index
    %c0_192 = arith.constant 0 : index
    %c0_193 = arith.constant 0 : index
    %388 = vector.load %arg11[%c51, %c0_192, %c0_193] : memref<110x8x256xf32, #tpu.memory_space<vmem>>, vector<1x8x256xf32>
    %389 = vector.shape_cast %388 : vector<1x8x256xf32> to vector<8x256xf32>
    %c64_i32 = arith.constant 64 : i32
    %390 = tpu.dynamic_rotate %315 by %c64_i32 dim 1 : vector<8x256xf32>, i32 -> vector<8x256xf32>
    %391 = arith.mulf %389, %390 : vector<8x256xf32>
    %c52 = arith.constant 52 : index
    %c0_194 = arith.constant 0 : index
    %c0_195 = arith.constant 0 : index
    %392 = vector.load %arg11[%c52, %c0_194, %c0_195] : memref<110x8x256xf32, #tpu.memory_space<vmem>>, vector<1x8x256xf32>
    %393 = vector.shape_cast %392 : vector<1x8x256xf32> to vector<8x256xf32>
    %c48_i32_196 = arith.constant 48 : i32
    %394 = tpu.dynamic_rotate %315 by %c48_i32_196 dim 1 : vector<8x256xf32>, i32 -> vector<8x256xf32>
    %395 = arith.mulf %393, %394 : vector<8x256xf32>
    %c53 = arith.constant 53 : index
    %c0_197 = arith.constant 0 : index
    %c0_198 = arith.constant 0 : index
    %396 = vector.load %arg11[%c53, %c0_197, %c0_198] : memref<110x8x256xf32, #tpu.memory_space<vmem>>, vector<1x8x256xf32>
    %397 = vector.shape_cast %396 : vector<1x8x256xf32> to vector<8x256xf32>
    %c32_i32_199 = arith.constant 32 : i32
    %398 = tpu.dynamic_rotate %315 by %c32_i32_199 dim 1 : vector<8x256xf32>, i32 -> vector<8x256xf32>
    %399 = arith.mulf %397, %398 : vector<8x256xf32>
    %c54 = arith.constant 54 : index
    %c0_200 = arith.constant 0 : index
    %c0_201 = arith.constant 0 : index
    %400 = vector.load %arg11[%c54, %c0_200, %c0_201] : memref<110x8x256xf32, #tpu.memory_space<vmem>>, vector<1x8x256xf32>
    %401 = vector.shape_cast %400 : vector<1x8x256xf32> to vector<8x256xf32>
    %c16_i32_202 = arith.constant 16 : i32
    %402 = tpu.dynamic_rotate %315 by %c16_i32_202 dim 1 : vector<8x256xf32>, i32 -> vector<8x256xf32>
    %403 = arith.mulf %401, %402 : vector<8x256xf32>
    %404 = arith.addf %387, %403 : vector<8x256xf32>
    %c55 = arith.constant 55 : index
    %c0_203 = arith.constant 0 : index
    %c0_204 = arith.constant 0 : index
    %405 = vector.load %arg11[%c55, %c0_203, %c0_204] : memref<110x8x256xf32, #tpu.memory_space<vmem>>, vector<1x8x256xf32>
    %406 = vector.shape_cast %405 : vector<1x8x256xf32> to vector<8x256xf32>
    %407 = arith.mulf %406, %315 : vector<8x256xf32>
    %408 = arith.addf %391, %407 : vector<8x256xf32>
    %c56 = arith.constant 56 : index
    %c0_205 = arith.constant 0 : index
    %c0_206 = arith.constant 0 : index
    %409 = vector.load %arg11[%c56, %c0_205, %c0_206] : memref<110x8x256xf32, #tpu.memory_space<vmem>>, vector<1x8x256xf32>
    %410 = vector.shape_cast %409 : vector<1x8x256xf32> to vector<8x256xf32>
    %c240_i32_207 = arith.constant 240 : i32
    %411 = tpu.dynamic_rotate %315 by %c240_i32_207 dim 1 : vector<8x256xf32>, i32 -> vector<8x256xf32>
    %412 = arith.mulf %410, %411 : vector<8x256xf32>
    %413 = arith.addf %395, %412 : vector<8x256xf32>
    %c57 = arith.constant 57 : index
    %c0_208 = arith.constant 0 : index
    %c0_209 = arith.constant 0 : index
    %414 = vector.load %arg11[%c57, %c0_208, %c0_209] : memref<110x8x256xf32, #tpu.memory_space<vmem>>, vector<1x8x256xf32>
    %415 = vector.shape_cast %414 : vector<1x8x256xf32> to vector<8x256xf32>
    %c224_i32_210 = arith.constant 224 : i32
    %416 = tpu.dynamic_rotate %315 by %c224_i32_210 dim 1 : vector<8x256xf32>, i32 -> vector<8x256xf32>
    %417 = arith.mulf %415, %416 : vector<8x256xf32>
    %418 = arith.addf %399, %417 : vector<8x256xf32>
    %c58 = arith.constant 58 : index
    %c0_211 = arith.constant 0 : index
    %c0_212 = arith.constant 0 : index
    %419 = vector.load %arg11[%c58, %c0_211, %c0_212] : memref<110x8x256xf32, #tpu.memory_space<vmem>>, vector<1x8x256xf32>
    %420 = vector.shape_cast %419 : vector<1x8x256xf32> to vector<8x256xf32>
    %c208_i32_213 = arith.constant 208 : i32
    %421 = tpu.dynamic_rotate %315 by %c208_i32_213 dim 1 : vector<8x256xf32>, i32 -> vector<8x256xf32>
    %422 = arith.mulf %420, %421 : vector<8x256xf32>
    %423 = arith.addf %404, %422 : vector<8x256xf32>
    %c59 = arith.constant 59 : index
    %c0_214 = arith.constant 0 : index
    %c0_215 = arith.constant 0 : index
    %424 = vector.load %arg11[%c59, %c0_214, %c0_215] : memref<110x8x256xf32, #tpu.memory_space<vmem>>, vector<1x8x256xf32>
    %425 = vector.shape_cast %424 : vector<1x8x256xf32> to vector<8x256xf32>
    %c192_i32 = arith.constant 192 : i32
    %426 = tpu.dynamic_rotate %315 by %c192_i32 dim 1 : vector<8x256xf32>, i32 -> vector<8x256xf32>
    %427 = arith.mulf %425, %426 : vector<8x256xf32>
    %428 = arith.addf %408, %427 : vector<8x256xf32>
    %c60 = arith.constant 60 : index
    %c0_216 = arith.constant 0 : index
    %c0_217 = arith.constant 0 : index
    %429 = vector.load %arg11[%c60, %c0_216, %c0_217] : memref<110x8x256xf32, #tpu.memory_space<vmem>>, vector<1x8x256xf32>
    %430 = vector.shape_cast %429 : vector<1x8x256xf32> to vector<8x256xf32>
    %c176_i32 = arith.constant 176 : i32
    %431 = tpu.dynamic_rotate %315 by %c176_i32 dim 1 : vector<8x256xf32>, i32 -> vector<8x256xf32>
    %432 = arith.mulf %430, %431 : vector<8x256xf32>
    %433 = arith.addf %413, %432 : vector<8x256xf32>
    %434 = arith.addf %423, %428 : vector<8x256xf32>
    %435 = arith.addf %434, %433 : vector<8x256xf32>
    %436 = arith.addf %435, %418 : vector<8x256xf32>
    %c109 = arith.constant 109 : index
    %c0_218 = arith.constant 0 : index
    %c0_219 = arith.constant 0 : index
    %437 = vector.load %arg11[%c109, %c0_218, %c0_219] : memref<110x8x256xf32, #tpu.memory_space<vmem>>, vector<1x8x256xf32>
    %438 = vector.shape_cast %437 : vector<1x8x256xf32> to vector<8x256xf32>
    %c82 = arith.constant 82 : index
    %c0_220 = arith.constant 0 : index
    %c0_221 = arith.constant 0 : index
    %439 = vector.load %arg11[%c82, %c0_220, %c0_221] : memref<110x8x256xf32, #tpu.memory_space<vmem>>, vector<1x8x256xf32>
    %440 = vector.shape_cast %439 : vector<1x8x256xf32> to vector<8x256xf32>
    %c160_i32 = arith.constant 160 : i32
    %441 = tpu.dynamic_rotate %344 by %c160_i32 dim 1 : vector<8x256xf32>, i32 -> vector<8x256xf32>
    %442 = arith.mulf %440, %441 : vector<8x256xf32>
    %443 = arith.addf %438, %442 : vector<8x256xf32>
    %c83 = arith.constant 83 : index
    %c0_222 = arith.constant 0 : index
    %c0_223 = arith.constant 0 : index
    %444 = vector.load %arg11[%c83, %c0_222, %c0_223] : memref<110x8x256xf32, #tpu.memory_space<vmem>>, vector<1x8x256xf32>
    %445 = vector.shape_cast %444 : vector<1x8x256xf32> to vector<8x256xf32>
    %c144_i32 = arith.constant 144 : i32
    %446 = tpu.dynamic_rotate %344 by %c144_i32 dim 1 : vector<8x256xf32>, i32 -> vector<8x256xf32>
    %447 = arith.mulf %445, %446 : vector<8x256xf32>
    %c84 = arith.constant 84 : index
    %c0_224 = arith.constant 0 : index
    %c0_225 = arith.constant 0 : index
    %448 = vector.load %arg11[%c84, %c0_224, %c0_225] : memref<110x8x256xf32, #tpu.memory_space<vmem>>, vector<1x8x256xf32>
    %449 = vector.shape_cast %448 : vector<1x8x256xf32> to vector<8x256xf32>
    %c128_i32 = arith.constant 128 : i32
    %450 = tpu.dynamic_rotate %344 by %c128_i32 dim 1 : vector<8x256xf32>, i32 -> vector<8x256xf32>
    %451 = arith.mulf %449, %450 : vector<8x256xf32>
    %c85 = arith.constant 85 : index
    %c0_226 = arith.constant 0 : index
    %c0_227 = arith.constant 0 : index
    %452 = vector.load %arg11[%c85, %c0_226, %c0_227] : memref<110x8x256xf32, #tpu.memory_space<vmem>>, vector<1x8x256xf32>
    %453 = vector.shape_cast %452 : vector<1x8x256xf32> to vector<8x256xf32>
    %c112_i32 = arith.constant 112 : i32
    %454 = tpu.dynamic_rotate %344 by %c112_i32 dim 1 : vector<8x256xf32>, i32 -> vector<8x256xf32>
    %455 = arith.mulf %453, %454 : vector<8x256xf32>
    %c86 = arith.constant 86 : index
    %c0_228 = arith.constant 0 : index
    %c0_229 = arith.constant 0 : index
    %456 = vector.load %arg11[%c86, %c0_228, %c0_229] : memref<110x8x256xf32, #tpu.memory_space<vmem>>, vector<1x8x256xf32>
    %457 = vector.shape_cast %456 : vector<1x8x256xf32> to vector<8x256xf32>
    %c96_i32 = arith.constant 96 : i32
    %458 = tpu.dynamic_rotate %344 by %c96_i32 dim 1 : vector<8x256xf32>, i32 -> vector<8x256xf32>
    %459 = arith.mulf %457, %458 : vector<8x256xf32>
    %460 = arith.addf %443, %459 : vector<8x256xf32>
    %c87 = arith.constant 87 : index
    %c0_230 = arith.constant 0 : index
    %c0_231 = arith.constant 0 : index
    %461 = vector.load %arg11[%c87, %c0_230, %c0_231] : memref<110x8x256xf32, #tpu.memory_space<vmem>>, vector<1x8x256xf32>
    %462 = vector.shape_cast %461 : vector<1x8x256xf32> to vector<8x256xf32>
    %c80_i32_232 = arith.constant 80 : i32
    %463 = tpu.dynamic_rotate %344 by %c80_i32_232 dim 1 : vector<8x256xf32>, i32 -> vector<8x256xf32>
    %464 = arith.mulf %462, %463 : vector<8x256xf32>
    %465 = arith.addf %447, %464 : vector<8x256xf32>
    %c88 = arith.constant 88 : index
    %c0_233 = arith.constant 0 : index
    %c0_234 = arith.constant 0 : index
    %466 = vector.load %arg11[%c88, %c0_233, %c0_234] : memref<110x8x256xf32, #tpu.memory_space<vmem>>, vector<1x8x256xf32>
    %467 = vector.shape_cast %466 : vector<1x8x256xf32> to vector<8x256xf32>
    %c64_i32_235 = arith.constant 64 : i32
    %468 = tpu.dynamic_rotate %344 by %c64_i32_235 dim 1 : vector<8x256xf32>, i32 -> vector<8x256xf32>
    %469 = arith.mulf %467, %468 : vector<8x256xf32>
    %470 = arith.addf %451, %469 : vector<8x256xf32>
    %c89 = arith.constant 89 : index
    %c0_236 = arith.constant 0 : index
    %c0_237 = arith.constant 0 : index
    %471 = vector.load %arg11[%c89, %c0_236, %c0_237] : memref<110x8x256xf32, #tpu.memory_space<vmem>>, vector<1x8x256xf32>
    %472 = vector.shape_cast %471 : vector<1x8x256xf32> to vector<8x256xf32>
    %c48_i32_238 = arith.constant 48 : i32
    %473 = tpu.dynamic_rotate %344 by %c48_i32_238 dim 1 : vector<8x256xf32>, i32 -> vector<8x256xf32>
    %474 = arith.mulf %472, %473 : vector<8x256xf32>
    %475 = arith.addf %455, %474 : vector<8x256xf32>
    %c90 = arith.constant 90 : index
    %c0_239 = arith.constant 0 : index
    %c0_240 = arith.constant 0 : index
    %476 = vector.load %arg11[%c90, %c0_239, %c0_240] : memref<110x8x256xf32, #tpu.memory_space<vmem>>, vector<1x8x256xf32>
    %477 = vector.shape_cast %476 : vector<1x8x256xf32> to vector<8x256xf32>
    %c32_i32_241 = arith.constant 32 : i32
    %478 = tpu.dynamic_rotate %344 by %c32_i32_241 dim 1 : vector<8x256xf32>, i32 -> vector<8x256xf32>
    %479 = arith.mulf %477, %478 : vector<8x256xf32>
    %480 = arith.addf %460, %479 : vector<8x256xf32>
    %c91 = arith.constant 91 : index
    %c0_242 = arith.constant 0 : index
    %c0_243 = arith.constant 0 : index
    %481 = vector.load %arg11[%c91, %c0_242, %c0_243] : memref<110x8x256xf32, #tpu.memory_space<vmem>>, vector<1x8x256xf32>
    %482 = vector.shape_cast %481 : vector<1x8x256xf32> to vector<8x256xf32>
    %c16_i32_244 = arith.constant 16 : i32
    %483 = tpu.dynamic_rotate %344 by %c16_i32_244 dim 1 : vector<8x256xf32>, i32 -> vector<8x256xf32>
    %484 = arith.mulf %482, %483 : vector<8x256xf32>
    %485 = arith.addf %465, %484 : vector<8x256xf32>
    %c92 = arith.constant 92 : index
    %c0_245 = arith.constant 0 : index
    %c0_246 = arith.constant 0 : index
    %486 = vector.load %arg11[%c92, %c0_245, %c0_246] : memref<110x8x256xf32, #tpu.memory_space<vmem>>, vector<1x8x256xf32>
    %487 = vector.shape_cast %486 : vector<1x8x256xf32> to vector<8x256xf32>
    %488 = arith.mulf %487, %344 : vector<8x256xf32>
    %489 = arith.addf %470, %488 : vector<8x256xf32>
    %c93 = arith.constant 93 : index
    %c0_247 = arith.constant 0 : index
    %c0_248 = arith.constant 0 : index
    %490 = vector.load %arg11[%c93, %c0_247, %c0_248] : memref<110x8x256xf32, #tpu.memory_space<vmem>>, vector<1x8x256xf32>
    %491 = vector.shape_cast %490 : vector<1x8x256xf32> to vector<8x256xf32>
    %c240_i32_249 = arith.constant 240 : i32
    %492 = tpu.dynamic_rotate %344 by %c240_i32_249 dim 1 : vector<8x256xf32>, i32 -> vector<8x256xf32>
    %493 = arith.mulf %491, %492 : vector<8x256xf32>
    %494 = arith.addf %475, %493 : vector<8x256xf32>
    %c94 = arith.constant 94 : index
    %c0_250 = arith.constant 0 : index
    %c0_251 = arith.constant 0 : index
    %495 = vector.load %arg11[%c94, %c0_250, %c0_251] : memref<110x8x256xf32, #tpu.memory_space<vmem>>, vector<1x8x256xf32>
    %496 = vector.shape_cast %495 : vector<1x8x256xf32> to vector<8x256xf32>
    %c224_i32_252 = arith.constant 224 : i32
    %497 = tpu.dynamic_rotate %344 by %c224_i32_252 dim 1 : vector<8x256xf32>, i32 -> vector<8x256xf32>
    %498 = arith.mulf %496, %497 : vector<8x256xf32>
    %499 = arith.addf %480, %498 : vector<8x256xf32>
    %c95 = arith.constant 95 : index
    %c0_253 = arith.constant 0 : index
    %c0_254 = arith.constant 0 : index
    %500 = vector.load %arg11[%c95, %c0_253, %c0_254] : memref<110x8x256xf32, #tpu.memory_space<vmem>>, vector<1x8x256xf32>
    %501 = vector.shape_cast %500 : vector<1x8x256xf32> to vector<8x256xf32>
    %c208_i32_255 = arith.constant 208 : i32
    %502 = tpu.dynamic_rotate %344 by %c208_i32_255 dim 1 : vector<8x256xf32>, i32 -> vector<8x256xf32>
    %503 = arith.mulf %501, %502 : vector<8x256xf32>
    %504 = arith.addf %485, %503 : vector<8x256xf32>
    %c96 = arith.constant 96 : index
    %c0_256 = arith.constant 0 : index
    %c0_257 = arith.constant 0 : index
    %505 = vector.load %arg11[%c96, %c0_256, %c0_257] : memref<110x8x256xf32, #tpu.memory_space<vmem>>, vector<1x8x256xf32>
    %506 = vector.shape_cast %505 : vector<1x8x256xf32> to vector<8x256xf32>
    %c192_i32_258 = arith.constant 192 : i32
    %507 = tpu.dynamic_rotate %344 by %c192_i32_258 dim 1 : vector<8x256xf32>, i32 -> vector<8x256xf32>
    %508 = arith.mulf %506, %507 : vector<8x256xf32>
    %509 = arith.addf %489, %508 : vector<8x256xf32>
    %c97 = arith.constant 97 : index
    %c0_259 = arith.constant 0 : index
    %c0_260 = arith.constant 0 : index
    %510 = vector.load %arg11[%c97, %c0_259, %c0_260] : memref<110x8x256xf32, #tpu.memory_space<vmem>>, vector<1x8x256xf32>
    %511 = vector.shape_cast %510 : vector<1x8x256xf32> to vector<8x256xf32>
    %c176_i32_261 = arith.constant 176 : i32
    %512 = tpu.dynamic_rotate %344 by %c176_i32_261 dim 1 : vector<8x256xf32>, i32 -> vector<8x256xf32>
    %513 = arith.mulf %511, %512 : vector<8x256xf32>
    %514 = arith.addf %494, %513 : vector<8x256xf32>
    %c98 = arith.constant 98 : index
    %c0_262 = arith.constant 0 : index
    %c0_263 = arith.constant 0 : index
    %515 = vector.load %arg11[%c98, %c0_262, %c0_263] : memref<110x8x256xf32, #tpu.memory_space<vmem>>, vector<1x8x256xf32>
    %516 = vector.shape_cast %515 : vector<1x8x256xf32> to vector<8x256xf32>
    %c160_i32_264 = arith.constant 160 : i32
    %517 = tpu.dynamic_rotate %344 by %c160_i32_264 dim 1 : vector<8x256xf32>, i32 -> vector<8x256xf32>
    %518 = arith.mulf %516, %517 : vector<8x256xf32>
    %519 = arith.addf %499, %518 : vector<8x256xf32>
    %c99 = arith.constant 99 : index
    %c0_265 = arith.constant 0 : index
    %c0_266 = arith.constant 0 : index
    %520 = vector.load %arg11[%c99, %c0_265, %c0_266] : memref<110x8x256xf32, #tpu.memory_space<vmem>>, vector<1x8x256xf32>
    %521 = vector.shape_cast %520 : vector<1x8x256xf32> to vector<8x256xf32>
    %c144_i32_267 = arith.constant 144 : i32
    %522 = tpu.dynamic_rotate %344 by %c144_i32_267 dim 1 : vector<8x256xf32>, i32 -> vector<8x256xf32>
    %523 = arith.mulf %521, %522 : vector<8x256xf32>
    %524 = arith.addf %504, %523 : vector<8x256xf32>
    %c100 = arith.constant 100 : index
    %c0_268 = arith.constant 0 : index
    %c0_269 = arith.constant 0 : index
    %525 = vector.load %arg11[%c100, %c0_268, %c0_269] : memref<110x8x256xf32, #tpu.memory_space<vmem>>, vector<1x8x256xf32>
    %526 = vector.shape_cast %525 : vector<1x8x256xf32> to vector<8x256xf32>
    %c128_i32_270 = arith.constant 128 : i32
    %527 = tpu.dynamic_rotate %344 by %c128_i32_270 dim 1 : vector<8x256xf32>, i32 -> vector<8x256xf32>
    %528 = arith.mulf %526, %527 : vector<8x256xf32>
    %529 = arith.addf %509, %528 : vector<8x256xf32>
    %c101 = arith.constant 101 : index
    %c0_271 = arith.constant 0 : index
    %c0_272 = arith.constant 0 : index
    %530 = vector.load %arg11[%c101, %c0_271, %c0_272] : memref<110x8x256xf32, #tpu.memory_space<vmem>>, vector<1x8x256xf32>
    %531 = vector.shape_cast %530 : vector<1x8x256xf32> to vector<8x256xf32>
    %c112_i32_273 = arith.constant 112 : i32
    %532 = tpu.dynamic_rotate %344 by %c112_i32_273 dim 1 : vector<8x256xf32>, i32 -> vector<8x256xf32>
    %533 = arith.mulf %531, %532 : vector<8x256xf32>
    %534 = arith.addf %514, %533 : vector<8x256xf32>
    %c102 = arith.constant 102 : index
    %c0_274 = arith.constant 0 : index
    %c0_275 = arith.constant 0 : index
    %535 = vector.load %arg11[%c102, %c0_274, %c0_275] : memref<110x8x256xf32, #tpu.memory_space<vmem>>, vector<1x8x256xf32>
    %536 = vector.shape_cast %535 : vector<1x8x256xf32> to vector<8x256xf32>
    %c96_i32_276 = arith.constant 96 : i32
    %537 = tpu.dynamic_rotate %344 by %c96_i32_276 dim 1 : vector<8x256xf32>, i32 -> vector<8x256xf32>
    %538 = arith.mulf %536, %537 : vector<8x256xf32>
    %539 = arith.addf %519, %538 : vector<8x256xf32>
    %540 = arith.addf %539, %524 : vector<8x256xf32>
    %541 = arith.addf %540, %529 : vector<8x256xf32>
    %542 = arith.addf %541, %534 : vector<8x256xf32>
    %543 = arith.addf %380, %436 : vector<8x256xf32>
    %544 = arith.addf %542, %162 : vector<8x256xf32>
    %545 = arith.addf %543, %544 : vector<8x256xf32>
    %cst_277 = arith.constant dense<0.000000e+00> : vector<8x256xf32>
    %546 = tpu.matmul %27, %545, %cst_277 {dimension_numbers = #tpu.dot_dimension_numbers<[1], [0], [0], [1], [0, 0, 1, 1], [], []>} : vector<8x8xf32>, vector<8x256xf32>, vector<8x256xf32> -> vector<8x256xf32>
    %547 = vector.broadcast %28 : vector<8x1xf32> to vector<8x256xf32>
    %548 = arith.addf %546, %547 : vector<8x256xf32>
    %549 = arith.mulf %548, %36 : vector<8x256xf32>
    %cst_278 = arith.constant dense<0.000000e+00> : vector<8x256xf32>
    %550 = tpu.matmul %27, %549, %cst_278 {dimension_numbers = #tpu.dot_dimension_numbers<[1], [0], [0], [1], [0, 0, 1, 1], [], []>} : vector<8x8xf32>, vector<8x256xf32>, vector<8x256xf32> -> vector<8x256xf32>
    %551 = vector.broadcast %28 : vector<8x1xf32> to vector<8x256xf32>
    %552 = arith.addf %550, %551 : vector<8x256xf32>
    %c0_279 = arith.constant 0 : index
    %c0_280 = arith.constant 0 : index
    %c0_281 = arith.constant 0 : index
    %553 = vector.load %arg12[%c0_279, %c0_280, %c0_281] : memref<1x8x256xf32, #tpu.memory_space<vmem>>, vector<1x8x256xf32>
    %554 = vector.shape_cast %553 : vector<1x8x256xf32> to vector<8x256xf32>
    %555 = vector.shape_cast %552 : vector<8x256xf32> to vector<1x8x256xf32>
    tpu.vector_store %arg12[%c0_279, %c0_280, %c0_281], %555 {strides = array<i32>} : memref<1x8x256xf32, #tpu.memory_space<vmem>>, vector<1x8x256xf32>,
    return
  }
  func.func @transform_0(%arg0: i32) -> (i32, i32, i32) {
    %c0_i32 = arith.constant 0 : i32
    %c0_i32_0 = arith.constant 0 : i32
    %c0_i32_1 = arith.constant 0 : i32
    return %arg0, %c0_i32, %c0_i32_0 : i32, i32, i32
  }
  func.func @transform_1(%arg0: i32) -> (i32, i32) {
    %c0_i32 = arith.constant 0 : i32
    %c0_i32_0 = arith.constant 0 : i32
    %c0_i32_1 = arith.constant 0 : i32
    return %c0_i32, %c0_i32_0 : i32, i32
  }
  func.func @transform_2(%arg0: i32) -> (i32, i32) {
    %c0_i32 = arith.constant 0 : i32
    %c0_i32_0 = arith.constant 0 : i32
    %c0_i32_1 = arith.constant 0 : i32
    return %c0_i32, %c0_i32_0 : i32, i32
  }
  func.func @transform_3(%arg0: i32) -> (i32, i32) {
    %c0_i32 = arith.constant 0 : i32
    %c0_i32_0 = arith.constant 0 : i32
    %c0_i32_1 = arith.constant 0 : i32
    return %c0_i32, %c0_i32_0 : i32, i32
  }
  func.func @transform_4(%arg0: i32) -> (i32, i32) {
    %c0_i32 = arith.constant 0 : i32
    %c0_i32_0 = arith.constant 0 : i32
    %c0_i32_1 = arith.constant 0 : i32
    return %c0_i32, %c0_i32_0 : i32, i32
  }
  func.func @transform_5(%arg0: i32) -> (i32, i32) {
    %c0_i32 = arith.constant 0 : i32
    %c0_i32_0 = arith.constant 0 : i32
    %c0_i32_1 = arith.constant 0 : i32
    return %c0_i32, %c0_i32_0 : i32, i32
  }
  func.func @transform_6(%arg0: i32) -> (i32, i32) {
    %c0_i32 = arith.constant 0 : i32
    %c0_i32_0 = arith.constant 0 : i32
    %c0_i32_1 = arith.constant 0 : i32
    return %c0_i32, %c0_i32_0 : i32, i32
  }
  func.func @transform_7(%arg0: i32) -> (i32, i32) {
    %c0_i32 = arith.constant 0 : i32
    %c0_i32_0 = arith.constant 0 : i32
    %c0_i32_1 = arith.constant 0 : i32
    return %c0_i32, %c0_i32_0 : i32, i32
  }
  func.func @transform_8(%arg0: i32) -> (i32, i32) {
    %c0_i32 = arith.constant 0 : i32
    %c0_i32_0 = arith.constant 0 : i32
    %c0_i32_1 = arith.constant 0 : i32
    return %c0_i32, %c0_i32_0 : i32, i32
  }
  func.func @transform_9(%arg0: i32) -> (i32, i32) {
    %c0_i32 = arith.constant 0 : i32
    %c0_i32_0 = arith.constant 0 : i32
    %c0_i32_1 = arith.constant 0 : i32
    return %c0_i32, %c0_i32_0 : i32, i32
  }
  func.func @transform_10(%arg0: i32) -> (i32, i32, i32) {
    %c0_i32 = arith.constant 0 : i32
    %c0_i32_0 = arith.constant 0 : i32
    %c0_i32_1 = arith.constant 0 : i32
    %c0_i32_2 = arith.constant 0 : i32
    return %c0_i32, %c0_i32_0, %c0_i32_1 : i32, i32, i32
  }
  func.func @transform_11(%arg0: i32) -> (i32, i32, i32) {
    %c0_i32 = arith.constant 0 : i32
    %c0_i32_0 = arith.constant 0 : i32
    %c0_i32_1 = arith.constant 0 : i32
    return %arg0, %c0_i32, %c0_i32_0 : i32, i32, i32
  }
}

</mosaic_0001>

<bundles_post_ra>
// kernel: tpu_custom_call.1
= control target key start
LH: loop header
LB: loop body
LE: loop exit
PB: predicated region body
PF: predicated region fallthrough
CT: control target
= control target key end

     0   :  { %16 = vsyncpa [#allocation3], 0  ;;  %s3349_s0 = inlined_call_operand.vmem [shape: f32[1,8,256], index: 0, kind: input, shape index: {}]   ;;  %s3350_s1 = inlined_call_operand.vmem [shape: f32[256,32], index: 1, kind: input, shape index: {}]   ;;  %s3351_s2 = inlined_call_operand.vmem [shape: f32[32,256], index: 2, kind: input, shape index: {}]   ;;  %s3352_s3 = inlined_call_operand.vmem [shape: f32[16,8], index: 3, kind: input, shape index: {}]   ;;  %s3353_s4 = inlined_call_operand.vmem [shape: f32[16,1], index: 4, kind: input, shape index: {}]   ;;  %s3354_s5 = inlined_call_operand.vmem [shape: f32[16,16], index: 5, kind: input, shape index: {}]   ;;  %s3355_s6 = inlined_call_operand.vmem [shape: f32[16,1], index: 6, kind: input, shape index: {}]   ;;  %s3356_s7 = inlined_call_operand.vmem [shape: f32[16,32], index: 7, kind: input, shape index: {}]   ;;  %s3357_s8 = inlined_call_operand.vmem [shape: f32[8,8], index: 8, kind: input, shape index: {}]   ;;  %s3358_s9 = inlined_call_operand.vmem [shape: f32[8,1], index: 9, kind: input, shape index: {}]   ;;  %s3359_s10 = inlined_call_operand.hbm [shape: f32[110,8,256], index: 10, kind: input, shape index: {}]   ;;  %s3360_s11 = inlined_call_operand.hbm [shape: f32[1,8,256], index: 11, kind: output, shape index: {}]  }
   0x1   :  { %17 = vsyncpa [#allocation4], 0  ;;  %s2101_s17 = smov [#allocation2]   ;;  %s2053_s21 = scalar_lea.hbm %s3359_s10, 28160 }
   0x2   :  { %s43_s18 = sshll.u32 %s2101_s17, 4  ;;  %p2054_p0 = scmp.ne.s32.totalorder %s3359_s10, %s2053_s21  ;;  %s44_s18 = int_to_ptr.vmem [resolvable:$true] %s43_s18 }
   0x3   :  { %p2057_p1 = scmp.lt.u32.totalorder %s2053_s21, %s3359_s10 }
   0x5   :  { %p2059_p2 = pnand %p2057_p1, %p2054_p0 }
   0x7   :  { %2062 = shalt.err (!%p2059_p2)
}
   0x8   :  { %s2063_s26 = scalar_lea.vmem %s44_s18, 28160  ;;  %p2068_p4 = scmp.lt.s32.totalorder %s44_s18, %s44_s18 }
   0x9   :  { %p2064_p3 = scmp.ne.s32.totalorder %s44_s18, %s2063_s26  ;;  %p2069_p5 = scmp.lt.s32.totalorder %s2063_s26, %s2063_s26 }
   0xb   :  { %p2070_p6 = por %p2069_p5, %p2068_p4 }
   0xd   :  { %p2071_p7 = pnand %p2070_p6, %p2064_p3 }
   0xf   :  { %2074 = shalt.err (!%p2071_p7)
}
  0x10   :  { %s2102_s27 = smov 256   ;;  %s2103_s28 = smov 16  }
  0x11   :  { %49 = dma.hbm_to_vmem [thread:$0]  %s3359_s10, 28160, %s44_s18, [#allocation3], %s2102_s27, %s2102_s27, %s2103_s28  }
  0x12   :  { %2097 = dma.done.wait [#allocation3], 28160  }
  0x13   :  { %2098 = vsyncadd [#allocation3], 4294939136  ;;  %v71_v0 = vld [vmem:[%s3350_s1 + $0x80] sm:$0xff]  ;;  %v72_v1 = vld [vmem:[%s3350_s1 + $0x88] sm:$0xff]  ;;  %vm171_vm0 = vcmask 64512   ;;  %v2104_v52 = vmov 0  }
  0x14   :  { %v55_v2 = vld [vmem:[%s3350_s1] sm:$0xff]  ;;  %v1950_v3 = vpack.c.bf16 %v72_v1, %v71_v0  ;;  %v56_v4 = vld [vmem:[%s3350_s1 + $0x8] sm:$0xff]  ;;  %v73_v5 = vld [vmem:[%s3350_s1 + $0x90] sm:$0xff]  ;;  %2042 = vset.pattern.permute.xlu0 %v2104_v52  ;;  %2043 = vset.pattern.permute.xlu1 %v2104_v52  ;;  %vm269_vm1 = vcmask 130048   ;;  %vm375_vm2 = vcmask 261120   ;;  %s2108_s14 = smov 33  }
  0x15   :  { %v74_v6 = vld [vmem:[%s3350_s1 + $0x98] sm:$0xff]  ;;  %v1952_v7 = vpack.c.bf16 %v56_v4, %v55_v2  ;;  %v57_v9 = vld [vmem:[%s3350_s1 + $0x10] sm:$0xff]  ;;  %v75_v11 = vld [vmem:[%s3350_s1 + $0xa0] sm:$0xff]  ;;  %s2109_s15 = smov 32   ;;  %s2111_s16 = smov 18  }
  0x16   :  { %v1954_v8 = vpack.c.bf16 %v74_v6, %v73_v5  ;;  %v58_v10 = vld [vmem:[%s3350_s1 + $0x18] sm:$0xff]  ;;  %1951 = vmatprep.subr.bf16.mxu0 %v1950_v3  ;;  %v76_v12 = vld [vmem:[%s3350_s1 + $0xa8] sm:$0xff]  ;;  %v59_v15 = vld [vmem:[%s3350_s1 + $0x20] sm:$0xff]  ;;  %s2112_s17 = smov 17   ;;  %s2114_s19 = smov 14  }
  0x17   :  { %1953 = vmatpush3.bf16.msra.mxu0 %v1952_v7  ;;  %v1956_v13 = vpack.c.bf16 %v58_v10, %v57_v9  ;;  %v1958_v14 = vpack.c.bf16 %v76_v12, %v75_v11  ;;  %v60_v16 = vld [vmem:[%s3350_s1 + $0x28] sm:$0xff]  ;;  %v77_v17 = vld [vmem:[%s3350_s1 + $0xb0] sm:$0xff]  ;;  %v78_v18 = vld [vmem:[%s3350_s1 + $0xb8] sm:$0xff]  ;;  %s2115_s20 = smov 2   ;;  %s2116_s10 = smov 1  }
  0x18   :  { %1955 = vmatprep.subr.bf16.mxu0 %v1954_v8  ;;  %v1960_v19 = vpack.c.bf16 %v60_v16, %v59_v15  ;;  %v1962_v20 = vpack.c.bf16 %v78_v18, %v77_v17  ;;  %v61_v21 = vld [vmem:[%s3350_s1 + $0x30] sm:$0xff]  ;;  %v62_v22 = vld [vmem:[%s3350_s1 + $0x38] sm:$0xff]  ;;  %v79_v23 = vld [vmem:[%s3350_s1 + $0xc0] sm:$0xff]  ;;  %v3361_v15 = vmov 0.0   ;;  %s2117_s18 = smov 127   ;;  %s2118_s21 = smov 126  }
  0x19   :  { %v80_v24 = vld [vmem:[%s3350_s1 + $0xc8] sm:$0xff]  ;;  %v1964_v26 = vpack.c.bf16 %v62_v22, %v61_v21  ;;  %v63_v28 = vld [vmem:[%s3350_s1 + $0x40] sm:$0xff]  ;;  %v81_v30 = vld [vmem:[%s3350_s1 + $0xd0] sm:$0xff]  ;;  %s2119_s22 = smov 114   ;;  %s2121_s23 = smov 112  }
  0x1a   :  { %v2279_v25 = vld [vmem:[%s3349_s0 + $0x8] sm:$0xff]  ;;  %v1966_v27 = vpack.c.bf16 %v80_v24, %v79_v23  ;;  %v82_v31 = vld [vmem:[%s3350_s1 + $0xd8] sm:$0xff]  ;;  %v65_v34 = vld [vmem:[%s3350_s1 + $0x50] sm:$0xff]  ;;  %s2122_s24 = smov 111   ;;  %s2124_s25 = smov 98  }
  0x1b   :  { %1957 = vmatpush3.bf16.msra.mxu0 %v1956_v13  ;;  %151 = vmatprep.mubr.f32.mxu0 %v2279_v25  ;;  %v64_v29 = vld [vmem:[%s3350_s1 + $0x48] sm:$0xff]  ;;  %v1970_v33 = vpack.c.bf16 %v82_v31, %v81_v30  ;;  %v66_v35 = vld [vmem:[%s3350_s1 + $0x58] sm:$0xff]  ;;  %v83_v36 = vld [vmem:[%s3350_s1 + $0xe0] sm:$0xff]  ;;  %s2126_s26 = smov 96   ;;  %s2127_s27 = smov 95  }
  0x1c   :  { %1959 = vmatprep.subr.bf16.mxu0 %v1958_v14  ;;  %v1968_v32 = vpack.c.bf16 %v64_v29, %v63_v28  ;;  %v84_v37 = vld [vmem:[%s3350_s1 + $0xe8] sm:$0xff]  ;;  %v1972_v38 = vpack.c.bf16 %v66_v35, %v65_v34  ;;  %v67_v40 = vld [vmem:[%s3350_s1 + $0x60] sm:$0xff]  ;;  %v85_v42 = vld [vmem:[%s3350_s1 + $0xf0] sm:$0xff]  ;;  %s2129_s29 = smov 10   ;;  %s2130_s30 = smov 9  }
  0x1d   :  { %v1974_v39 = vpack.c.bf16 %v84_v37, %v83_v36  ;;  %v68_v41 = vld [vmem:[%s3350_s1 + $0x68] sm:$0xff]  ;;  %v86_v43 = vld [vmem:[%s3350_s1 + $0xf8] sm:$0xff]  ;;  %v69_v46 = vld [vmem:[%s3350_s1 + $0x70] sm:$0xff]  ;;  %s2131_s12 = smov 8   ;;  %s2133_s13 = smov 6  }
  0x1e   :  { %v1976_v44 = vpack.c.bf16 %v68_v41, %v67_v40  ;;  %v1978_v45 = vpack.c.bf16 %v86_v43, %v85_v42  ;;  %v70_v47 = vld [vmem:[%s3350_s1 + $0x78] sm:$0xff]  ;;  %v2327_v49 = vld [vmem:[%s3349_s0] sm:$0xff]  ;;  %v160_v53 = vld [vmem:[%s3353_s4 + $0x8] sm:$0xff]  ;;  %v462_v40 = vmul.f32 %v2279_v25, %v2279_v25  ;;  %s2123_s1 = smov 110   ;;  %s2125_s0 = smov 97  }
  0x1f   :  { %1961 = vmatpush3.bf16.msra.mxu0 %v1960_v19  ;;  %v1980_v48 = vpack.c.bf16 %v70_v47, %v69_v46  ;;  %v157_v50 = vld [vmem:[%s3352_s3] sm:$0xff]  ;;  %v158_v58 = vld [vmem:[%s3352_s3 + $0x8] sm:$0xff]  ;;  %v370_v9 = vld [vmem:[%s3351_s2 + $0x18] sm:$0xff]  ;;  %v461_v41 = vmul.f32 %v2327_v49, %v2327_v49  ;;  %s2110_s3 = smov 31  }
  0x20   :  { %1963 = vmatprep.subr.bf16.mxu0 %v1962_v20  ;;  %1940 = vmatprep.mubr.msk.f32.mxu1 %vm171_vm0, %v157_v50  ;;  %v159_v51 = vld [vmem:[%s3353_s4] sm:$0xff]  ;;  %v258_v61 = vld [vmem:[%s3355_s6 + $0x8] sm:$0xff]  ;;  %v369_v12 = vld [vmem:[%s3351_s2 + $0x10] sm:$0xff]  ;;  %s2106_s4 = smov 34  }
  0x21   :  { %163 = vperm.xlu0 %2042, %v159_v51   ;;  %v460_v54 = vld [vmem:[%s3358_s9] sm:$0xff]  ;;  %v256_v7 = vld [vmem:[%s3354_s5 + $0x8] sm:$0xff]  ;;  %v374_v14 = vld [vmem:[%s3351_s2 + $0x38] sm:$0xff]  ;;  %s2107_s9 = smov 30  }
  0x22   :  { %v255_v59 = vld [vmem:[%s3354_s5] sm:$0xff]  ;;  %v368_v8 = vld [vmem:[%s3351_s2 + $0x8] sm:$0xff]  ;;  %v373_v19 = vld [vmem:[%s3351_s2 + $0x30] sm:$0xff]  ;;  %s2120_s5 = smov 113  }
  0x23   :  { %1965 = vmatpush3.bf16.msra.mxu0 %v1964_v26  ;;  %v257_v60 = vld [vmem:[%s3355_s6] sm:$0xff]  ;;  %v1986_v11 = vpack.c.bf16 %v370_v9, %v368_v8  ;;  %v372_v13 = vld [vmem:[%s3351_s2 + $0x28] sm:$0xff]  ;;  %s2113_s6 = smov 15  }
  0x24   :  { %1967 = vmatprep.subr.bf16.mxu0 %v1966_v27  ;;  %261 = vperm.xlu1 %2043, %v257_v60   ;;  %v367_v10 = vld [vmem:[%s3351_s2] sm:$0xff]  ;;  %v1990_v17 = vpack.c.bf16 %v374_v14, %v372_v13 }
  0x25   :  { %168 = vperm.xlu0 %2042, %v160_v53   ;;  %v1988_v16 = vpack.c.bf16 %v369_v12, %v367_v10  ;;  %v371_v18 = vld [vmem:[%s3351_s2 + $0x20] sm:$0xff]  ;;  %s2128_s2 = smov 94  }
  0x26   :  { %v1992_v20 = vpack.c.bf16 %v373_v19, %v371_v18  ;;  %v363_v34 = vld [vmem:[%s3356_s7] sm:$0xff] }
  0x27   :  { %1969 = vmatpush3.bf16.msra.mxu0 %v1968_v32  ;;  %v459_v51 = vld [vmem:[%s3357_s8] sm:$0xff] }
  0x28   :  { %1971 = vmatprep.subr.bf16.mxu0 %v1970_v33  ;;  %266 = vperm.xlu1 %2043, %v258_v61  }
  0x29   :  { %469 = vperm.xlu0 %2042, %v460_v54  }
  0x2b   :  { %1973 = vmatpush3.bf16.msra.mxu0 %v1972_v38  ;;  %v364_v38 = vld [vmem:[%s3356_s7 + $0x8] sm:$0xff]  ;;  %s2132_s7 = smov 7  }
  0x2c   :  { %1975 = vmatprep.subr.bf16.mxu0 %v1974_v39 }
  0x2f   :  { %1977 = vmatpush3.bf16.msra.mxu0 %v1976_v44 }
  0x30   :  { %1979 = vmatprep.subr.bf16.mxu0 %v1978_v45 }
  0x33   :  { %1981 = vmatpush3.bf16.msra.mxu0 %v1980_v48 }
  0x36   :  { %152 = vmatmul.mubr.f32.vlgmr.msra.gmra.mrb[0].mxu0 %v2327_v49 }
  0xa0   :  { %v164_v62 = vpop.permute.xlu0 %163 }
  0xa3   :  { %v262_v21 = vpop.permute.xlu1 %261 }
  0xa4   :  { %v169_v63 = vpop.permute.xlu0 %168 }
  0xa7   :  { %v267_v22 = vpop.permute.xlu1 %266 }
  0xa8   :  { %v2403_v25 = vpop.permute.xlu0 %469 }
  0xa9   :  { %3368 = vst [vmem:[#allocation8_spill] sm:$0xff] %v2403_v25 }
 0x109   :  { %v1928_v55 = vpop.f32.mrb[0].mxu0 }
 0x10a   :  { %v1929_v56 = vpop.f32.mrb[1].mxu0 }
 0x10b   :  { %v1930_v57 = vadd.f32 %v1929_v56, %v1928_v55 }
 0x10d   :  { %1938 = vmatprep.subr.mxu1 %v1930_v57 }
 0x10e   :  { %1939 = vmatpush3.msra.mxu1 %v1930_v57 }
 0x10f   :  { %1941 = vmatmul.mubr.msk.f32.vlgmr.msra.gmra.mrb[0].mxu1 %vm171_vm0, %v158_v58 }
 0x110   :  { %1947 = vmatprep.mubr.msk.f32.mxu1 %vm269_vm1, %v255_v59 }
 0x1e2   :  { %v1942_v0 = vpop.f32.mrb[0].mxu1 }
 0x1e3   :  { %v250_v1 = vadd.f32 %v1942_v0, %v169_v63  ;;  %v244_v2 = vpop.f32.mrb[1].mxu1 }
 0x1e4   :  { %v245_v3 = vadd.f32 %v244_v2, %v164_v62 }
 0x1e5   :  { %v254_v4 = vmax.f32 %v250_v1, 0.0 }
 0x1e6   :  { %v253_v5 = vmax.f32 %v245_v3, 0.0 }
 0x1e8   :  { %v1982_v6 = vpack.c.bf16 %v254_v4, %v253_v5 }
 0x1ea   :  { %1983 = vmatprep.subr.bf16.mxu1 %v1982_v6 }
 0x1eb   :  { %1985 = vmatpush3.bf16.msra.mxu1 %v1982_v6 }
 0x1ec   :  { %1987 = vmatprep.subr.bf16.mxu1 %v1986_v11 }
 0x1ee   :  { %1948 = vmatmul.mubr.msk.f32.vlgmr.msra.gmra.mrb[2].mxu1 %vm269_vm1, %v256_v7 }
 0x1ef   :  { %446 = vmatprep.mubr.f32.mxu1 %v3361_v15  ;;  %1989 = vmatpush1.bf16.msra.mxu1 %v1988_v16 }
 0x1f0   :  { %1991 = vmatprep.subr.bf16.mxu1 %v1990_v17  ;;  %v557_v17 = vlaneseq }
 0x1f3   :  { %1993 = vmatpush1.bf16.msra.mxu1 %v1992_v20  ;;  %v2517_v20 = vand.u32 127, %v557_v17 }
 0x1f5   :  { %vm559_vm3 = vcmp.lt.s32.totalorder %v2517_v20, 34  ;;  %vm609_vm4 = vcmp.lt.s32.totalorder %v2517_v20, 30  ;;  %vm573_vm5 = vcmp.lt.s32.totalorder %v2517_v20, 33  ;;  %vm585_vm6 = vcmp.lt.s32.totalorder %v2517_v20, 32 }
 0x1f6   :  { %vm597_vm7 = vcmp.lt.s32.totalorder %v2517_v20, 31  ;;  %vm623_vm8 = vcmp.lt.s32.totalorder %v2517_v20, 18  ;;  %vm637_vm9 = vcmp.lt.s32.totalorder %v2517_v20, 17  ;;  %vm651_vm10 = vcmp.lt.s32.totalorder %v2517_v20, 16 }
 0x1f7   :  { %vm665_vm11 = vcmp.lt.s32.totalorder %v2517_v20, 15  ;;  %vm679_vm12 = vcmp.lt.s32.totalorder %v2517_v20, 14  ;;  %vm693_vm13 = vcmp.lt.s32.totalorder %v2517_v20, 2  ;;  %vm707_vm14 = vcmp.lt.s32.totalorder %v2517_v20, 1 }
 0x1f8   :  { %vm728_vm15 = vcmp.lt.s32.totalorder %v2517_v20, 127  ;;  %vm742_vm1 = vcmp.lt.s32.totalorder %v2517_v20, 126 }
 0x2c1   :  { %v1949_v23 = vpop.f32.mrb[2].mxu1 }
 0x2c2   :  { %v348_v24 = vadd.f32 %v1949_v23, %v267_v22  ;;  %v342_v26 = vpop.f32.mrb[3].mxu1 }
 0x2c3   :  { %v343_v27 = vadd.f32 %v342_v26, %v262_v21  ;;  %v552_v26 = vld [vmem:[#allocation2 + $0x8] sm:$0xff] }
 0x2c4   :  { %v1890_v28 = vmul.f32 -1.442695, %v348_v24  ;;  %v551_v24 = vld [vmem:[#allocation2] sm:$0xff] }
 0x2c5   :  { %v1889_v29 = vmul.f32 -1.442695, %v343_v27 }
 0x2c6   :  { %2044 = vpow2.f32 %v1890_v28 }
 0x2c7   :  { %2046 = vpow2.f32 %v1889_v29 }
 0x2d0   :  { %v2045_v30 = vpop.eup %2044 }
 0x2d1   :  { %v2047_v31 = vpop.eup %2046  ;;  %v358_v32 = vadd.f32 1.0, %v2045_v30 }
 0x2d2   :  { %v357_v33 = vadd.f32 1.0, %v2047_v31  ;;  %v603_v31 = vld [vmem:[#allocation2 + $0x40] sm:$0xff] }
 0x2d4   :  { %2048 = vrcp.f32 %v357_v33 }
 0x2d5   :  { %2050 = vrcp.f32 %v358_v32  ;;  %v604_v32 = vld [vmem:[#allocation2 + $0x48] sm:$0xff] }
 0x2de   :  { %v2049_v35 = vpop.eup %2048 }
 0x2df   :  { %v365_v36 = vmul.f32 %v2049_v35, %v363_v34  ;;  %v2051_v37 = vpop.eup %2050 }
 0x2e0   :  { %v366_v39 = vmul.f32 %v2051_v37, %v364_v38  ;;  %v715_v37 = vld [vmem:[#allocation2 + $0xc0] sm:$0xff]  ;;  %v716_v38 = vld [vmem:[#allocation2 + $0xc8] sm:$0xff] }
 0x2e1   :  { %1891 = vmatmul.mubr.msk.f32.vlgmr.msra.gmra.mrb[4].mxu1 %vm375_vm2, %v365_v36 }
 0x2e2   :  { %452 = vmatprep.mubr.f32.mxu1 %v3361_v15 }
 0x2e5   :  { %1892 = vmatmul.mubr.msk.f32.gmra.mrb[6].mxu1 %vm375_vm2, %v366_v39  ;;  %v549_v39 = vld [vmem:[#allocation2 + $0x670] sm:$0xff]  ;;  %vm756_vm2 = vcmp.lt.s32.totalorder %v2517_v20, 114 }
 0x2e6   :  { %539 = vmatprep.mubr.f32.mxu1 %v3361_v15 }
 0x3b4   :  { %v448_v42 = vpop.f32.mrb[4].mxu1 }
 0x3b5   :  { %v450_v43 = vpop.f32.mrb[5].mxu1  ;;  %v463_v45 = vmul.f32 %v461_v41, %v448_v42 }
 0x3b6   :  { %v464_v44 = vmul.f32 %v462_v40, %v450_v43  ;;  %v550_v40 = vld [vmem:[#allocation2 + $0x678] sm:$0xff] }
 0x3b8   :  { %v454_v46 = vpop.f32.mrb[6].mxu1 }
 0x3b9   :  { %v465_v47 = vmul.f32 %v463_v45, %v454_v46  ;;  %v456_v48 = vpop.f32.mrb[7].mxu1 }
 0x3ba   :  { %v466_v50 = vmul.f32 %v464_v44, %v456_v48 }
 0x3bc   :  { %475 = vmatprep.subr.mxu1 %v466_v50 }
 0x3bd   :  { %476 = vmatpush1.msra.mxu1 %v465_v47 }
 0x3be   :  { %1893 = vmatmul.mubr.msk.f32.vlgmr.msra.gmra.mrb[8].mxu1 %vm171_vm0, %v459_v51 }
 0x3bf   :  { %1788 = vmatprep.mubr.f32.mxu1 %v3361_v15 }
 0x491   :  { %v541_v49 = vpop.f32.mrb[8].mxu1 }
 0x492   :  { %v542_v52 = vadd.f32 %v541_v49, %v2403_v25  ;;  %v543_v53 = vpop.f32.mrb[9].mxu1 }
 0x493   :  { %v544_v54 = vadd.f32 %v543_v53, %v2403_v25  ;;  %v617_v53 = vld [vmem:[#allocation2 + $0x50] sm:$0xff] }
 0x494   :  { %v2407_v55 = vmax.f32 %v542_v52, 0.0  ;;  %v567_v52 = vld [vmem:[#allocation2 + $0x10] sm:$0xff] }
 0x495   :  { %v2409_v56 = vmax.f32 %v544_v54, 0.0  ;;  %v618_v54 = vld [vmem:[#allocation2 + $0x58] sm:$0xff] }
 0x496   :  { %3369 = vst [vmem:[#allocation9_spill] sm:$0xff] %v2407_v55  ;;  %553 = vrot.lane.b32.xlu1 %v2407_v55, %s2106_s4  ;;  %v2540_v45 = vmul.f32 %v715_v37, %v2407_v55  ;;  %v646_v37 = vld [vmem:[#allocation2 + $0x78] sm:$0xff] }
 0x497   :  { %3370 = vst [vmem:[#allocation10_spill] sm:$0xff] %v2409_v56  ;;  %555 = vrot.lane.b32.xlu0 %v2409_v56, %s2106_s4  ;;  %v2543_v46 = vmul.f32 %v716_v38, %v2409_v56  ;;  %s2134_s4 = smov 5  }
 0x49a   :  { %605 = vrot.lane.b32.xlu1 %v2407_v55, %s2107_s9 }
 0x49b   :  { %607 = vrot.lane.b32.xlu0 %v2409_v56, %s2107_s9  ;;  %s2135_s9 = smov 4  }
 0x49e   :  { %569 = vrot.lane.b32.xlu1 %v2407_v55, %s2108_s14 }
 0x49f   :  { %571 = vrot.lane.b32.xlu0 %v2409_v56, %s2108_s14  ;;  %s2136_s14 = smov 3  }
 0x4a2   :  { %581 = vrot.lane.b32.xlu1 %v2407_v55, %s2109_s15 }
 0x4a3   :  { %583 = vrot.lane.b32.xlu0 %v2409_v56, %s2109_s15 }
 0x4a6   :  { %593 = vrot.lane.b32.xlu1 %v2407_v55, %s2110_s3 }
 0x4a7   :  { %595 = vrot.lane.b32.xlu0 %v2409_v56, %s2110_s3  ;;  %s2137_s3 = smov 125  }
 0x4aa   :  { %619 = vrot.lane.b32.xlu1 %v2407_v55, %s2111_s16 }
 0x4ab   :  { %621 = vrot.lane.b32.xlu0 %v2409_v56, %s2111_s16  ;;  %s2138_s16 = smov 124  }
 0x4ae   :  { %633 = vrot.lane.b32.xlu1 %v2407_v55, %s2112_s17 }
 0x4af   :  { %635 = vrot.lane.b32.xlu0 %v2409_v56, %s2112_s17  ;;  %s2139_s17 = smov 123  }
 0x4b2   :  { %647 = vrot.lane.b32.xlu1 %v2407_v55, %s2103_s28 }
 0x4b3   :  { %649 = vrot.lane.b32.xlu0 %v2409_v56, %s2103_s28 }
 0x4b6   :  { %661 = vrot.lane.b32.xlu1 %v2407_v55, %s2113_s6 }
 0x4b7   :  { %663 = vrot.lane.b32.xlu0 %v2409_v56, %s2113_s6  ;;  %s2140_s6 = smov 122  }
 0x4ba   :  { %675 = vrot.lane.b32.xlu1 %v2407_v55, %s2114_s19 }
 0x4bb   :  { %677 = vrot.lane.b32.xlu0 %v2409_v56, %s2114_s19  ;;  %s2141_s19 = smov 121  }
 0x4be   :  { %689 = vrot.lane.b32.xlu1 %v2407_v55, %s2115_s20 }
 0x4bf   :  { %691 = vrot.lane.b32.xlu0 %v2409_v56, %s2115_s20 }
 0x4c2   :  { %703 = vrot.lane.b32.xlu1 %v2407_v55, %s2116_s10 }
 0x4c3   :  { %705 = vrot.lane.b32.xlu0 %v2409_v56, %s2116_s10 }
 0x4c6   :  { %724 = vrot.lane.b32.xlu1 %v2407_v55, %s2117_s18 }
 0x4c7   :  { %726 = vrot.lane.b32.xlu0 %v2409_v56, %s2117_s18 }
 0x4ca   :  { %738 = vrot.lane.b32.xlu1 %v2407_v55, %s2118_s21 }
 0x4cb   :  { %740 = vrot.lane.b32.xlu0 %v2409_v56, %s2118_s21 }
 0x4ce   :  { %752 = vrot.lane.b32.xlu1 %v2407_v55, %s2119_s22 }
 0x4cf   :  { %754 = vrot.lane.b32.xlu0 %v2409_v56, %s2119_s22  ;;  %s2146_s22 = smov 80  }
 0x4d2   :  { %766 = vrot.lane.b32.xlu1 %v2407_v55, %s2120_s5 }
 0x4d3   :  { %768 = vrot.lane.b32.xlu0 %v2409_v56, %s2120_s5  ;;  %s2147_s5 = smov 64  }
 0x4d6   :  { %780 = vrot.lane.b32.xlu1 %v2407_v55, %s2121_s23 }
 0x4d7   :  { %782 = vrot.lane.b32.xlu0 %v2409_v56, %s2121_s23 }
 0x4da   :  { %794 = vrot.lane.b32.xlu1 %v2407_v55, %s2122_s24 }
 0x4db   :  { %796 = vrot.lane.b32.xlu0 %v2409_v56, %s2122_s24 }
 0x4de   :  { %808 = vrot.lane.b32.xlu1 %v2407_v55, %s2123_s1 }
 0x4df   :  { %810 = vrot.lane.b32.xlu0 %v2409_v56, %s2123_s1 }
 0x4e2   :  { %822 = vrot.lane.b32.xlu1 %v2407_v55, %s2124_s25 }
 0x4e3   :  { %824 = vrot.lane.b32.xlu0 %v2409_v56, %s2124_s25 }
 0x4e6   :  { %836 = vrot.lane.b32.xlu1 %v2407_v55, %s2125_s0 }
 0x4e7   :  { %838 = vrot.lane.b32.xlu0 %v2409_v56, %s2125_s0 }
 0x4ea   :  { %850 = vrot.lane.b32.xlu1 %v2407_v55, %s2126_s26 }
 0x4eb   :  { %852 = vrot.lane.b32.xlu0 %v2409_v56, %s2126_s26 }
 0x4ee   :  { %864 = vrot.lane.b32.xlu1 %v2407_v55, %s2127_s27 }
 0x4ef   :  { %866 = vrot.lane.b32.xlu0 %v2409_v56, %s2127_s27 }
 0x4f2   :  { %878 = vrot.lane.b32.xlu1 %v2407_v55, %s2128_s2 }
 0x4f3   :  { %880 = vrot.lane.b32.xlu0 %v2409_v56, %s2128_s2 }
 0x508   :  { %v554_v57 = vpop.permute.xlu1 %553 }
 0x509   :  { %v556_v58 = vpop.permute.xlu0 %555 }
 0x50a   :  { %v560_v27 = vsel %vm559_vm3, %v554_v57, %v556_v58  ;;  %v561_v28 = vsel %vm559_vm3, %v556_v58, %v554_v57  ;;  %vm770_vm3 = vcmp.lt.s32.totalorder %v2517_v20, 113 }
 0x50b   :  { %v562_v35 = vmul.f32 %v561_v28, %v551_v24  ;;  %v563_v36 = vmul.f32 %v560_v27, %v552_v26  ;;  %v631_v26 = vld [vmem:[#allocation2 + $0x60] sm:$0xff]  ;;  %v632_v27 = vld [vmem:[#allocation2 + $0x68] sm:$0xff] }
 0x50c   :  { %v606_v59 = vpop.permute.xlu1 %605  ;;  %v579_v28 = vld [vmem:[#allocation2 + $0x20] sm:$0xff] }
 0x50d   :  { %v608_v60 = vpop.permute.xlu0 %607  ;;  %v564_v47 = vadd.f32 %v562_v35, %v549_v39  ;;  %v565_v48 = vadd.f32 %v563_v36, %v550_v40  ;;  %v645_v36 = vld [vmem:[#allocation2 + $0x70] sm:$0xff] }
 0x50e   :  { %v610_v33 = vsel %vm609_vm4, %v606_v59, %v608_v60  ;;  %v611_v34 = vsel %vm609_vm4, %v608_v60, %v606_v59  ;;  %v568_v60 = vld [vmem:[#allocation2 + $0x18] sm:$0xff]  ;;  %vm784_vm4 = vcmp.lt.s32.totalorder %v2517_v20, 112 }
 0x50f   :  { %v612_v42 = vmul.f32 %v611_v34, %v603_v31  ;;  %v613_v43 = vmul.f32 %v610_v33, %v604_v32  ;;  %v659_v31 = vld [vmem:[#allocation2 + $0x80] sm:$0xff]  ;;  %v660_v32 = vld [vmem:[#allocation2 + $0x88] sm:$0xff] }
 0x510   :  { %v2475_v61 = vpop.permute.xlu1 %569  ;;  %v580_v33 = vld [vmem:[#allocation2 + $0x28] sm:$0xff] }
 0x511   :  { %v2477_v62 = vpop.permute.xlu0 %571  ;;  %v614_v51 = vadd.f32 %v612_v42, %v564_v47  ;;  %v615_v49 = vadd.f32 %v613_v43, %v565_v48 }
 0x512   :  { %v574_v17 = vsel %vm573_vm5, %v2475_v61, %v2477_v62  ;;  %v575_v24 = vsel %vm573_vm5, %v2477_v62, %v2475_v61  ;;  %vm798_vm5 = vcmp.lt.s32.totalorder %v2517_v20, 111 }
 0x513   :  { %v577_v47 = vmul.f32 %v574_v17, %v568_v60 }
 0x514   :  { %v2479_v63 = vpop.permute.xlu1 %581 }
 0x515   :  { %v2481_v0 = vpop.permute.xlu0 %583 }
 0x516   :  { %v586_v61 = vsel %vm585_vm6, %v2479_v63, %v2481_v0  ;;  %v587_v62 = vsel %vm585_vm6, %v2481_v0, %v2479_v63 }
 0x518   :  { %v2483_v1 = vpop.permute.xlu1 %593 }
 0x519   :  { %v2485_v2 = vpop.permute.xlu0 %595 }
 0x51a   :  { %v598_v39 = vsel %vm597_vm7, %v2483_v1, %v2485_v2  ;;  %v599_v40 = vsel %vm597_vm7, %v2485_v2, %v2483_v1  ;;  %vm812_vm7 = vcmp.lt.s32.totalorder %v2517_v20, 110 }
 0x51c   :  { %v2487_v3 = vpop.permute.xlu1 %619 }
 0x51d   :  { %v2489_v4 = vpop.permute.xlu0 %621 }
 0x51e   :  { %v624_v57 = vsel %vm623_vm8, %v2487_v3, %v2489_v4  ;;  %v625_v58 = vsel %vm623_vm8, %v2489_v4, %v2487_v3  ;;  %vm826_vm8 = vcmp.lt.s32.totalorder %v2517_v20, 98 }
 0x51f   :  { %v626_v34 = vmul.f32 %v625_v58, %v617_v53  ;;  %v627_v35 = vmul.f32 %v624_v57, %v618_v54  ;;  %v588_v54 = vmul.f32 %v587_v62, %v579_v28  ;;  %v589_v57 = vmul.f32 %v586_v61, %v580_v33  ;;  %v688_v28 = vld [vmem:[#allocation2 + $0xa8] sm:$0xff] }
 0x520   :  { %v2491_v5 = vpop.permute.xlu1 %633 }
 0x521   :  { %v2493_v6 = vpop.permute.xlu0 %635 }
 0x522   :  { %v638_v3 = vsel %vm637_vm9, %v2491_v5, %v2493_v6  ;;  %v639_v4 = vsel %vm637_vm9, %v2493_v6, %v2491_v5  ;;  %vm840_vm9 = vcmp.lt.s32.totalorder %v2517_v20, 97 }
 0x523   :  { %v640_v42 = vmul.f32 %v639_v4, %v631_v26  ;;  %v641_v43 = vmul.f32 %v638_v3, %v632_v27  ;;  %v673_v26 = vld [vmem:[#allocation2 + $0x90] sm:$0xff]  ;;  %v674_v27 = vld [vmem:[#allocation2 + $0x98] sm:$0xff]  ;;  %v687_v4 = vld [vmem:[#allocation2 + $0xa0] sm:$0xff] }
 0x524   :  { %v2495_v7 = vpop.permute.xlu1 %647 }
 0x525   :  { %v2497_v8 = vpop.permute.xlu0 %649  ;;  %v642_v1 = vadd.f32 %v640_v42, %v588_v54  ;;  %v643_v2 = vadd.f32 %v641_v43, %v589_v57  ;;  %v765_v43 = vld [vmem:[#allocation2 + $0x108] sm:$0xff] }
 0x526   :  { %v652_v63 = vsel %vm651_vm10, %v2495_v7, %v2497_v8  ;;  %v653_v0 = vsel %vm651_vm10, %v2497_v8, %v2495_v7  ;;  %v576_v8 = vmul.f32 %v575_v24, %v567_v52 }
 0x527   :  { %v654_v58 = vmul.f32 %v653_v0, %v645_v36  ;;  %v655_v15 = vmul.f32 %v652_v63, %v646_v37 }
 0x528   :  { %v2499_v9 = vpop.permute.xlu1 %661  ;;  %v628_v25 = vadd.f32 %v626_v34, %v576_v8  ;;  %v737_v34 = vld [vmem:[#allocation2 + $0xe8] sm:$0xff] }
 0x529   :  { %v2501_v10 = vpop.permute.xlu0 %663 }
 0x52a   :  { %v666_v5 = vsel %vm665_vm11, %v2499_v9, %v2501_v10  ;;  %v667_v6 = vsel %vm665_vm11, %v2501_v10, %v2499_v9  ;;  %v591_v9 = vld [vmem:[#allocation2 + $0x30] sm:$0xff]  ;;  %v592_v10 = vld [vmem:[#allocation2 + $0x38] sm:$0xff]  ;;  %vm854_vm11 = vcmp.lt.s32.totalorder %v2517_v20, 96 }
 0x52b   :  { %v668_v48 = vmul.f32 %v667_v6, %v659_v31  ;;  %v669_v53 = vmul.f32 %v666_v5, %v660_v32  ;;  %v600_v55 = vmul.f32 %v599_v40, %v591_v9  ;;  %v601_v56 = vmul.f32 %v598_v39, %v592_v10  ;;  %v722_v5 = vld [vmem:[#allocation2 + $0xd0] sm:$0xff]  ;;  %v723_v6 = vld [vmem:[#allocation2 + $0xd8] sm:$0xff] }
 0x52c   :  { %v2503_v11 = vpop.permute.xlu1 %675  ;;  %v750_v39 = vld [vmem:[#allocation2 + $0xf0] sm:$0xff]  ;;  %v751_v40 = vld [vmem:[#allocation2 + $0xf8] sm:$0xff] }
 0x52d   :  { %v2505_v12 = vpop.permute.xlu0 %677  ;;  %v670_v24 = vadd.f32 %v668_v48, %v614_v51  ;;  %v671_v3 = vadd.f32 %v669_v53, %v615_v49  ;;  %v701_v51 = vld [vmem:[#allocation2 + $0xb0] sm:$0xff]  ;;  %v702_v49 = vld [vmem:[#allocation2 + $0xb8] sm:$0xff] }
 0x52e   :  { %v680_v52 = vsel %vm679_vm12, %v2503_v11, %v2505_v12  ;;  %v681_v60 = vsel %vm679_vm12, %v2505_v12, %v2503_v11  ;;  %v656_v11 = vadd.f32 %v654_v58, %v600_v55  ;;  %v657_v12 = vadd.f32 %v655_v15, %v601_v56 }
 0x52f   :  { %vm868_vm12 = vcmp.lt.s32.totalorder %v2517_v20, 95 }
 0x530   :  { %v2507_v13 = vpop.permute.xlu1 %689 }
 0x531   :  { %v2509_v14 = vpop.permute.xlu0 %691 }
 0x532   :  { %v694_v61 = vsel %vm693_vm13, %v2507_v13, %v2509_v14  ;;  %v695_v62 = vsel %vm693_vm13, %v2509_v14, %v2507_v13  ;;  %v682_v13 = vmul.f32 %v681_v60, %v673_v26  ;;  %v683_v14 = vmul.f32 %v680_v52, %v674_v27 }
 0x533   :  { %v696_v33 = vmul.f32 %v695_v62, %v687_v4  ;;  %v778_v62 = vld [vmem:[#allocation2 + $0x110] sm:$0xff] }
 0x534   :  { %v2511_v16 = vpop.permute.xlu1 %703 }
 0x535   :  { %v2513_v18 = vpop.permute.xlu0 %705  ;;  %v698_v53 = vadd.f32 %v696_v33, %v642_v1  ;;  %v792_v1 = vld [vmem:[#allocation2 + $0x120] sm:$0xff] }
 0x536   :  { %v708_v31 = vsel %vm707_vm14, %v2511_v16, %v2513_v18  ;;  %v709_v32 = vsel %vm707_vm14, %v2513_v18, %v2511_v16  ;;  %v697_v16 = vmul.f32 %v694_v61, %v688_v28  ;;  %v736_v18 = vld [vmem:[#allocation2 + $0xe0] sm:$0xff] }
 0x537   :  { %v710_v63 = vmul.f32 %v709_v32, %v701_v51  ;;  %v711_v0 = vmul.f32 %v708_v31, %v702_v49  ;;  %v806_v31 = vld [vmem:[#allocation2 + $0x130] sm:$0xff]  ;;  %v807_v32 = vld [vmem:[#allocation2 + $0x138] sm:$0xff] }
 0x538   :  { %v2515_v19 = vpop.permute.xlu1 %724  ;;  %v699_v54 = vadd.f32 %v697_v16, %v643_v2 }
 0x539   :  { %v2519_v21 = vpop.permute.xlu0 %726  ;;  %v712_v58 = vadd.f32 %v710_v63, %v656_v11  ;;  %v713_v26 = vadd.f32 %v711_v0, %v657_v12  ;;  %v793_v11 = vld [vmem:[#allocation2 + $0x128] sm:$0xff] }
 0x53a   :  { %v729_v15 = vsel %vm728_vm15, %v2515_v19, %v2519_v21  ;;  %v730_v55 = vsel %vm728_vm15, %v2519_v21, %v2515_v19  ;;  %v719_v19 = vadd.f32 %v2540_v45, %v670_v24  ;;  %v720_v21 = vadd.f32 %v2543_v46, %v671_v3  ;;  %v764_v46 = vld [vmem:[#allocation2 + $0x100] sm:$0xff] }
 0x53b   :  { %v731_v9 = vmul.f32 %v729_v15, %v722_v5  ;;  %v732_v10 = vmul.f32 %v730_v55, %v723_v6  ;;  %v820_v15 = vld [vmem:[#allocation2 + $0x140] sm:$0xff]  ;;  %v821_v55 = vld [vmem:[#allocation2 + $0x148] sm:$0xff] }
 0x53c   :  { %v2521_v22 = vpop.permute.xlu1 %738 }
 0x53d   :  { %v2524_v23 = vpop.permute.xlu0 %740 }
 0x53e   :  { %v744_v36 = vsel %vm742_vm1, %v2524_v23, %v2521_v22 }
 0x53f   :  { %v746_v45 = vmul.f32 %v744_v36, %v737_v34 }
 0x540   :  { %v2527_v29 = vpop.permute.xlu1 %752 }
 0x541   :  { %v2529_v30 = vpop.permute.xlu0 %754  ;;  %v748_v61 = vadd.f32 %v746_v45, %v699_v54 }
 0x542   :  { %v757_v42 = vsel %vm756_vm2, %v2527_v29, %v2529_v30 }
 0x543   :  { %v759_v27 = vmul.f32 %v757_v42, %v750_v39  ;;  %v834_v42 = vld [vmem:[#allocation2 + $0x150] sm:$0xff] }
 0x544   :  { %v2531_v41 = vpop.permute.xlu1 %766 }
 0x545   :  { %v2535_v44 = vpop.permute.xlu0 %768  ;;  %v761_v5 = vadd.f32 %v759_v27, %v712_v58  ;;  %v876_v27 = vld [vmem:[#allocation2 + $0x180] sm:$0xff] }
 0x546   :  { %v771_v8 = vsel %vm770_vm3, %v2531_v41, %v2535_v44 }
 0x547   :  { %v773_v3 = vmul.f32 %v771_v8, %v764_v46 }
 0x548   :  { %v2551_v50 = vpop.permute.xlu1 %780 }
 0x549   :  { %3371 = vst [vmem:[#allocation11_spill] sm:$0xff] %v2551_v50  ;;  %v2562_v59 = vpop.permute.xlu0 %782  ;;  %v775_v16 = vadd.f32 %v773_v3, %v719_v19  ;;  %v848_v19 = vld [vmem:[#allocation2 + $0x160] sm:$0xff] }
 0x54c   :  { %v2606_v38 = vpop.permute.xlu1 %794 }
 0x54d   :  { %3372 = vst [vmem:[#allocation12_spill] sm:$0xff] %v2606_v38  ;;  %v2617_v7 = vpop.permute.xlu0 %796  ;;  %v629_v38 = vadd.f32 %v627_v35, %v577_v47  ;;  %v743_v35 = vsel %vm742_vm1, %v2521_v22, %v2524_v23  ;;  %v758_v22 = vsel %vm756_vm2, %v2529_v30, %v2527_v29  ;;  %v772_v47 = vsel %vm770_vm3, %v2535_v44, %v2531_v41  ;;  %v779_v41 = vld [vmem:[#allocation2 + $0x118] sm:$0xff] }
 0x54e   :  { %v745_v23 = vmul.f32 %v743_v35, %v736_v18  ;;  %v684_v29 = vadd.f32 %v682_v13, %v628_v25  ;;  %v760_v52 = vmul.f32 %v758_v22, %v751_v40  ;;  %v774_v4 = vmul.f32 %v772_v47, %v765_v43  ;;  %v835_v22 = vld [vmem:[#allocation2 + $0x158] sm:$0xff] }
 0x54f   :  { %v685_v30 = vadd.f32 %v683_v14, %v629_v38  ;;  %vm882_vm2 = vcmp.lt.s32.totalorder %v2517_v20, 94  ;;  %vm1020_vm3 = vcmp.lt.s32.totalorder %v2517_v20, 3 }
 0x550   :  { %v2619_v50 = vpop.permute.xlu1 %808  ;;  %v733_v60 = vadd.f32 %v731_v9, %v684_v29  ;;  %v747_v28 = vadd.f32 %v745_v23, %v698_v53  ;;  %v3373_v25 = vld [vmem:[#allocation11_spill] sm:$0xff]  ;;  %v762_v6 = vadd.f32 %v760_v52, %v713_v26  ;;  %v776_v18 = vadd.f32 %v774_v4, %v720_v21  ;;  %v862_v9 = vld [vmem:[#allocation2 + $0x170] sm:$0xff] }
 0x551   :  { %v2630_v17 = vpop.permute.xlu0 %810  ;;  %v734_v24 = vadd.f32 %v732_v10, %v685_v30  ;;  %v785_v44 = vsel %vm784_vm4, %v3373_v25, %v2562_v59  ;;  %v786_v38 = vsel %vm784_vm4, %v2562_v59, %v3373_v25  ;;  %v863_v10 = vld [vmem:[#allocation2 + $0x178] sm:$0xff]  ;;  %v849_v21 = vld [vmem:[#allocation2 + $0x168] sm:$0xff] }
 0x552   :  { %v813_v59 = vsel %vm812_vm7, %v2619_v50, %v2630_v17  ;;  %v814_v13 = vsel %vm812_vm7, %v2630_v17, %v2619_v50  ;;  %v787_v34 = vmul.f32 %v785_v44, %v778_v62  ;;  %v788_v35 = vmul.f32 %v786_v38, %v779_v41  ;;  %v877_v52 = vld [vmem:[#allocation2 + $0x188] sm:$0xff] }
 0x553   :  { %v815_v50 = vmul.f32 %v813_v59, %v806_v31  ;;  %v816_v17 = vmul.f32 %v814_v13, %v807_v32  ;;  %vm922_vm7 = vcmp.lt.s32.totalorder %v2517_v20, 9 }
 0x554   :  { %v2659_v56 = vpop.permute.xlu1 %822  ;;  %v3374_v12 = vld [vmem:[#allocation12_spill] sm:$0xff]  ;;  %v789_v47 = vadd.f32 %v787_v34, %v733_v60  ;;  %v790_v29 = vadd.f32 %v788_v35, %v734_v24 }
 0x555   :  { %v825_v37 = vpop.permute.xlu0 %824  ;;  %v799_v51 = vsel %vm798_vm5, %v3374_v12, %v2617_v7  ;;  %v800_v49 = vsel %vm798_vm5, %v2617_v7, %v3374_v12  ;;  %v817_v3 = vadd.f32 %v815_v50, %v761_v5  ;;  %v818_v4 = vadd.f32 %v816_v17, %v762_v6 }
 0x556   :  { %v827_v7 = vsel %vm826_vm8, %v2659_v56, %v825_v37  ;;  %v828_v33 = vsel %vm826_vm8, %v825_v37, %v2659_v56  ;;  %v801_v36 = vmul.f32 %v799_v51, %v792_v1  ;;  %v802_v63 = vmul.f32 %v800_v49, %v793_v11 }
 0x557   :  { %v829_v39 = vmul.f32 %v827_v7, %v820_v15  ;;  %v830_v40 = vmul.f32 %v828_v33, %v821_v55  ;;  %vm908_vm5 = vcmp.lt.s32.totalorder %v2517_v20, 10  ;;  %vm964_vm8 = vcmp.lt.s32.totalorder %v2517_v20, 6 }
 0x558   :  { %v837_v48 = vpop.permute.xlu1 %836  ;;  %v804_v54 = vadd.f32 %v802_v63, %v748_v61 }
 0x559   :  { %v839_v57 = vpop.permute.xlu0 %838  ;;  %v831_v44 = vadd.f32 %v829_v39, %v775_v16  ;;  %v832_v38 = vadd.f32 %v830_v40, %v776_v18 }
 0x55a   :  { %v841_v23 = vsel %vm840_vm9, %v837_v48, %v839_v57  ;;  %v842_v56 = vsel %vm840_vm9, %v839_v57, %v837_v48  ;;  %v803_v48 = vadd.f32 %v801_v36, %v747_v28  ;;  %vm978_vm9 = vcmp.lt.s32.totalorder %v2517_v20, 5 }
 0x55b   :  { %v843_v57 = vmul.f32 %v841_v23, %v834_v42  ;;  %v844_v58 = vmul.f32 %v842_v56, %v835_v22  ;;  %v1024_v42 = vld [vmem:[#allocation2 + $0x190] sm:$0xff]  ;;  %v1025_v22 = vld [vmem:[#allocation2 + $0x198] sm:$0xff] }
 0x55c   :  { %v851_v2 = vpop.permute.xlu1 %850 }
 0x55d   :  { %v853_v14 = vpop.permute.xlu0 %852  ;;  %v845_v11 = vadd.f32 %v843_v57, %v789_v47  ;;  %v846_v12 = vadd.f32 %v844_v58, %v790_v29  ;;  %v897_v47 = vld [vmem:[#allocation2 + $0x688] sm:$0xff]  ;;  %v1079_v57 = vld [vmem:[#allocation2 + $0x1b8] sm:$0xff] }
 0x55e   :  { %v855_v45 = vsel %vm854_vm11, %v851_v2, %v853_v14  ;;  %v856_v46 = vsel %vm854_vm11, %v853_v14, %v851_v2 }
 0x55f   :  { %v857_v62 = vmul.f32 %v855_v45, %v848_v19  ;;  %v858_v41 = vmul.f32 %v856_v46, %v849_v21  ;;  %v1052_v19 = vld [vmem:[#allocation2 + $0x1a8] sm:$0xff] }
 0x560   :  { %v865_v0 = vpop.permute.xlu1 %864 }
 0x561   :  { %v867_v37 = vpop.permute.xlu0 %866  ;;  %v859_v51 = vadd.f32 %v857_v62, %v803_v48  ;;  %v860_v49 = vadd.f32 %v858_v41, %v804_v54  ;;  %v1078_v54 = vld [vmem:[#allocation2 + $0x1b0] sm:$0xff] }
 0x562   :  { %v869_v43 = vsel %vm868_vm12, %v865_v0, %v867_v37  ;;  %v870_v8 = vsel %vm868_vm12, %v867_v37, %v865_v0  ;;  %v1051_v37 = vld [vmem:[#allocation2 + $0x1a0] sm:$0xff]  ;;  %vm999_vm12 = vcmp.lt.s32.totalorder %v2517_v20, 4 }
 0x563   :  { %v871_v30 = vmul.f32 %v869_v43, %v862_v9  ;;  %v872_v53 = vmul.f32 %v870_v8, %v863_v10  ;;  %v896_v8 = vld [vmem:[#allocation2 + $0x680] sm:$0xff] }
 0x564   :  { %v879_v26 = vpop.permute.xlu1 %878 }
 0x565   :  { %v881_v25 = vpop.permute.xlu0 %880  ;;  %v873_v28 = vadd.f32 %v871_v30, %v817_v3  ;;  %v874_v61 = vadd.f32 %v872_v53, %v818_v4 }
 0x566   :  { %v883_v60 = vsel %vm882_vm2, %v879_v26, %v881_v25  ;;  %v884_v24 = vsel %vm882_vm2, %v881_v25, %v879_v26  ;;  %vm1226_vm2 = vcmp.lt.s32.totalorder %v2517_v20, 123 }
 0x567   :  { %v885_v1 = vmul.f32 %v883_v60, %v876_v27  ;;  %v886_v2 = vmul.f32 %v884_v24, %v877_v52  ;;  %v891_v59 = vadd.f32 %v873_v28, %v859_v51  ;;  %v892_v13 = vadd.f32 %v874_v61, %v860_v49  ;;  %v1100_v60 = vld [vmem:[#allocation2 + $0x1c8] sm:$0xff]  ;;  %v912_v24 = vld [vmem:[#allocation2 + $0x3d0] sm:$0xff]  ;;  %v913_v28 = vld [vmem:[#allocation2 + $0x3d8] sm:$0xff] }
 0x568   :  { %v927_v49 = vld [vmem:[#allocation2 + $0x3e8] sm:$0xff] }
 0x569   :  { %v887_v31 = vadd.f32 %v885_v1, %v831_v44  ;;  %v888_v32 = vadd.f32 %v886_v2, %v832_v38  ;;  %v1099_v38 = vld [vmem:[#allocation2 + $0x1c0] sm:$0xff] }
 0x56b   :  { %v889_v14 = vadd.f32 %v887_v31, %v845_v11  ;;  %v890_v5 = vadd.f32 %v888_v32, %v846_v12 }
 0x56d   :  { %v2737_v6 = vadd.f32 %v891_v59, %v889_v14  ;;  %v2739_v15 = vadd.f32 %v892_v13, %v890_v5  ;;  %v1126_v5 = vld [vmem:[#allocation2 + $0x1d0] sm:$0xff] }
 0x56f   :  { %906 = vrot.lane.b32.xlu0 %v2739_v15, %s2129_s29  ;;  %904 = vrot.lane.b32.xlu1 %v2737_v6, %s2129_s29  ;;  %v1102_v32 = vmul.f32 %v1100_v60, %v2739_v15  ;;  %v1101_v59 = vmul.f32 %v1099_v38, %v2737_v6 }
 0x573   :  { %920 = vrot.lane.b32.xlu0 %v2739_v15, %s2130_s30  ;;  %918 = vrot.lane.b32.xlu1 %v2737_v6, %s2130_s30 }
 0x577   :  { %934 = vrot.lane.b32.xlu0 %v2739_v15, %s2131_s12  ;;  %932 = vrot.lane.b32.xlu1 %v2737_v6, %s2131_s12 }
 0x57b   :  { %948 = vrot.lane.b32.xlu0 %v2739_v15, %s2132_s7  ;;  %946 = vrot.lane.b32.xlu1 %v2737_v6, %s2132_s7 }
 0x57f   :  { %962 = vrot.lane.b32.xlu0 %v2739_v15, %s2133_s13  ;;  %960 = vrot.lane.b32.xlu1 %v2737_v6, %s2133_s13 }
 0x583   :  { %976 = vrot.lane.b32.xlu0 %v2739_v15, %s2134_s4  ;;  %974 = vrot.lane.b32.xlu1 %v2737_v6, %s2134_s4 }
 0x587   :  { %997 = vrot.lane.b32.xlu0 %v2739_v15, %s2135_s9  ;;  %995 = vrot.lane.b32.xlu1 %v2737_v6, %s2135_s9 }
 0x58b   :  { %1018 = vrot.lane.b32.xlu0 %v2739_v15, %s2136_s14  ;;  %1016 = vrot.lane.b32.xlu1 %v2737_v6, %s2136_s14 }
 0x58f   :  { %1046 = vrot.lane.b32.xlu0 %v2739_v15, %s2115_s20  ;;  %1044 = vrot.lane.b32.xlu1 %v2737_v6, %s2115_s20  ;;  %s2142_s20 = smov 120  }
 0x593   :  { %1073 = vrot.lane.b32.xlu0 %v2739_v15, %s2116_s10  ;;  %1071 = vrot.lane.b32.xlu1 %v2737_v6, %s2116_s10  ;;  %s2143_s10 = smov 119  }
 0x597   :  { %1121 = vrot.lane.b32.xlu0 %v2739_v15, %s2117_s18  ;;  %1119 = vrot.lane.b32.xlu1 %v2737_v6, %s2117_s18  ;;  %s2144_s18 = smov 118  }
 0x59b   :  { %1148 = vrot.lane.b32.xlu0 %v2739_v15, %s2118_s21  ;;  %1146 = vrot.lane.b32.xlu1 %v2737_v6, %s2118_s21  ;;  %s2145_s21 = smov 48  }
 0x59f   :  { %1175 = vrot.lane.b32.xlu0 %v2739_v15, %s2137_s3  ;;  %1173 = vrot.lane.b32.xlu1 %v2737_v6, %s2137_s3 }
 0x5a3   :  { %1203 = vrot.lane.b32.xlu0 %v2739_v15, %s2138_s16  ;;  %1201 = vrot.lane.b32.xlu1 %v2737_v6, %s2138_s16 }
 0x5a7   :  { %1224 = vrot.lane.b32.xlu0 %v2739_v15, %s2139_s17  ;;  %1222 = vrot.lane.b32.xlu1 %v2737_v6, %s2139_s17 }
 0x5ab   :  { %1245 = vrot.lane.b32.xlu0 %v2739_v15, %s2140_s6  ;;  %1243 = vrot.lane.b32.xlu1 %v2737_v6, %s2140_s6 }
 0x5af   :  { %1259 = vrot.lane.b32.xlu0 %v2739_v15, %s2141_s19  ;;  %1257 = vrot.lane.b32.xlu1 %v2737_v6, %s2141_s19 }
 0x5b3   :  { %1273 = vrot.lane.b32.xlu0 %v2739_v15, %s2142_s20  ;;  %1271 = vrot.lane.b32.xlu1 %v2737_v6, %s2142_s20 }
 0x5b7   :  { %1287 = vrot.lane.b32.xlu0 %v2739_v15, %s2143_s10  ;;  %1285 = vrot.lane.b32.xlu1 %v2737_v6, %s2143_s10 }
 0x5bb   :  { %1301 = vrot.lane.b32.xlu0 %v2739_v15, %s2144_s18  ;;  %1299 = vrot.lane.b32.xlu1 %v2737_v6, %s2144_s18 }
 0x5e1   :  { %v907_v55 = vpop.permute.xlu0 %906  ;;  %v905_v7 = vpop.permute.xlu1 %904 }
 0x5e2   :  { %v909_v61 = vsel %vm908_vm5, %v905_v7, %v907_v55  ;;  %v910_v1 = vsel %vm908_vm5, %v907_v55, %v905_v7  ;;  %v1127_v55 = vld [vmem:[#allocation2 + $0x1d8] sm:$0xff]  ;;  %vm1261_vm5 = vcmp.lt.s32.totalorder %v2517_v20, 121 }
 0x5e3   :  { %v914_v13 = vmul.f32 %v912_v24, %v910_v1  ;;  %v915_v14 = vmul.f32 %v913_v28, %v909_v61  ;;  %v1181_v28 = vld [vmem:[#allocation2 + $0x1f0] sm:$0xff]  ;;  %v1182_v61 = vld [vmem:[#allocation2 + $0x1f8] sm:$0xff] }
 0x5e5   :  { %v2789_v33 = vpop.permute.xlu0 %920  ;;  %v2791_v16 = vpop.permute.xlu1 %918 }
 0x5e6   :  { %v923_v31 = vsel %vm922_vm7, %v2791_v16, %v2789_v33 }
 0x5e9   :  { %v2793_v18 = vpop.permute.xlu0 %934  ;;  %v2795_v34 = vpop.permute.xlu1 %932 }
 0x5ed   :  { %v2797_v35 = vpop.permute.xlu0 %948  ;;  %v2799_v36 = vpop.permute.xlu1 %946 }
 0x5f1   :  { %v2801_v63 = vpop.permute.xlu0 %962  ;;  %v2803_v50 = vpop.permute.xlu1 %960 }
 0x5f5   :  { %v2805_v17 = vpop.permute.xlu0 %976  ;;  %v2807_v0 = vpop.permute.xlu1 %974 }
 0x5f9   :  { %v2809_v9 = vpop.permute.xlu0 %997  ;;  %v2811_v10 = vpop.permute.xlu1 %995 }
 0x5fd   :  { %v1019_v39 = vpop.permute.xlu0 %1018  ;;  %v1017_v40 = vpop.permute.xlu1 %1016 }
 0x5fe   :  { %v2814_v23 = vsel %vm1020_vm3, %v1017_v40, %v1019_v39  ;;  %v2816_v56 = vsel %vm1020_vm3, %v1019_v39, %v1017_v40  ;;  %v902_v40 = vld [vmem:[#allocation2 + $0x6c0] sm:$0xff]  ;;  %vm1247_vm3 = vcmp.lt.s32.totalorder %v2517_v20, 122 }
 0x5ff   :  { %v1026_v21 = vmul.f32 %v1024_v42, %v2816_v56  ;;  %v1027_v45 = vmul.f32 %v1025_v22, %v2814_v23  ;;  %v903_v42 = vld [vmem:[#allocation2 + $0x6c8] sm:$0xff]  ;;  %v924_v22 = vsel %vm922_vm7, %v2789_v33, %v2791_v16  ;;  %v2879_v33 = vadd.f32 %v914_v13, %v902_v40 }
 0x600   :  { %v917_v16 = vadd.f32 %v915_v14, %v903_v42  ;;  %vm1275_vm7 = vcmp.lt.s32.totalorder %v2517_v20, 120 }
 0x601   :  { %v1047_v46 = vpop.permute.xlu0 %1046  ;;  %v1045_v43 = vpop.permute.xlu1 %1044  ;;  %v1028_v58 = vadd.f32 %v1026_v21, %v896_v8  ;;  %v1029_v26 = vadd.f32 %v1027_v45, %v897_v47  ;;  %v926_v47 = vld [vmem:[#allocation2 + $0x3e0] sm:$0xff] }
 0x602   :  { %v2822_v29 = vsel %vm693_vm13, %v1045_v43, %v1047_v46  ;;  %v2826_v30 = vsel %vm693_vm13, %v1047_v46, %v1045_v43  ;;  %vm936_vm13 = vcmp.lt.s32.totalorder %v2517_v20, 8  ;;  %v1153_v46 = vld [vmem:[#allocation2 + $0x1e0] sm:$0xff]  ;;  %v1154_v43 = vld [vmem:[#allocation2 + $0x1e8] sm:$0xff]  ;;  %v928_v38 = vmul.f32 %v926_v47, %v924_v22 }
 0x603   :  { %v1053_v53 = vmul.f32 %v1051_v37, %v2826_v30  ;;  %v1054_v48 = vmul.f32 %v1052_v19, %v2822_v29  ;;  %v929_v37 = vmul.f32 %v927_v49, %v923_v31  ;;  %v937_v24 = vsel %vm936_vm13, %v2795_v34, %v2793_v18 }
 0x605   :  { %v1074_v27 = vpop.permute.xlu0 %1073  ;;  %v1072_v52 = vpop.permute.xlu1 %1071  ;;  %v1055_v62 = vadd.f32 %v1053_v53, %v1028_v58  ;;  %v1056_v41 = vadd.f32 %v1054_v48, %v1029_v26  ;;  %v983_v58 = vld [vmem:[#allocation2 + $0x278] sm:$0xff]  ;;  %v2885_v26 = vsel %vm978_vm9, %v2807_v0, %v2805_v17  ;;  %v931_v60 = vadd.f32 %v929_v37, %v917_v16 }
 0x606   :  { %v2834_v3 = vsel %vm707_vm14, %v1072_v52, %v1074_v27  ;;  %v2838_v4 = vsel %vm707_vm14, %v1074_v27, %v1072_v52  ;;  %vm950_vm14 = vcmp.lt.s32.totalorder %v2517_v20, 7  ;;  %v982_v27 = vld [vmem:[#allocation2 + $0x270] sm:$0xff]  ;;  %v2892_v52 = vsel %vm978_vm9, %v2805_v17, %v2807_v0 }
 0x607   :  { %v1080_v25 = vmul.f32 %v1078_v54, %v2838_v4  ;;  %v1081_v44 = vmul.f32 %v1079_v57, %v2834_v3  ;;  %v938_v17 = vsel %vm936_vm13, %v2793_v18, %v2795_v34  ;;  %v1032_v34 = vld [vmem:[#allocation2 + $0x298] sm:$0xff]  ;;  %vm1289_vm13 = vcmp.lt.s32.totalorder %v2517_v20, 119 }
 0x608   :  { %v1034_v16 = vmul.f32 %v1032_v34, %v2814_v23  ;;  %vm1390_vm9 = vcmp.lt.s32.totalorder %v2517_v20, 80 }
 0x609   :  { %v1082_v2 = vadd.f32 %v1080_v25, %v1055_v62  ;;  %v1083_v11 = vadd.f32 %v1081_v44, %v1056_v41  ;;  %v1122_v12 = vpop.permute.xlu0 %1121  ;;  %v1120_v51 = vpop.permute.xlu1 %1119  ;;  %v1004_v62 = vld [vmem:[#allocation2 + $0x288] sm:$0xff]  ;;  %v2898_v41 = vsel %vm999_vm12, %v2811_v10, %v2809_v9 }
 0x60a   :  { %v2855_v7 = vsel %vm728_vm15, %v1120_v51, %v1122_v12  ;;  %v2859_v39 = vsel %vm728_vm15, %v1122_v12, %v1120_v51  ;;  %vm1177_vm15 = vcmp.lt.s32.totalorder %v2517_v20, 125  ;;  %v1003_v12 = vld [vmem:[#allocation2 + $0x280] sm:$0xff]  ;;  %v2915_v51 = vsel %vm999_vm12, %v2809_v9, %v2811_v10  ;;  %v1031_v9 = vld [vmem:[#allocation2 + $0x290] sm:$0xff] }
 0x60b   :  { %v1104_v19 = vadd.f32 %v1102_v32, %v1083_v11  ;;  %v1103_v21 = vadd.f32 %v1101_v59, %v1082_v2  ;;  %v1128_v53 = vmul.f32 %v1126_v5, %v2855_v7  ;;  %v1129_v48 = vmul.f32 %v1127_v55, %v2859_v39  ;;  %v941_v2 = vld [vmem:[#allocation2 + $0x3f8] sm:$0xff]  ;;  %v900_v32 = vld [vmem:[#allocation2 + $0x6a8] sm:$0xff]  ;;  %v940_v5 = vld [vmem:[#allocation2 + $0x3f0] sm:$0xff] }
 0x60c   :  { %v985_v11 = vmul.f32 %v983_v58, %v2885_v26  ;;  %v984_v59 = vmul.f32 %v982_v27, %v2892_v52  ;;  %v1006_v18 = vmul.f32 %v1004_v62, %v2898_v41  ;;  %v899_v55 = vld [vmem:[#allocation2 + $0x6a0] sm:$0xff]  ;;  %v943_v37 = vmul.f32 %v941_v2, %v937_v24 }
 0x60d   :  { %v1149_v45 = vpop.permute.xlu0 %1148  ;;  %v1147_v8 = vpop.permute.xlu1 %1146  ;;  %v1130_v49 = vadd.f32 %v1128_v53, %v1103_v21  ;;  %v1131_v31 = vadd.f32 %v1129_v48, %v1104_v19  ;;  %v955_v19 = vld [vmem:[#allocation2 + $0x408] sm:$0xff]  ;;  %v951_v21 = vsel %vm950_vm14, %v2799_v36, %v2797_v35  ;;  %v954_v53 = vld [vmem:[#allocation2 + $0x400] sm:$0xff]  ;;  %v1033_v24 = vmul.f32 %v1031_v9, %v2816_v56 }
 0x60e   :  { %v2873_v54 = vsel %vm742_vm1, %v1147_v8, %v1149_v45  ;;  %v2877_v57 = vsel %vm742_vm1, %v1149_v45, %v1147_v8  ;;  %v952_v45 = vsel %vm950_vm14, %v2797_v35, %v2799_v36  ;;  %v987_v48 = vadd.f32 %v985_v11, %v900_v32  ;;  %v1058_v58 = vld [vmem:[#allocation2 + $0x2a0] sm:$0xff]  ;;  %v1085_v11 = vld [vmem:[#allocation2 + $0x2b0] sm:$0xff] }
 0x60f   :  { %v1155_v25 = vmul.f32 %v1153_v46, %v2873_v54  ;;  %v1156_v44 = vmul.f32 %v1154_v43, %v2877_v57  ;;  %v1005_v46 = vmul.f32 %v1003_v12, %v2915_v51  ;;  %v1059_v43 = vld [vmem:[#allocation2 + $0x2a8] sm:$0xff]  ;;  %v965_v35 = vsel %vm964_vm8, %v2803_v50, %v2801_v63 }
 0x610   :  { %v986_v36 = vadd.f32 %v984_v59, %v899_v55  ;;  %v1008_v2 = vadd.f32 %v1006_v18, %v987_v48  ;;  %v930_v12 = vadd.f32 %v928_v38, %v2879_v33  ;;  %v1060_v59 = vmul.f32 %v1058_v58, %v2826_v30  ;;  %v1011_v38 = vld [vmem:[#allocation2 + $0x438] sm:$0xff]  ;;  %v1038_v58 = vld [vmem:[#allocation2 + $0x440] sm:$0xff] }
 0x611   :  { %v1176_v0 = vpop.permute.xlu0 %1175  ;;  %v1174_v1 = vpop.permute.xlu1 %1173  ;;  %v1157_v10 = vadd.f32 %v1155_v25, %v1130_v49  ;;  %v1158_v40 = vadd.f32 %v1156_v44, %v1131_v31  ;;  %v942_v25 = vmul.f32 %v940_v5, %v938_v17  ;;  %v969_v44 = vld [vmem:[#allocation2 + $0x418] sm:$0xff]  ;;  %v1061_v17 = vmul.f32 %v1059_v43, %v2822_v29  ;;  %v990_v31 = vld [vmem:[#allocation2 + $0x428] sm:$0xff] }
 0x612   :  { %v2921_v13 = vsel %vm1177_vm15, %v1174_v1, %v1176_v0  ;;  %v2925_v14 = vsel %vm1177_vm15, %v1176_v0, %v1174_v1  ;;  %v1086_v0 = vld [vmem:[#allocation2 + $0x2b8] sm:$0xff]  ;;  %v966_v1 = vsel %vm964_vm8, %v2801_v63, %v2803_v50  ;;  %v956_v49 = vmul.f32 %v954_v53, %v952_v45  ;;  %v989_v50 = vld [vmem:[#allocation2 + $0x420] sm:$0xff]  ;;  %v1107_v53 = vld [vmem:[#allocation2 + $0x2c8] sm:$0xff] }
 0x613   :  { %v1183_v42 = vmul.f32 %v1181_v28, %v2921_v13  ;;  %v1184_v22 = vmul.f32 %v1182_v61, %v2925_v14  ;;  %v957_v28 = vmul.f32 %v955_v19, %v951_v21  ;;  %v968_v61 = vld [vmem:[#allocation2 + $0x410] sm:$0xff]  ;;  %v1007_v32 = vadd.f32 %v1005_v46, %v986_v36  ;;  %v1039_v46 = vld [vmem:[#allocation2 + $0x448] sm:$0xff]  ;;  %v1066_v36 = vld [vmem:[#allocation2 + $0x458] sm:$0xff] }
 0x614   :  { %v945_v34 = vadd.f32 %v943_v37, %v931_v60  ;;  %v971_v63 = vmul.f32 %v969_v44, %v965_v35  ;;  %v1036_v18 = vadd.f32 %v1034_v16, %v1008_v2  ;;  %v1088_v5 = vmul.f32 %v1086_v0, %v2834_v3  ;;  %v1010_v21 = vld [vmem:[#allocation2 + $0x430] sm:$0xff]  ;;  %v1134_v0 = vld [vmem:[#allocation2 + $0x2d8] sm:$0xff] }
 0x615   :  { %v2938_v8 = vpop.permute.xlu0 %1203  ;;  %v2940_v47 = vpop.permute.xlu1 %1201  ;;  %v2943_v27 = vadd.f32 %v1183_v42, %v1157_v10  ;;  %v2945_v62 = vadd.f32 %v1184_v22, %v1158_v40  ;;  %v944_v10 = vadd.f32 %v942_v25, %v930_v12  ;;  %v970_v33 = vmul.f32 %v968_v61, %v966_v1  ;;  %v1065_v61 = vld [vmem:[#allocation2 + $0x450] sm:$0xff]  ;;  %v1093_v12 = vld [vmem:[#allocation2 + $0x468] sm:$0xff] }
 0x616   :  { %v1035_v40 = vadd.f32 %v1033_v24, %v1007_v32  ;;  %v1087_v42 = vmul.f32 %v1085_v11, %v2838_v4  ;;  %v959_v22 = vadd.f32 %v957_v28, %v945_v34  ;;  %v992_v19 = vmul.f32 %v990_v31, %v2885_v26  ;;  %v1106_v26 = vld [vmem:[#allocation2 + $0x2c0] sm:$0xff]  ;;  %v1133_v2 = vld [vmem:[#allocation2 + $0x2d0] sm:$0xff]  ;;  %v1161_v31 = vld [vmem:[#allocation2 + $0x2e8] sm:$0xff] }
 0x617   :  { %1321 = vrot.lane.b32.xlu0 %v2945_v62, %s2145_s21  ;;  %1319 = vrot.lane.b32.xlu1 %v2943_v27, %s2145_s21  ;;  %v1063_v60 = vadd.f32 %v1061_v17, %v1036_v18  ;;  %v958_v37 = vadd.f32 %v956_v49, %v944_v10  ;;  %v991_v45 = vmul.f32 %v989_v50, %v2892_v52  ;;  %vm1205_vm1 = vcmp.lt.s32.totalorder %v2517_v20, 124  ;;  %v1160_v50 = vld [vmem:[#allocation2 + $0x2e0] sm:$0xff] }
 0x618   :  { %v1062_v43 = vadd.f32 %v1060_v59, %v1035_v40  ;;  %v973_v48 = vadd.f32 %v971_v63, %v959_v22  ;;  %v1013_v16 = vmul.f32 %v1011_v38, %v2898_v41  ;;  %v1012_v35 = vmul.f32 %v1010_v21, %v2915_v51  ;;  %v1092_v59 = vld [vmem:[#allocation2 + $0x460] sm:$0xff]  ;;  %v1188_v22 = vld [vmem:[#allocation2 + $0x2f0] sm:$0xff]  ;;  %v1210_v21 = vld [vmem:[#allocation2 + $0x308] sm:$0xff] }
 0x619   :  { %v2964_v55 = vpop.permute.xlu0 %1224  ;;  %v2966_v9 = vpop.permute.xlu1 %1222  ;;  %v1090_v25 = vadd.f32 %v1088_v5, %v1063_v60  ;;  %v972_v44 = vadd.f32 %v970_v33, %v958_v37  ;;  %v1041_v52 = vmul.f32 %v1039_v46, %v2814_v23  ;;  %v1109_v1 = vmul.f32 %v1107_v53, %v2739_v15  ;;  %v1189_v33 = vld [vmem:[#allocation2 + $0x2f8] sm:$0xff]  ;;  %v1209_v46 = vld [vmem:[#allocation2 + $0x300] sm:$0xff] }
 0x61a   :  { %v1089_v24 = vadd.f32 %v1087_v42, %v1062_v43  ;;  %v994_v28 = vadd.f32 %v992_v19, %v973_v48  ;;  %v1040_v51 = vmul.f32 %v1038_v58, %v2816_v56  ;;  %v1108_v49 = vmul.f32 %v1106_v26, %v2737_v6  ;;  %v1231_v26 = vld [vmem:[#allocation2 + $0x318] sm:$0xff] }
 0x61b   :  { %1335 = vrot.lane.b32.xlu0 %v2945_v62, %s2109_s15  ;;  %1333 = vrot.lane.b32.xlu1 %v2943_v27, %s2109_s15  ;;  %v993_v41 = vadd.f32 %v991_v45, %v972_v44  ;;  %v1068_v32 = vmul.f32 %v1066_v36, %v2822_v29  ;;  %v1111_v34 = vadd.f32 %v1109_v1, %v1090_v25  ;;  %v1113_v36 = vld [vmem:[#allocation2 + $0x470] sm:$0xff]  ;;  %vm1303_vm14 = vcmp.lt.s32.totalorder %v2517_v20, 118 }
 0x61c   :  { %v1015_v23 = vadd.f32 %v1013_v16, %v994_v28  ;;  %v1136_v63 = vmul.f32 %v1134_v0, %v2859_v39  ;;  %v1067_v56 = vmul.f32 %v1065_v61, %v2826_v30  ;;  %v1110_v5 = vadd.f32 %v1108_v49, %v1089_v24  ;;  %v1114_v16 = vld [vmem:[#allocation2 + $0x478] sm:$0xff] }
 0x61d   :  { %v2979_v17 = vpop.permute.xlu0 %1245  ;;  %v2981_v11 = vpop.permute.xlu1 %1243  ;;  %v1014_v18 = vadd.f32 %v1012_v35, %v993_v41  ;;  %v1135_v10 = vmul.f32 %v1133_v2, %v2855_v7  ;;  %v1095_v40 = vmul.f32 %v1093_v12, %v2834_v3  ;;  %v1163_v42 = vmul.f32 %v1161_v31, %v2877_v57  ;;  %v1140_v41 = vld [vmem:[#allocation2 + $0x480] sm:$0xff]  ;;  %v1168_v31 = vld [vmem:[#allocation2 + $0x498] sm:$0xff] }
 0x61e   :  { %v1043_v38 = vadd.f32 %v1041_v52, %v1015_v23  ;;  %v1094_v19 = vmul.f32 %v1092_v59, %v2838_v4  ;;  %v1162_v30 = vmul.f32 %v1160_v50, %v2873_v54  ;;  %v3005_v60 = vsel %vm1205_vm1, %v2938_v8, %v2940_v47  ;;  %v1141_v52 = vld [vmem:[#allocation2 + $0x488] sm:$0xff]  ;;  %v1167_v59 = vld [vmem:[#allocation2 + $0x490] sm:$0xff] }
 0x61f   :  { %1362 = vrot.lane.b32.xlu0 %v2945_v62, %s2121_s23  ;;  %1360 = vrot.lane.b32.xlu1 %v2943_v27, %s2121_s23  ;;  %v1042_v29 = vadd.f32 %v1040_v51, %v1014_v18  ;;  %v1138_v37 = vadd.f32 %v1136_v63, %v1111_v34  ;;  %v1191_v45 = vmul.f32 %v1189_v33, %v2925_v14  ;;  %vm1323_vm8 = vcmp.lt.s32.totalorder %v2517_v20, 48 }
 0x620   :  { %v1070_v3 = vadd.f32 %v1068_v32, %v1043_v38  ;;  %v3014_v4 = vsel %vm1205_vm1, %v2940_v47, %v2938_v8  ;;  %v1137_v58 = vadd.f32 %v1135_v10, %v1110_v5  ;;  %v1190_v25 = vmul.f32 %v1188_v22, %v2921_v13  ;;  %v1230_v47 = vld [vmem:[#allocation2 + $0x310] sm:$0xff]  ;;  %v1196_v5 = vld [vmem:[#allocation2 + $0x4a8] sm:$0xff]  ;;  %v1195_v38 = vld [vmem:[#allocation2 + $0x4a0] sm:$0xff] }
 0x621   :  { %v3016_v43 = vpop.permute.xlu0 %1259  ;;  %v3018_v53 = vpop.permute.xlu1 %1257  ;;  %v1069_v48 = vadd.f32 %v1067_v56, %v1042_v29  ;;  %v1228_v44 = vsel %vm1226_vm2, %v2964_v55, %v2966_v9  ;;  %v1165_v24 = vadd.f32 %v1163_v42, %v1138_v37  ;;  %v1212_v8 = vmul.f32 %v1210_v21, %v3005_v60  ;;  %v1217_v42 = vld [vmem:[#allocation2 + $0x4b8] sm:$0xff]  ;;  %v1238_v21 = vld [vmem:[#allocation2 + $0x4c8] sm:$0xff]  ;;  %v1237_v37 = vld [vmem:[#allocation2 + $0x4c0] sm:$0xff] }
 0x622   :  { %v1097_v35 = vadd.f32 %v1095_v40, %v1070_v3  ;;  %v1227_v0 = vsel %vm1226_vm2, %v2966_v9, %v2964_v55  ;;  %v1164_v61 = vadd.f32 %v1162_v30, %v1137_v58  ;;  %v1211_v1 = vmul.f32 %v1209_v46, %v3014_v4  ;;  %v1216_v30 = vld [vmem:[#allocation2 + $0x4b0] sm:$0xff] }
 0x623   :  { %1375 = vrot.lane.b32.xlu0 %v2945_v62, %s2126_s26  ;;  %1373 = vrot.lane.b32.xlu1 %v2943_v27, %s2126_s26  ;;  %v1096_v28 = vadd.f32 %v1094_v19, %v1069_v48  ;;  %v1116_v2 = vmul.f32 %v1114_v16, %v2739_v15  ;;  %v1193_v51 = vadd.f32 %v1191_v45, %v1165_v24  ;;  %v1252_v16 = vld [vmem:[#allocation2 + $0x4d8] sm:$0xff]  ;;  %vm1426_vm12 = vcmp.lt.s32.totalorder %v2517_v20, 64 }
 0x624   :  { %v1233_v12 = vmul.f32 %v1231_v26, %v1228_v44  ;;  %v1115_v49 = vmul.f32 %v1113_v36, %v2737_v6  ;;  %v1192_v55 = vadd.f32 %v1190_v25, %v1164_v61  ;;  %v1232_v9 = vmul.f32 %v1230_v47, %v1227_v0  ;;  %v1251_v26 = vld [vmem:[#allocation2 + $0x4d0] sm:$0xff]  ;;  %v1266_v36 = vld [vmem:[#allocation2 + $0x4e8] sm:$0xff] }
 0x625   :  { %v1118_v23 = vadd.f32 %v1116_v2, %v1097_v35  ;;  %v1143_v32 = vmul.f32 %v1141_v52, %v2859_v39  ;;  %v1214_v34 = vadd.f32 %v1212_v8, %v1193_v51  ;;  %v1274_v63 = vpop.permute.xlu0 %1273  ;;  %v1272_v50 = vpop.permute.xlu1 %1271  ;;  %v1142_v56 = vmul.f32 %v1140_v41, %v2855_v7  ;;  %v1279_v2 = vld [vmem:[#allocation2 + $0x4f0] sm:$0xff] }
 0x626   :  { %v1117_v18 = vadd.f32 %v1115_v49, %v1096_v28  ;;  %v1213_v10 = vadd.f32 %v1211_v1, %v1192_v55  ;;  %v1170_v33 = vmul.f32 %v1168_v31, %v2877_v57  ;;  %v1169_v40 = vmul.f32 %v1167_v59, %v2873_v54  ;;  %v1280_v28 = vld [vmem:[#allocation2 + $0x4f8] sm:$0xff]  ;;  %v1294_v49 = vld [vmem:[#allocation2 + $0x508] sm:$0xff] }
 0x627   :  { %1346 = vrot.lane.b32.xlu0 %v2945_v62, %s2103_s28  ;;  %1344 = vrot.lane.b32.xlu1 %v2943_v27, %s2103_s28  ;;  %v3044_v39 = vadd.f32 %v1233_v12, %v1214_v34  ;;  %v1145_v29 = vadd.f32 %v1143_v32, %v1118_v23  ;;  %v1198_v19 = vmul.f32 %v1196_v5, %v2925_v14  ;;  %v1293_v23 = vld [vmem:[#allocation2 + $0x500] sm:$0xff]  ;;  %v1307_v5 = vld [vmem:[#allocation2 + $0x510] sm:$0xff] }
 0x628   :  { %v3047_v22 = vadd.f32 %v1232_v9, %v1213_v10  ;;  %v1144_v7 = vadd.f32 %v1142_v56, %v1117_v18  ;;  %v1197_v57 = vmul.f32 %v1195_v38, %v2921_v13  ;;  %v1219_v3 = vmul.f32 %v1217_v42, %v3005_v60 }
 0x629   :  { %v1172_v54 = vadd.f32 %v1170_v33, %v1145_v29  ;;  %v1288_v14 = vpop.permute.xlu0 %1287  ;;  %v1286_v45 = vpop.permute.xlu1 %1285  ;;  %v1218_v48 = vmul.f32 %v1216_v30, %v3014_v4  ;;  %v1249_v13 = vsel %vm1247_vm3, %v2979_v17, %v2981_v11  ;;  %v1240_v25 = vmul.f32 %v1238_v21, %v1228_v44 }
 0x62a   :  { %v1171_v46 = vadd.f32 %v1169_v40, %v1144_v7  ;;  %v1248_v60 = vsel %vm1247_vm3, %v2981_v11, %v2979_v17  ;;  %v1239_v35 = vmul.f32 %v1237_v37, %v1227_v0  ;;  %v1263_v44 = vsel %vm1261_vm5, %v3016_v43, %v3018_v53  ;;  %v1265_v17 = vld [vmem:[#allocation2 + $0x4e0] sm:$0xff] }
 0x62b   :  { %1388 = vrot.lane.b32.xlu0 %v2945_v62, %s2146_s22  ;;  %1386 = vrot.lane.b32.xlu1 %v2943_v27, %s2146_s22  ;;  %v1200_v58 = vadd.f32 %v1198_v19, %v1172_v54  ;;  %v1254_v8 = vmul.f32 %v1252_v16, %v1249_v13  ;;  %v1262_v11 = vsel %vm1261_vm5, %v3018_v53, %v3016_v43 }
 0x62c   :  { %v1199_v4 = vadd.f32 %v1197_v57, %v1171_v46  ;;  %v1253_v0 = vmul.f32 %v1251_v26, %v1248_v60  ;;  %v1277_v52 = vsel %vm1275_vm7, %v1274_v63, %v1272_v50  ;;  %v1268_v1 = vmul.f32 %v1266_v36, %v1263_v44  ;;  %v1318_v46 = vld [vmem:[#allocation2 + $0x208] sm:$0xff]  ;;  %v1358_v36 = vld [vmem:[#allocation2 + $0x240] sm:$0xff] }
 0x62d   :  { %v1221_v24 = vadd.f32 %v1219_v3, %v1200_v58  ;;  %v1276_v41 = vsel %vm1275_vm7, %v1272_v50, %v1274_v63  ;;  %v1302_v51 = vpop.permute.xlu0 %1301  ;;  %v1300_v12 = vpop.permute.xlu1 %1299  ;;  %v1267_v53 = vmul.f32 %v1265_v17, %v1262_v11  ;;  %v1291_v31 = vsel %vm1289_vm13, %v1288_v14, %v1286_v45  ;;  %v1308_v63 = vld [vmem:[#allocation2 + $0x518] sm:$0xff]  ;;  %v1359_v44 = vld [vmem:[#allocation2 + $0x248] sm:$0xff] }
 0x62e   :  { %v1220_v47 = vadd.f32 %v1218_v48, %v1199_v4  ;;  %v1282_v9 = vmul.f32 %v1280_v28, %v1277_v52  ;;  %v1290_v32 = vsel %vm1289_vm13, %v1286_v45, %v1288_v14  ;;  %v1281_v34 = vmul.f32 %v1279_v2, %v1276_v41  ;;  %v1317_v45 = vld [vmem:[#allocation2 + $0x200] sm:$0xff]  ;;  %v1315_v4 = vld [vmem:[#allocation2 + $0x698] sm:$0xff]  ;;  %v1371_v2 = vld [vmem:[#allocation2 + $0x250] sm:$0xff] }
 0x62f   :  { %1411 = vrot.lane.b32.xlu0 %v3044_v39, %s2146_s22  ;;  %1409 = vrot.lane.b32.xlu1 %v3047_v22, %s2146_s22  ;;  %v1242_v61 = vadd.f32 %v1240_v25, %v1221_v24  ;;  %v1305_v50 = vsel %vm1303_vm14, %v1302_v51, %v1300_v12  ;;  %v1296_v56 = vmul.f32 %v1294_v49, %v1291_v31  ;;  %v1314_v25 = vld [vmem:[#allocation2 + $0x690] sm:$0xff]  ;;  %v1372_v41 = vld [vmem:[#allocation2 + $0x258] sm:$0xff] }
 0x630   :  { %v1241_v43 = vadd.f32 %v1239_v35, %v1220_v47  ;;  %v1304_v10 = vsel %vm1303_vm14, %v1300_v12, %v1302_v51  ;;  %v1295_v38 = vmul.f32 %v1293_v23, %v1290_v32  ;;  %v1310_v42 = vmul.f32 %v1308_v63, %v1305_v50 }
 0x631   :  { %v1256_v55 = vadd.f32 %v1254_v8, %v1242_v61  ;;  %v1309_v19 = vmul.f32 %v1307_v5, %v1304_v10  ;;  %v1332_v61 = vld [vmem:[#allocation2 + $0x218] sm:$0xff]  ;;  %v1343_v5 = vld [vmem:[#allocation2 + $0x228] sm:$0xff] }
 0x632   :  { %v1255_v59 = vadd.f32 %v1253_v0, %v1241_v43  ;;  %v1331_v0 = vld [vmem:[#allocation2 + $0x210] sm:$0xff] }
 0x633   :  { %1424 = vrot.lane.b32.xlu0 %v3044_v39, %s2147_s5  ;;  %1422 = vrot.lane.b32.xlu1 %v3047_v22, %s2147_s5  ;;  %v1270_v18 = vadd.f32 %v1268_v1, %v1256_v55 }
 0x634   :  { %v1269_v33 = vadd.f32 %v1267_v53, %v1255_v59 }
 0x635   :  { %v1284_v40 = vadd.f32 %v1282_v9, %v1270_v18 }
 0x636   :  { %v1283_v29 = vadd.f32 %v1281_v34, %v1269_v33 }
 0x637   :  { %1458 = vrot.lane.b32.xlu0 %v3044_v39, %s2103_s28  ;;  %1456 = vrot.lane.b32.xlu1 %v3047_v22, %s2103_s28  ;;  %v1298_v30 = vadd.f32 %v1296_v56, %v1284_v40  ;;  %v1342_v56 = vld [vmem:[#allocation2 + $0x220] sm:$0xff] }
 0x638   :  { %v1297_v7 = vadd.f32 %v1295_v38, %v1283_v29  ;;  %v1384_v40 = vld [vmem:[#allocation2 + $0x260] sm:$0xff] }
 0x639   :  { %v3106_v57 = vadd.f32 %v1310_v42, %v1298_v30  ;;  %v1385_v42 = vld [vmem:[#allocation2 + $0x268] sm:$0xff] }
 0x63a   :  { %v3108_v21 = vadd.f32 %v1309_v19, %v1297_v7 }
 0x63b   :  { %1436 = vrot.lane.b32.xlu0 %v3044_v39, %s2145_s21  ;;  %1434 = vrot.lane.b32.xlu1 %v3047_v22, %s2145_s21 }
 0x63f   :  { %1478 = vrot.lane.b32.xlu0 %v3044_v39, %s2121_s23  ;;  %1476 = vrot.lane.b32.xlu1 %v3047_v22, %s2121_s23 }
 0x643   :  { %1534 = vrot.lane.b32.xlu0 %v3106_v57, %s2109_s15  ;;  %1532 = vrot.lane.b32.xlu1 %v3108_v21, %s2109_s15 }
 0x647   :  { %1574 = vrot.lane.b32.xlu0 %v3106_v57, %s2126_s26  ;;  %1572 = vrot.lane.b32.xlu1 %v3108_v21, %s2126_s26 }
 0x64b   :  { %1547 = vrot.lane.b32.xlu0 %v3106_v57, %s2103_s28  ;;  %1545 = vrot.lane.b32.xlu1 %v3108_v21, %s2103_s28 }
 0x64f   :  { %1587 = vrot.lane.b32.xlu0 %v3106_v57, %s2146_s22  ;;  %1585 = vrot.lane.b32.xlu1 %v3108_v21, %s2146_s22 }
 0x653   :  { %1600 = vrot.lane.b32.xlu0 %v3106_v57, %s2147_s5  ;;  %1598 = vrot.lane.b32.xlu1 %v3108_v21, %s2147_s5 }
 0x657   :  { %1563 = vrot.lane.b32.xlu0 %v3106_v57, %s2121_s23  ;;  %1561 = vrot.lane.b32.xlu1 %v3108_v21, %s2121_s23  ;;  %s2148_s23 = smov [#allocation5]  }
 0x65b   :  { %1613 = vrot.lane.b32.xlu0 %v3106_v57, %s2145_s21  ;;  %1611 = vrot.lane.b32.xlu1 %v3108_v21, %s2145_s21 }
 0x65f   :  { %1447 = vrot.lane.b32.xlu0 %v3044_v39, %s2109_s15  ;;  %1445 = vrot.lane.b32.xlu1 %v3047_v22, %s2109_s15 }
 0x663   :  { %1491 = vrot.lane.b32.xlu0 %v3044_v39, %s2126_s26  ;;  %1489 = vrot.lane.b32.xlu1 %v3047_v22, %s2126_s26 }
 0x689   :  { %v1322_v54 = vpop.permute.xlu0 %1321  ;;  %v1320_v3 = vpop.permute.xlu1 %1319 }
 0x68a   :  { %v1324_v37 = vsel %vm1323_vm8, %v1320_v3, %v1322_v54  ;;  %v1325_v14 = vsel %vm1323_vm8, %v1322_v54, %v1320_v3 }
 0x68b   :  { %v1326_v26 = vmul.f32 %v1325_v14, %v1317_v45  ;;  %v1327_v60 = vmul.f32 %v1324_v37, %v1318_v46  ;;  %v1353_v14 = vld [vmem:[#allocation2 + $0x230] sm:$0xff]  ;;  %v1354_v46 = vld [vmem:[#allocation2 + $0x238] sm:$0xff] }
 0x68d   :  { %v1336_v48 = vpop.permute.xlu0 %1335  ;;  %v1334_v16 = vpop.permute.xlu1 %1333  ;;  %v1328_v11 = vadd.f32 %v1326_v26, %v1314_v25  ;;  %v1329_v47 = vadd.f32 %v1327_v60, %v1315_v4  ;;  %v1356_v60 = vmul.f32 %v1354_v46, %v2945_v62 }
 0x68e   :  { %v1337_v13 = vsel %vm585_vm6, %v1334_v16, %v1336_v48  ;;  %v1338_v58 = vsel %vm585_vm6, %v1336_v48, %v1334_v16 }
 0x68f   :  { %v1339_v31 = vmul.f32 %v1338_v58, %v1331_v0  ;;  %v1340_v55 = vmul.f32 %v1337_v13, %v1332_v61  ;;  %v1355_v58 = vmul.f32 %v1353_v14, %v2943_v27  ;;  %v1408_v27 = vld [vmem:[#allocation2 + $0x328] sm:$0xff]  ;;  %v1467_v61 = vld [vmem:[#allocation2 + $0x370] sm:$0xff]  ;;  %v1530_v14 = vld [vmem:[#allocation2 + $0x520] sm:$0xff] }
 0x691   :  { %v1363_v35 = vpop.permute.xlu0 %1362  ;;  %v1361_v24 = vpop.permute.xlu1 %1360 }
 0x692   :  { %v1364_v8 = vsel %vm784_vm4, %v1361_v24, %v1363_v35  ;;  %v1365_v17 = vsel %vm784_vm4, %v1363_v35, %v1361_v24 }
 0x693   :  { %v1366_v28 = vmul.f32 %v1364_v8, %v1358_v36  ;;  %v1367_v52 = vmul.f32 %v1365_v17, %v1359_v44 }
 0x695   :  { %v1376_v1 = vpop.permute.xlu0 %1375  ;;  %v1368_v51 = vadd.f32 %v1366_v28, %v1328_v11  ;;  %v1369_v12 = vadd.f32 %v1367_v52, %v1329_v47  ;;  %v1374_v43 = vpop.permute.xlu1 %1373  ;;  %v1407_v47 = vld [vmem:[#allocation2 + $0x320] sm:$0xff]  ;;  %v1420_v52 = vld [vmem:[#allocation2 + $0x330] sm:$0xff] }
 0x696   :  { %v1377_v53 = vsel %vm854_vm11, %v1374_v43, %v1376_v1  ;;  %v1378_v49 = vsel %vm854_vm11, %v1376_v1, %v1374_v43  ;;  %v1455_v43 = vld [vmem:[#allocation2 + $0x368] sm:$0xff] }
 0x697   :  { %v1379_v9 = vmul.f32 %v1377_v53, %v1371_v2  ;;  %v1380_v23 = vmul.f32 %v1378_v49, %v1372_v41  ;;  %v1421_v2 = vld [vmem:[#allocation2 + $0x338] sm:$0xff] }
 0x699   :  { %v1347_v32 = vpop.permute.xlu0 %1346  ;;  %v1381_v59 = vadd.f32 %v1379_v9, %v1339_v31  ;;  %v1382_v34 = vadd.f32 %v1380_v23, %v1340_v55  ;;  %v1345_v63 = vpop.permute.xlu1 %1344  ;;  %v1468_v9 = vld [vmem:[#allocation2 + $0x378] sm:$0xff]  ;;  %v1554_v23 = vld [vmem:[#allocation2 + $0x540] sm:$0xff] }
 0x69a   :  { %v1348_v10 = vsel %vm651_vm10, %v1345_v63, %v1347_v32  ;;  %v1349_v33 = vsel %vm651_vm10, %v1347_v32, %v1345_v63  ;;  %v1555_v32 = vld [vmem:[#allocation2 + $0x548] sm:$0xff] }
 0x69b   :  { %v1397_v50 = vadd.f32 %v1381_v59, %v1368_v51  ;;  %v1398_v18 = vadd.f32 %v1382_v34, %v1369_v12  ;;  %v1350_v7 = vmul.f32 %v1349_v33, %v1342_v56  ;;  %v1351_v54 = vmul.f32 %v1348_v10, %v1343_v5  ;;  %v1454_v12 = vld [vmem:[#allocation2 + $0x360] sm:$0xff]  ;;  %v1404_v59 = vld [vmem:[#allocation2 + $0x6b0] sm:$0xff]  ;;  %v1405_v34 = vld [vmem:[#allocation2 + $0x6b8] sm:$0xff] }
 0x69d   :  { %v1389_v38 = vpop.permute.xlu0 %1388  ;;  %v1387_v29 = vpop.permute.xlu1 %1386 }
 0x69e   :  { %v1391_v19 = vsel %vm1390_vm9, %v1387_v29, %v1389_v38  ;;  %v1392_v30 = vsel %vm1390_vm9, %v1389_v38, %v1387_v29  ;;  %v1637_v38 = vld [vmem:[#allocation2 + $0x5c8] sm:$0xff]  ;;  %v1469_v29 = vmul.f32 %v1467_v61, %v3047_v22 }
 0x69f   :  { %v1393_v3 = vmul.f32 %v1391_v19, %v1384_v40  ;;  %v1394_v37 = vmul.f32 %v1392_v30, %v1385_v42  ;;  %v1692_v40 = vld [vmem:[#allocation2 + $0x640] sm:$0xff]  ;;  %v1693_v42 = vld [vmem:[#allocation2 + $0x648] sm:$0xff]  ;;  %v1470_v19 = vmul.f32 %v1468_v9, %v3044_v39  ;;  %v3202_v30 = vmul.f32 %v1554_v23, %v3106_v57  ;;  %v1528_v9 = vld [vmem:[#allocation2 + $0x6d8] sm:$0xff] }
 0x6a0   :  { %v1501_v39 = vld [vmem:[#allocation2 + $0x3a8] sm:$0xff] }
 0x6a1   :  { %v1412_v45 = vpop.permute.xlu0 %1411  ;;  %v1395_v48 = vadd.f32 %v1393_v3, %v1350_v7  ;;  %v1396_v16 = vadd.f32 %v1394_v37, %v1351_v54  ;;  %v1410_v13 = vpop.permute.xlu1 %1409  ;;  %v3205_v7 = vmul.f32 %v1555_v32, %v3108_v21  ;;  %v1500_v54 = vld [vmem:[#allocation2 + $0x3a0] sm:$0xff]  ;;  %v1433_v23 = vld [vmem:[#allocation2 + $0x348] sm:$0xff] }
 0x6a2   :  { %v1413_v0 = vsel %vm1390_vm9, %v1410_v13, %v1412_v45  ;;  %v1414_v62 = vsel %vm1390_vm9, %v1412_v45, %v1410_v13  ;;  %v1531_v45 = vld [vmem:[#allocation2 + $0x528] sm:$0xff]  ;;  %v1514_v32 = vld [vmem:[#allocation2 + $0x3c0] sm:$0xff] }
 0x6a3   :  { %v1399_v25 = vadd.f32 %v1397_v50, %v1395_v48  ;;  %v1400_v26 = vadd.f32 %v1398_v18, %v1396_v16  ;;  %v1415_v31 = vmul.f32 %v1414_v62, %v1407_v47  ;;  %v1416_v55 = vmul.f32 %v1413_v0, %v1408_v27  ;;  %v1636_v50 = vld [vmem:[#allocation2 + $0x5c0] sm:$0xff]  ;;  %v1507_v48 = vld [vmem:[#allocation2 + $0x3b0] sm:$0xff]  ;;  %v1508_v16 = vld [vmem:[#allocation2 + $0x3b8] sm:$0xff] }
 0x6a4   :  { %v1570_v47 = vld [vmem:[#allocation2 + $0x560] sm:$0xff]  ;;  %v1571_v27 = vld [vmem:[#allocation2 + $0x568] sm:$0xff] }
 0x6a5   :  { %v1425_v4 = vpop.permute.xlu0 %1424  ;;  %v3174_v35 = vadd.f32 %v1399_v25, %v1355_v58  ;;  %v1423_v36 = vpop.permute.xlu1 %1422  ;;  %v3176_v44 = vadd.f32 %v1400_v26, %v1356_v60  ;;  %v1417_v3 = vadd.f32 %v1415_v31, %v1404_v59  ;;  %v1418_v37 = vadd.f32 %v1416_v55, %v1405_v34  ;;  %v1432_v31 = vld [vmem:[#allocation2 + $0x340] sm:$0xff]  ;;  %v1527_v55 = vld [vmem:[#allocation2 + $0x6d0] sm:$0xff]  ;;  %v1515_v59 = vld [vmem:[#allocation2 + $0x3c8] sm:$0xff] }
 0x6a6   :  { %v1427_v41 = vsel %vm1426_vm12, %v1423_v36, %v1425_v4  ;;  %v1428_v51 = vsel %vm1426_vm12, %v1425_v4, %v1423_v36  ;;  %v3216_v58 = vmul.f32 %v1636_v50, %v3108_v21  ;;  %v3219_v25 = vmul.f32 %v1637_v38, %v3106_v57 }
 0x6a7   :  { %v1429_v18 = vmul.f32 %v1428_v51, %v1420_v52  ;;  %v1430_v56 = vmul.f32 %v1427_v41, %v1421_v2  ;;  %v3222_v26 = vmul.f32 %v1692_v40, %v3106_v57  ;;  %v3225_v60 = vmul.f32 %v1693_v42, %v3108_v21 }
 0x6a8   :  { %v1502_v21 = vmul.f32 %v1500_v54, %v1413_v0 }
 0x6a9   :  { %v1459_v24 = vpop.permute.xlu0 %1458  ;;  %v1457_v8 = vpop.permute.xlu1 %1456  ;;  %v1471_v4 = vadd.f32 %v1469_v29, %v1429_v18  ;;  %v1472_v36 = vadd.f32 %v1470_v19, %v1430_v56 }
 0x6aa   :  { %v1460_v53 = vsel %vm651_vm10, %v1457_v8, %v1459_v24  ;;  %v1461_v49 = vsel %vm651_vm10, %v1459_v24, %v1457_v8 }
 0x6ab   :  { %v1462_v5 = vmul.f32 %v1461_v49, %v1454_v12  ;;  %v1463_v10 = vmul.f32 %v1460_v53, %v1455_v43  ;;  %v1503_v43 = vmul.f32 %v1501_v39, %v1414_v62  ;;  %v1509_v53 = vmul.f32 %v1507_v48, %v1427_v41  ;;  %v1544_v48 = vld [vmem:[#allocation2 + $0x538] sm:$0xff] }
 0x6ac   :  { %v1510_v49 = vmul.f32 %v1508_v16, %v1428_v51 }
 0x6ad   :  { %v3178_v17 = vpop.permute.xlu0 %1436  ;;  %v3180_v11 = vpop.permute.xlu1 %1434  ;;  %v1464_v24 = vadd.f32 %v1462_v5, %v1417_v3  ;;  %v1465_v8 = vadd.f32 %v1463_v10, %v1418_v37  ;;  %v1511_v51 = vadd.f32 %v1509_v53, %v1471_v4  ;;  %v1474_v10 = vld [vmem:[#allocation2 + $0x380] sm:$0xff]  ;;  %v1623_v37 = vld [vmem:[#allocation2 + $0x5a8] sm:$0xff]  ;;  %v1584_v4 = vld [vmem:[#allocation2 + $0x578] sm:$0xff] }
 0x6ae   :  { %v1438_v34 = vsel %vm1323_vm8, %v3180_v11, %v3178_v17  ;;  %v1512_v50 = vadd.f32 %v1510_v49, %v1472_v36  ;;  %v1622_v3 = vld [vmem:[#allocation2 + $0x5a0] sm:$0xff]  ;;  %v1630_v53 = vld [vmem:[#allocation2 + $0x5b8] sm:$0xff] }
 0x6af   :  { %v1504_v18 = vadd.f32 %v1502_v21, %v1464_v24  ;;  %v1505_v56 = vadd.f32 %v1503_v43, %v1465_v8  ;;  %v3257_v29 = vmul.f32 %v1438_v34, %v1433_v23  ;;  %v3259_v19 = vmul.f32 %v1514_v32, %v1438_v34  ;;  %v1629_v43 = vld [vmem:[#allocation2 + $0x5b0] sm:$0xff]  ;;  %v1658_v32 = vld [vmem:[#allocation2 + $0x5f8] sm:$0xff] }
 0x6b0   :  { %v1657_v23 = vld [vmem:[#allocation2 + $0x5f0] sm:$0xff] }
 0x6b1   :  { %v3187_v28 = vpop.permute.xlu0 %1478  ;;  %v3189_v1 = vpop.permute.xlu1 %1476  ;;  %v3267_v36 = vadd.f32 %v1511_v51, %v1504_v18  ;;  %v3269_v24 = vadd.f32 %v1512_v50, %v1505_v56  ;;  %v1596_v50 = vld [vmem:[#allocation2 + $0x580] sm:$0xff]  ;;  %v1597_v18 = vld [vmem:[#allocation2 + $0x588] sm:$0xff] }
 0x6b2   :  { %v1480_v38 = vsel %vm784_vm4, %v3189_v1, %v3187_v28  ;;  %v1678_v56 = vld [vmem:[#allocation2 + $0x620] sm:$0xff] }
 0x6b3   :  { %v3271_v8 = vmul.f32 %v1480_v38, %v1474_v10 }
 0x6b5   :  { %v1535_v63 = vpop.permute.xlu0 %1534  ;;  %v1533_v33 = vpop.permute.xlu1 %1532 }
 0x6b6   :  { %v3209_v46 = vsel %vm585_vm6, %v1533_v33, %v1535_v63  ;;  %v3213_v22 = vsel %vm585_vm6, %v1535_v63, %v1533_v33  ;;  %v1439_v63 = vsel %vm1323_vm8, %v3178_v17, %v3180_v11  ;;  %v1475_v33 = vld [vmem:[#allocation2 + $0x388] sm:$0xff]  ;;  %v1481_v17 = vsel %vm784_vm4, %v3187_v28, %v3189_v1 }
 0x6b7   :  { %v1538_v61 = vmul.f32 %v3209_v46, %v1530_v14  ;;  %v1539_v2 = vmul.f32 %v3213_v22, %v1531_v45  ;;  %v3255_v42 = vmul.f32 %v1439_v63, %v1432_v31  ;;  %v3261_v54 = vmul.f32 %v1515_v59, %v1439_v63  ;;  %v1543_v14 = vld [vmem:[#allocation2 + $0x530] sm:$0xff] }
 0x6b8   :  { %v1625_v21 = vmul.f32 %v1623_v37, %v3209_v46 }
 0x6b9   :  { %v1575_v13 = vpop.permute.xlu0 %1574  ;;  %v1573_v52 = vpop.permute.xlu1 %1572  ;;  %v1540_v11 = vadd.f32 %v1538_v61, %v1527_v55  ;;  %v1541_v40 = vadd.f32 %v1539_v2, %v1528_v9  ;;  %v1624_v2 = vmul.f32 %v1622_v3, %v3213_v22 }
 0x6ba   :  { %v3231_v12 = vsel %vm854_vm11, %v1573_v52, %v1575_v13  ;;  %v3235_v57 = vsel %vm854_vm11, %v1575_v13, %v1573_v52  ;;  %v1583_v13 = vld [vmem:[#allocation2 + $0x570] sm:$0xff]  ;;  %v1651_v52 = vld [vmem:[#allocation2 + $0x5e8] sm:$0xff] }
 0x6bb   :  { %v1578_v0 = vmul.f32 %v3235_v57, %v1570_v47  ;;  %v1579_v62 = vmul.f32 %v3231_v12, %v1571_v27  ;;  %v3273_v47 = vmul.f32 %v1481_v17, %v1475_v33  ;;  %v1650_v27 = vld [vmem:[#allocation2 + $0x5e0] sm:$0xff] }
 0x6bd   :  { %v1548_v41 = vpop.permute.xlu0 %1547  ;;  %v1546_v5 = vpop.permute.xlu1 %1545  ;;  %v1580_v45 = vadd.f32 %v1578_v0, %v1540_v11  ;;  %v1581_v39 = vadd.f32 %v1579_v62, %v1541_v40  ;;  %v1652_v62 = vmul.f32 %v1650_v27, %v3231_v12  ;;  %v1685_v40 = vld [vmem:[#allocation2 + $0x630] sm:$0xff] }
 0x6be   :  { %v1549_v16 = vsel %vm651_vm10, %v1546_v5, %v1548_v41  ;;  %v1550_v28 = vsel %vm651_vm10, %v1548_v41, %v1546_v5  ;;  %v1653_v41 = vmul.f32 %v1651_v52, %v3235_v57  ;;  %v1679_v5 = vld [vmem:[#allocation2 + $0x628] sm:$0xff] }
 0x6bf   :  { %v1551_v55 = vmul.f32 %v1549_v16, %v1543_v14  ;;  %v1552_v9 = vmul.f32 %v1550_v28, %v1544_v48  ;;  %v1626_v63 = vadd.f32 %v1624_v2, %v1580_v45  ;;  %v1627_v0 = vadd.f32 %v1625_v21, %v1581_v39  ;;  %v1686_v39 = vld [vmem:[#allocation2 + $0x638] sm:$0xff] }
 0x6c0   :  { %v1631_v10 = vmul.f32 %v1629_v43, %v1550_v28  ;;  %v1632_v33 = vmul.f32 %v1630_v53, %v1549_v16  ;;  %v1681_v2 = vmul.f32 %v1679_v5, %v3213_v22  ;;  %v1609_v5 = vld [vmem:[#allocation2 + $0x590] sm:$0xff] }
 0x6c1   :  { %v1588_v1 = vpop.permute.xlu0 %1587  ;;  %v1586_v61 = vpop.permute.xlu1 %1585  ;;  %v1654_v21 = vadd.f32 %v1652_v62, %v1626_v63  ;;  %v1655_v43 = vadd.f32 %v1653_v41, %v1627_v0  ;;  %v1559_v63 = vld [vmem:[#allocation2 + $0x550] sm:$0xff]  ;;  %v1560_v0 = vld [vmem:[#allocation2 + $0x558] sm:$0xff] }
 0x6c2   :  { %v1589_v49 = vsel %vm1390_vm9, %v1586_v61, %v1588_v1  ;;  %v1590_v31 = vsel %vm1390_vm9, %v1588_v1, %v1586_v61  ;;  %v1680_v61 = vmul.f32 %v1678_v56, %v3209_v46 }
 0x6c3   :  { %v1591_v59 = vmul.f32 %v1590_v31, %v1583_v13  ;;  %v1592_v34 = vmul.f32 %v1589_v49, %v1584_v4  ;;  %v1659_v3 = vmul.f32 %v1657_v23, %v1589_v49  ;;  %v1660_v37 = vmul.f32 %v1658_v32, %v1590_v31  ;;  %v1664_v13 = vld [vmem:[#allocation2 + $0x600] sm:$0xff]  ;;  %v1665_v4 = vld [vmem:[#allocation2 + $0x608] sm:$0xff] }
 0x6c4   :  { %v1706_v49 = vld [vmem:[#allocation2 + $0x660] sm:$0xff]  ;;  %v1707_v31 = vld [vmem:[#allocation2 + $0x668] sm:$0xff]  ;;  %v1683_v56 = vadd.f32 %v1681_v2, %v1655_v43  ;;  %v1700_v43 = vld [vmem:[#allocation2 + $0x658] sm:$0xff] }
 0x6c5   :  { %v1601_v51 = vpop.permute.xlu0 %1600  ;;  %v1593_v38 = vadd.f32 %v1591_v59, %v1551_v55  ;;  %v1594_v17 = vadd.f32 %v1592_v34, %v1552_v9  ;;  %v1599_v11 = vpop.permute.xlu1 %1598  ;;  %v1687_v34 = vmul.f32 %v1685_v40, %v1549_v16  ;;  %v1709_v16 = vmul.f32 %v1707_v31, %v3231_v12  ;;  %v1644_v40 = vld [vmem:[#allocation2 + $0x5d8] sm:$0xff] }
 0x6c6   :  { %v1602_v14 = vsel %vm1426_vm12, %v1599_v11, %v1601_v51  ;;  %v1603_v45 = vsel %vm1426_vm12, %v1601_v51, %v1599_v11  ;;  %v1688_v51 = vmul.f32 %v1686_v39, %v1550_v28  ;;  %v1643_v11 = vld [vmem:[#allocation2 + $0x5d0] sm:$0xff] }
 0x6c7   :  { %v1633_v48 = vadd.f32 %v1631_v10, %v1593_v38  ;;  %v1634_v1 = vadd.f32 %v1632_v33, %v1594_v17  ;;  %v1604_v27 = vmul.f32 %v1603_v45, %v1596_v50  ;;  %v1605_v52 = vmul.f32 %v1602_v14, %v1597_v18  ;;  %v1610_v10 = vld [vmem:[#allocation2 + $0x598] sm:$0xff]  ;;  %v1671_v39 = vld [vmem:[#allocation2 + $0x610] sm:$0xff] }
 0x6c8   :  { %v1666_v50 = vmul.f32 %v1664_v13, %v1602_v14  ;;  %v1667_v18 = vmul.f32 %v1665_v4, %v1603_v45  ;;  %v1484_v4 = vadd.f32 %v3271_v8, %v3255_v42  ;;  %v1443_v42 = vld [vmem:[#allocation2 + $0x350] sm:$0xff]  ;;  %v1444_v8 = vld [vmem:[#allocation2 + $0x358] sm:$0xff] }
 0x6c9   :  { %v1564_v53 = vpop.permute.xlu0 %1563  ;;  %v1661_v55 = vadd.f32 %v1659_v3, %v1633_v48  ;;  %v1662_v9 = vadd.f32 %v1660_v37, %v1634_v1  ;;  %v1606_v23 = vadd.f32 %v1604_v27, %v3202_v30  ;;  %v1607_v32 = vadd.f32 %v1605_v52, %v3205_v7  ;;  %v1562_v59 = vpop.permute.xlu1 %1561  ;;  %v1672_v48 = vld [vmem:[#allocation2 + $0x618] sm:$0xff] }
 0x6ca   :  { %v1565_v62 = vsel %vm784_vm4, %v1562_v59, %v1564_v53  ;;  %v1566_v41 = vsel %vm784_vm4, %v1564_v53, %v1562_v59  ;;  %v1682_v30 = vadd.f32 %v1680_v61, %v1654_v21  ;;  %v1708_v7 = vmul.f32 %v1706_v49, %v3235_v57  ;;  %v1699_v21 = vld [vmem:[#allocation2 + $0x650] sm:$0xff] }
 0x6cb   :  { %v1640_v46 = vadd.f32 %v3216_v58, %v1606_v23  ;;  %v1641_v22 = vadd.f32 %v3219_v25, %v1607_v32  ;;  %v1689_v58 = vadd.f32 %v1687_v34, %v1661_v55  ;;  %v1690_v33 = vadd.f32 %v1688_v51, %v1662_v9 }
 0x6cc   :  { %v1567_v3 = vmul.f32 %v1566_v41, %v1559_v63  ;;  %v1568_v37 = vmul.f32 %v1565_v62, %v1560_v0  ;;  %v1485_v27 = vadd.f32 %v3273_v47, %v3257_v29  ;;  %v1710_v52 = vadd.f32 %v1708_v7, %v1682_v30  ;;  %v1487_v63 = vld [vmem:[#allocation2 + $0x390] sm:$0xff]  ;;  %v1488_v0 = vld [vmem:[#allocation2 + $0x398] sm:$0xff] }
 0x6cd   :  { %v1614_v28 = vpop.permute.xlu0 %1613  ;;  %v1668_v25 = vadd.f32 %v1666_v50, %v1640_v46  ;;  %v1669_v38 = vadd.f32 %v1667_v18, %v1641_v22  ;;  %v1612_v17 = vpop.permute.xlu1 %1611  ;;  %v1711_v61 = vadd.f32 %v1709_v16, %v1683_v56  ;;  %v1645_v53 = vmul.f32 %v1643_v11, %v1565_v62 }
 0x6ce   :  { %v1615_v14 = vsel %vm1323_vm8, %v1612_v17, %v1614_v28  ;;  %v1616_v57 = vsel %vm1323_vm8, %v1614_v28, %v1612_v17  ;;  %v1646_v49 = vmul.f32 %v1644_v40, %v1566_v41  ;;  %v1712_v55 = vadd.f32 %v1710_v52, %v1689_v58 }
 0x6cf   :  { %v1696_v12 = vadd.f32 %v3222_v26, %v1668_v25  ;;  %v1697_v45 = vadd.f32 %v3225_v60, %v1669_v38  ;;  %v1617_v1 = vmul.f32 %v1616_v57, %v1609_v5  ;;  %v1618_v13 = vmul.f32 %v1615_v14, %v1610_v10 }
 0x6d0   :  { %v1713_v9 = vadd.f32 %v1711_v61, %v1690_v33  ;;  %v1673_v23 = vmul.f32 %v1671_v39, %v1615_v14  ;;  %v1674_v32 = vmul.f32 %v1672_v48, %v1616_v57  ;;  %v1518_v51 = vadd.f32 %v3259_v19, %v1484_v4  ;;  %v3377_v4 = vld [vmem:[#allocation10_spill] sm:$0xff] }
 0x6d1   :  { %v1448_v2 = vpop.permute.xlu0 %1447  ;;  %v1619_v26 = vadd.f32 %v1617_v1, %v1567_v3  ;;  %v1620_v31 = vadd.f32 %v1618_v13, %v1568_v37  ;;  %v1446_v60 = vpop.permute.xlu1 %1445  ;;  %v1519_v50 = vadd.f32 %v3261_v54, %v1485_v27  ;;  %v1701_v18 = vmul.f32 %v1699_v21, %v1566_v41  ;;  %v3378_v27 = vld [vmem:[#allocation9_spill] sm:$0xff] }
 0x6d2   :  { %v1449_v29 = vsel %vm585_vm6, %v1446_v60, %v1448_v2  ;;  %v1450_v47 = vsel %vm585_vm6, %v1448_v2, %v1446_v60  ;;  %v1702_v46 = vmul.f32 %v1700_v43, %v1565_v62  ;;  %v1714_v30 = vadd.f32 %v1712_v55, %v1696_v12 }
 0x6d3   :  { %v1647_v59 = vadd.f32 %v1645_v53, %v1619_v26  ;;  %v1648_v34 = vadd.f32 %v1646_v49, %v1620_v31  ;;  %v1715_v56 = vadd.f32 %v1713_v9, %v1697_v45  ;;  %v1451_v5 = vmul.f32 %v1450_v47, %v1443_v42 }
 0x6d4   :  { %v1452_v10 = vmul.f32 %v1449_v29, %v1444_v8  ;;  %v1522_v25 = vadd.f32 %v3267_v36, %v1518_v51  ;;  %v1523_v38 = vadd.f32 %v3269_v24, %v1519_v50  ;;  %v2052_v36 = vld [vmem:[%s3357_s8] sm:$0xff]  ;;  %v3375_v24 = vmov 0.0   ;;  %s1876_s8 = sshll.u32 %s2148_s23, 4  ;;  %s1877_s8 = int_to_ptr.vmem [resolvable:$true] %s1876_s8 }
 0x6d5   :  { %v1492_v22 = vpop.permute.xlu0 %1491  ;;  %v1675_v7 = vadd.f32 %v1673_v23, %v1647_v59  ;;  %v1676_v16 = vadd.f32 %v1674_v32, %v1648_v34  ;;  %v1490_v28 = vpop.permute.xlu1 %1489  ;;  %s2075_s24 = scalar_lea.vmem %s1877_s8, 256  ;;  %p2080_p9 = scmp.lt.s32.totalorder %s1877_s8, %s1877_s8 }
 0x6d6   :  { %v1493_v58 = vsel %vm854_vm11, %v1490_v28, %v1492_v22  ;;  %v1494_v19 = vsel %vm854_vm11, %v1492_v22, %v1490_v28  ;;  %p2076_p8 = scmp.ne.s32.totalorder %s1877_s8, %s2075_s24  ;;  %p2081_p10 = scmp.lt.s32.totalorder %s2075_s24, %s2075_s24 }
 0x6d7   :  { %v1703_v33 = vadd.f32 %v1701_v18, %v1675_v7  ;;  %v1704_v54 = vadd.f32 %v1702_v46, %v1676_v16  ;;  %v1495_v41 = vmul.f32 %v1493_v58, %v1487_v63  ;;  %v1496_v62 = vmul.f32 %v1494_v19, %v1488_v0 }
 0x6d8   :  { %p2082_p11 = por %p2081_p10, %p2080_p9 }
 0x6d9   :  { %v1716_v17 = vadd.f32 %v1714_v30, %v1703_v33  ;;  %v1497_v11 = vadd.f32 %v1495_v41, %v1451_v5  ;;  %v1498_v40 = vadd.f32 %v1496_v62, %v1452_v10  ;;  %v1717_v3 = vadd.f32 %v1715_v56, %v1704_v54 }
 0x6da   :  { %p2083_p12 = pnand %p2082_p11, %p2076_p8 }
 0x6db   :  { %v1524_v37 = vadd.f32 %v1522_v25, %v1497_v11  ;;  %v1525_v14 = vadd.f32 %v1523_v38, %v1498_v40  ;;  %v1721_v20 = vadd.f32 %v1717_v3, %v2739_v15  ;;  %v1720_v45 = vadd.f32 %v1716_v17, %v2737_v6 }
 0x6dd   :  { %v1718_v57 = vadd.f32 %v1524_v37, %v3174_v35  ;;  %v1719_v12 = vadd.f32 %v1525_v14, %v3176_v44  ;;  %v3376_v35 = vld [vmem:[#allocation8_spill] sm:$0xff] }
 0x6df   :  { %v1723_v39 = vadd.f32 %v1721_v20, %v1719_v12  ;;  %v1722_v48 = vadd.f32 %v1720_v45, %v1718_v57 }
 0x6e1   :  { %1724 = vmatprep.subr.mxu1 %v1723_v39 }
 0x6e2   :  { %1725 = vmatpush1.msra.mxu1 %v1722_v48 }
 0x6e3   :  { %1894 = vmatmul.mubr.msk.f32.vlgmr.msra.gmra.mrb[10].mxu1 %vm171_vm0, %v2052_v36 }
 0x6e4   :  { %1861 = vmatprep.mubr.f32.mxu1 %v3375_v24 }
 0x7b6   :  { %v1790_v1 = vpop.f32.mrb[10].mxu1 }
 0x7b7   :  { %v1791_v13 = vadd.f32 %v1790_v1, %v3376_v35  ;;  %v1792_v44 = vpop.f32.mrb[11].mxu1 }
 0x7b8   :  { %v1793_v15 = vadd.f32 %v1792_v44, %v3376_v35 }
 0x7b9   :  { %v1795_v52 = vmul.f32 %v1791_v13, %v3378_v27 }
 0x7ba   :  { %v1796_v6 = vmul.f32 %v1793_v15, %v3377_v4 }
 0x7bc   :  { %1797 = vmatprep.subr.mxu1 %v1796_v6 }
 0x7bd   :  { %1798 = vmatpush1.msra.mxu1 %v1795_v52 }
 0x7be   :  { %1895 = vmatmul.mubr.msk.f32.vlgmr.msra.gmra.mrb[12].mxu1 %vm171_vm0, %v2052_v36 }
 0x891   :  { %v1863_v61 = vpop.f32.mrb[12].mxu1 }
 0x892   :  { %v1864_v2 = vadd.f32 %v1863_v61, %v3376_v35  ;;  %v1865_v21 = vpop.f32.mrb[13].mxu1 }
 0x893   :  { %v1866_v43 = vadd.f32 %v1865_v21, %v3376_v35 }
 0x894   :  { %1868 = vst [vmem:[#allocation5] sm:$0xff] %v1864_v2 }
 0x895   :  { %1869 = vst [vmem:[#allocation5 + $0x8] sm:$0xff] %v1866_v43 }
 0x896   :  { %2086 = shalt.err (!%p2083_p12)
}
 0x897   :  { %s2087_s0 = scalar_lea.hbm %s3360_s11, 256 }
 0x898   :  { %p2088_p13 = scmp.ne.s32.totalorder %s3360_s11, %s2087_s0  ;;  %p2091_p0 = scmp.lt.u32.totalorder %s2087_s0, %s3360_s11 }
 0x89a   :  { %p2093_p1 = pnand %p2091_p0, %p2088_p13 }
 0x89c   :  { %2096 = shalt.err (!%p2093_p1)
}
 0x89d   :  { %1879 = dma.vmem_to_hbm [thread:$0]  %s1877_s8, 256, %s3360_s11, [#allocation4]  }
 0x89e   :  { %2099 = dma.done.wait [#allocation4], 256  }
 0x89f   :  { %2100 = vsyncadd [#allocation4], 4294967040 }
 0x8a0   :  { %1883 = vsyncpa [#allocation3], 1 }
 0x8a1   :  { %1884 = vsyncpa [#allocation4], 1 }

</bundles_post_ra>
